<compile_context>
chip_gen: v5e
topology: v5e:2x2
jax: 0.10.0
libtpu: 0.0.40
codegen_flags: <defaults>
</compile_context>

<pallas_src>
import functools

import jax
import jax.numpy as jnp
from jax import lax
from jax.experimental import pallas as pl
from jax.experimental.pallas import tpu as pltpu

LANE = 128


def _round_up(x, m):
    return (x + m - 1) // m * m


def _vmem_capacity_bytes():
    try:
        return int(pltpu.get_tpu_info().vmem_capacity_bytes)
    except Exception:
        return 64 * 1024 * 1024          # v7x per-TC VMEM (smallest generation)


# ----------------------------------------------------------------------------
# Fused 3x3-conv (+ optional input BN-affine+ReLU) + partial-BN-stats kernel
# ----------------------------------------------------------------------------
def _conv_bn_kernel(xm_ref, xt_ref, xb_ref, w_ref, b_ref, scale_ref, shift_ref,
                    o_ref, sum_ref, sq_ref, xpad_ref,
                    *, tile_h, width, apply_input_bn_relu):
    """One grid step = (batch n, row-tile i).

    xm_ref       : (tile_h, W, Cin_p)   bf16  main rows of this tile
    xt_ref/xb_ref: (1, W, Cin_p)        bf16  top / bottom halo row (clamped)
    w_ref        : (3, 3*Cin_p, Cout_p) bf16  taps, K layout = (kx, cin)
    b_ref        : (1, Cout_p)          f32
    scale/shift  : (1, Cin_p)           f32   previous layer's folded BN
    o_ref        : (tile_h*W, Cout_p)   bf16  pre-BN conv output rows
    sum_ref/sq_ref: (1, Cout_p)         f32   per-(n, tile) partial BN stats
    xpad_ref     : (tile_h+2, W+2, Cin_p) bf16 VMEM scratch (padded halo tile)
    """
    i = pl.program_id(1)
    last = pl.num_programs(1) - 1
    th, w = tile_h, width
    cin = xm_ref.shape[-1]
    cout = o_ref.shape[-1]
    m = th * w

    def prep(v, valid):
        # BN(previous layer) + ReLU is applied *before* the conv zero padding,
        # matching the reference (pad acts on the already-activated tensor).
        if apply_input_bn_relu:
            v = jnp.maximum(
                v.astype(jnp.float32) * scale_ref[...] + shift_ref[...], 0.0)
        if valid is not None:
            v = jnp.where(valid, v, jnp.zeros_like(v))
        return v.astype(jnp.bfloat16)

    # Assemble the spatially padded (th+2, W+2, Cin) halo tile in VMEM.
    zcol = jnp.zeros((th + 2, 1, cin), jnp.bfloat16)
    xpad_ref[:, 0:1, :] = zcol                       # left conv padding
    xpad_ref[:, w + 1:w + 2, :] = zcol               # right conv padding
    xpad_ref[0:1, 1:w + 1, :] = prep(xt_ref[...], i > 0)        # top halo
    xpad_ref[1:th + 1, 1:w + 1, :] = prep(xm_ref[...], None)    # main rows
    xpad_ref[th + 1:th + 2, 1:w + 1, :] = prep(xb_ref[...], i < last)

    x = xpad_ref[...]                                # (th+2, W+2, Cin) bf16

    # 3x3 conv as 3 MXU matmuls with K = 3*Cin (kx-im2col built in VMEM).
    acc = jnp.broadcast_to(b_ref[...], (m, cout)).astype(jnp.float32)
    for dy in range(3):
        col = jnp.concatenate(
            [x[dy:dy + th, 0:w, :],
             x[dy:dy + th, 1:w + 1, :],
             x[dy:dy + th, 2:w + 2, :]], axis=-1).reshape(m, 3 * cin)
        acc = acc + jnp.dot(col, w_ref[dy], preferred_element_type=jnp.float32)

    # Per-(batch, row-tile) partial BatchNorm statistics (f32, pre-cast).
    sum_ref[...] = jnp.sum(acc, axis=0, keepdims=True)
    sq_ref[...] = jnp.sum(acc * acc, axis=0, keepdims=True)

    o_ref[...] = acc.astype(o_ref.dtype)


def _affine_relu_kernel(x_ref, scale_ref, shift_ref, o_ref):
    o_ref[...] = jnp.maximum(
        x_ref[...].astype(jnp.float32) * scale_ref[...] + shift_ref[...],
        0.0).astype(o_ref.dtype)


# ----------------------------------------------------------------------------
# Wrappers around pallas_call
# ----------------------------------------------------------------------------
def conv3x3_bn_stats(x_nhwc, w3, bias_p, scale=None, shift=None, *,
                     tile_h, vmem_limit):
    """3x3 conv (stride 1, pad 1) with fused optional input BN+ReLU and fused
    per-tile BN statistics.  Channel dims must be pre-padded to LANE; the
    activation is bf16 and spatially *unpadded* (halo handled in-kernel)."""
    N, H, W, Cin_p = x_nhwc.shape
    Cout_p = w3.shape[-1]
    assert H % tile_h == 0
    nt = H // tile_h
    HW = H * W

    fused = scale is not None
    if scale is None:
        scale = jnp.ones((1, Cin_p), jnp.float32)
        shift = jnp.zeros((1, Cin_p), jnp.float32)
    b2d = bias_p.reshape(1, Cout_p).astype(jnp.float32)

    kern = functools.partial(_conv_bn_kernel, tile_h=tile_h, width=W,
                             apply_input_bn_relu=fused)

    flops = 2 * N * HW * 9 * Cin_p * Cout_p
    bytes_accessed = (N * HW * Cin_p * 2 + 2 * N * nt * W * Cin_p * 2
                      + w3.size * 2 + N * HW * Cout_p * 2
                      + 2 * N * nt * Cout_p * 4)

    # TODO(synk): pl.Buffered(1) on the constant-index operands (weights /
    # bias / scale / shift) would save one weight copy of VMEM on v7x.
    out, ssum, ssq = pl.pallas_call(
        kern,
        grid=(N, nt),
        in_specs=[
            pl.BlockSpec((None, tile_h, W, Cin_p), lambda n, i: (n, i, 0, 0)),
            pl.BlockSpec((None, 1, W, Cin_p),
                         lambda n, i: (n, jnp.maximum(i * tile_h - 1, 0), 0, 0)),
            pl.BlockSpec((None, 1, W, Cin_p),
                         lambda n, i: (n, jnp.minimum((i + 1) * tile_h, H - 1),
                                       0, 0)),
            pl.BlockSpec((3, 3 * Cin_p, Cout_p), lambda n, i: (0, 0, 0)),
            pl.BlockSpec((1, Cout_p), lambda n, i: (0, 0)),
            pl.BlockSpec((1, Cin_p), lambda n, i: (0, 0)),
            pl.BlockSpec((1, Cin_p), lambda n, i: (0, 0)),
        ],
        out_specs=(
            pl.BlockSpec((None, tile_h * W, Cout_p), lambda n, i: (n, i, 0)),
            pl.BlockSpec((None, None, 1, Cout_p), lambda n, i: (n, i, 0, 0)),
            pl.BlockSpec((None, None, 1, Cout_p), lambda n, i: (n, i, 0, 0)),
        ),
        out_shape=(
            jax.ShapeDtypeStruct((N, HW, Cout_p), jnp.bfloat16),
            jax.ShapeDtypeStruct((N, nt, 1, Cout_p), jnp.float32),
            jax.ShapeDtypeStruct((N, nt, 1, Cout_p), jnp.float32),
        ),
        scratch_shapes=[pltpu.VMEM((tile_h + 2, W + 2, Cin_p), jnp.bfloat16)],
        compiler_params=pltpu.CompilerParams(
            dimension_semantics=("parallel", "parallel"),
            vmem_limit_bytes=vmem_limit),
        cost_estimate=pl.CostEstimate(flops=flops, transcendentals=0,
                                      bytes_accessed=bytes_accessed),
    )(x_nhwc, x_nhwc, x_nhwc, w3, b2d, scale, shift)
    return out, ssum, ssq


def affine_relu(x, scale, shift, *, block_rows, vmem_limit):
    """Final fused BN-affine + ReLU (no following conv to fuse into)."""
    N, R, C = x.shape
    assert R % block_rows == 0
    nt = R // block_rows
    return pl.pallas_call(
        _affine_relu_kernel,
        grid=(N, nt),
        in_specs=[
            pl.BlockSpec((None, block_rows, C), lambda n, i: (n, i, 0)),
            pl.BlockSpec((1, C), lambda n, i: (0, 0)),
            pl.BlockSpec((1, C), lambda n, i: (0, 0)),
        ],
        out_specs=pl.BlockSpec((None, block_rows, C), lambda n, i: (n, i, 0)),
        out_shape=jax.ShapeDtypeStruct((N, R, C), jnp.float32),
        compiler_params=pltpu.CompilerParams(
            dimension_semantics=("parallel", "parallel"),
            vmem_limit_bytes=vmem_limit),
    )(x, scale, shift)


def _bn_scale_shift(ssum, ssq, count, gamma_p, beta_p, eps=1e-5):
    # Training-mode BN: batch statistics, biased variance.
    # TODO(synk): single-pass E[x^2]-E[x]^2 can lose precision if activations
    # ever develop a large mean/std ratio; switch to Welford if needed.
    s = jnp.sum(ssum, axis=(0, 1, 2))            # (Cp,)
    q = jnp.sum(ssq, axis=(0, 1, 2))
    mean = s / count
    var = jnp.maximum(q / count - mean * mean, 0.0)
    scale = gamma_p * lax.rsqrt(var + eps)
    shift = beta_p - mean * scale
    return scale.reshape(1, -1), shift.reshape(1, -1)


# ----------------------------------------------------------------------------
# Bilinear x2 upsample (align_corners=True) as two dense matmuls (no gathers)
# ----------------------------------------------------------------------------
def _resize_matrix(n_in, n_out):
    if n_in == 1:
        return jnp.ones((n_out, 1), jnp.float32)
    src = jnp.arange(n_out, dtype=jnp.float32) * ((n_in - 1) / (n_out - 1))
    i0 = jnp.clip(jnp.floor(src).astype(jnp.int32), 0, n_in - 1)
    i1 = jnp.clip(i0 + 1, 0, n_in - 1)
    f = src - i0.astype(jnp.float32)
    cols = jnp.arange(n_in, dtype=jnp.int32)[None, :]
    return ((cols == i0[:, None]).astype(jnp.float32) * (1.0 - f)[:, None]
            + (cols == i1[:, None]).astype(jnp.float32) * f[:, None])


def upsample_bilinear_x2_align_corners(x_nhwc):
    N, H, W, C = x_nhwc.shape
    ay = _resize_matrix(H, 2 * H)
    ax = _resize_matrix(W, 2 * W)
    t = jnp.einsum('Oh,nhwc->nOwc', ay, x_nhwc)
    return jnp.einsum('Ow,nhwc->nhOc', ax, t)


# ----------------------------------------------------------------------------
# Parameter padding / tiling helpers
# ----------------------------------------------------------------------------
def _pad_conv_weight(w_hwio, cin_p, cout_p):
    """HWIO (3,3,Cin,Cout) -> (3, 3*Cin_p, Cout_p) bf16, K layout (kx, cin)."""
    kh, kw, cin, cout = w_hwio.shape
    wp = jnp.zeros((kh, kw, cin_p, cout_p), jnp.float32)
    wp = wp.at[:, :, :cin, :cout].set(w_hwio.astype(jnp.float32))
    return wp.reshape(kh, kw * cin_p, cout_p).astype(jnp.bfloat16)


def _pad_vec(v, cp):
    return jnp.pad(v.astype(jnp.float32), (0, cp - v.shape[0]))


def _conv_vmem_bytes(tile_h, w, cin_p, cout_p):
    """Per-step VMEM working set of the conv kernel (incl. temporaries)."""
    m = tile_h * w
    x_in = 2 * (tile_h + 2) * w * cin_p * 2        # double-buffered input views
    xpad = (tile_h + 2) * (w + 2) * cin_p * 2      # scratch halo tile (bf16)
    bnf = m * cin_p * 4                            # BN/ReLU f32 temporary
    col = 2 * m * 3 * cin_p * 2                    # im2col temporaries
    acc = m * cout_p * 4                           # f32 accumulator
    o_buf = 2 * m * cout_p * 2                     # double-buffered bf16 output
    wgt = 2 * 9 * cin_p * cout_p * 2               # double-buffered weights
    return x_in + xpad + bnf + col + acc + o_buf + wgt + (2 << 20)


def _pick_tile_h(h, w, cin_p, cout_p, budget_bytes):
    """Divisor of H whose working set fits VMEM, steering tile_h*W to 512-8192
    rows so the matmul M dim fills the MXU."""
    cands = [d for d in range(1, h + 1) if h % d == 0 and (d * w) % 8 == 0]
    if not cands:
        return h
    fitting = [d for d in cands
               if _conv_vmem_bytes(d, w, cin_p, cout_p) <= budget_bytes]
    if not fitting:
        return min(cands)          # degrade; vmem_limit is raised to match
    preferred = [d for d in fitting if 512 <= d * w <= 8192]
    return max(preferred) if preferred else max(fitting)


def _pick_block_rows(total_rows, c, budget_bytes=16 * 1024 * 1024):
    """Block size for the elementwise BN+ReLU pass (decoupled from the conv)."""
    cands = [d for d in range(1, total_rows + 1)
             if total_rows % d == 0 and (d % 8 == 0 or d == total_rows)]
    fitting = [d for d in cands if d * c * (2 + 4) * 2 <= budget_bytes]
    return max(fitting) if fitting else min(cands)


# ----------------------------------------------------------------------------
# `up` module forward (Pallas path)
# ----------------------------------------------------------------------------
def up_forward(x1_nchw, x2_nchw, params, *, tile_h=None):
    # NCHW -> NHWC
    x1 = jnp.transpose(x1_nchw, (0, 2, 3, 1)).astype(jnp.float32)
    x2 = jnp.transpose(x2_nchw, (0, 2, 3, 1)).astype(jnp.float32)

    x1u = upsample_bilinear_x2_align_corners(x1)
    diffY = x1u.shape[1] - x2.shape[1]
    diffX = x1u.shape[2] - x2.shape[2]
    x2p = jnp.pad(x2, ((0, 0), (diffY // 2, diffY - diffY // 2),
                       (diffX // 2, diffX - diffX // 2), (0, 0)))
    # TODO(synk): feed x2p / x1u to conv1 as two separate K-slabs instead of
    # materializing the channel concat (saves one HBM pass over the conv1 input).
    x = jnp.concatenate([x2p, x1u], axis=-1)        # cat([x2, x1], dim=C)
    N, H, W, Cin = x.shape
    Cin_p = _round_up(Cin, LANE)
    x = jnp.pad(x, ((0, 0), (0, 0), (0, 0),
                    (0, Cin_p - Cin))).astype(jnp.bfloat16)

    out_ch = params["g1"].shape[0]
    Cout_p = _round_up(out_ch, LANE)

    cap = _vmem_capacity_bytes()
    tile_budget = min(cap // 3, 40 * 1024 * 1024)
    if tile_h is None:
        tile_h = _pick_tile_h(H, W, max(Cin_p, Cout_p), Cout_p, tile_budget)
    assert H % tile_h == 0

    need = _conv_vmem_bytes(tile_h, W, max(Cin_p, Cout_p), Cout_p) + (4 << 20)
    vmem_limit = int(min(max(min(cap * 3 // 4, 96 << 20), need),
                         int(cap * 0.9)))

    w1 = _pad_conv_weight(params["w1"], Cin_p, Cout_p)
    b1 = _pad_vec(params["b1"], Cout_p)
    w2 = _pad_conv_weight(params["w2"], Cout_p, Cout_p)
    b2 = _pad_vec(params["b2"], Cout_p)
    g1, bt1 = _pad_vec(params["g1"], Cout_p), _pad_vec(params["bt1"], Cout_p)
    g2, bt2 = _pad_vec(params["g2"], Cout_p), _pad_vec(params["bt2"], Cout_p)

    count = float(N * H * W)

    # conv1 (+ per-tile BN1 statistics fused into the kernel)
    y1, s1, q1 = conv3x3_bn_stats(x, w1, b1, tile_h=tile_h,
                                  vmem_limit=vmem_limit)
    scale1, shift1 = _bn_scale_shift(s1, q1, count, g1, bt1)

    # conv2 (applies BN1 affine + ReLU on its input tiles; BN2 stats fused)
    y2, s2, q2 = conv3x3_bn_stats(y1.reshape(N, H, W, Cout_p), w2, b2,
                                  scale1, shift1, tile_h=tile_h,
                                  vmem_limit=vmem_limit)
    scale2, shift2 = _bn_scale_shift(s2, q2, count, g2, bt2)

    # final BN2 affine + ReLU (own, larger block size)
    block_rows = _pick_block_rows(H * W, Cout_p)
    y2a = affine_relu(y2, scale2, shift2, block_rows=block_rows,
                      vmem_limit=vmem_limit)

    out = y2a.reshape(N, H, W, Cout_p)[..., :out_ch]
    return jnp.transpose(out, (0, 3, 1, 2))         # back to NCHW


# ----------------------------------------------------------------------------
# Pure-JAX reference (independent correctness check)
# ----------------------------------------------------------------------------
def _upsample_ref(x):
    N, H, W, C = x.shape

    def lin_idx(n_in, n_out):
        if n_in == 1:
            z = jnp.zeros((n_out,), jnp.int32)
            return z, z, jnp.zeros((n_out,), jnp.float32)
        src = jnp.arange(n_out, dtype=jnp.float32) * (n_in - 1) / (n_out - 1)
        i0 = jnp.clip(jnp.floor(src).astype(jnp.int32), 0, n_in - 1)
        i1 = jnp.clip(i0 + 1, 0, n_in - 1)
        return i0, i1, src - i0.astype(jnp.float32)

    y0, y1, fy = lin_idx(H, 2 * H)
    x0, x1, fx = lin_idx(W, 2 * W)
    rows = (x[:, y0] * (1.0 - fy)[None, :, None, None]
            + x[:, y1] * fy[None, :, None, None])
    return (rows[:, :, x0] * (1.0 - fx)[None, None, :, None]
            + rows[:, :, x1] * fx[None, None, :, None])


def up_forward_ref(x1_nchw, x2_nchw, params):
    x1 = jnp.transpose(x1_nchw, (0, 2, 3, 1)).astype(jnp.float32)
    x2 = jnp.transpose(x2_nchw, (0, 2, 3, 1)).astype(jnp.float32)
    x1u = _upsample_ref(x1)
    diffY = x1u.shape[1] - x2.shape[1]
    diffX = x1u.shape[2] - x2.shape[2]
    x2p = jnp.pad(x2, ((0, 0), (diffY // 2, diffY - diffY // 2),
                       (diffX // 2, diffX - diffX // 2), (0, 0)))
    x = jnp.concatenate([x2p, x1u], axis=-1)

    def conv(x, w, b):
        y = lax.conv_general_dilated(
            x, w, window_strides=(1, 1), padding="SAME",
            dimension_numbers=("NHWC", "HWIO", "NHWC"))
        return y + b[None, None, None, :]

    def bnrelu(x, g, bt, eps=1e-5):
        mean = x.mean(axis=(0, 1, 2))
        var = x.var(axis=(0, 1, 2))                  # biased
        y = (x - mean) / jnp.sqrt(var + eps) * g + bt
        return jnp.maximum(y, 0.0)

    h = bnrelu(conv(x, params["w1"], params["b1"]), params["g1"], params["bt1"])
    h = bnrelu(conv(h, params["w2"], params["b2"]), params["g2"], params["bt2"])
    return jnp.transpose(h, (0, 3, 1, 2))


# ----------------------------------------------------------------------------
# Deterministic parameter init (xavier_normal_ weights, zero bias, BN defaults)
# ----------------------------------------------------------------------------
def make_params(key, in_ch, out_ch):
    k1, k2 = jax.random.split(key)

    def xavier_conv(k, cin, cout, ksz=3):
        fan_in, fan_out = cin * ksz * ksz, cout * ksz * ksz
        std = (2.0 / (fan_in + fan_out)) ** 0.5
        w_oihw = jax.random.normal(k, (cout, cin, ksz, ksz), jnp.float32) * std
        return jnp.transpose(w_oihw, (2, 3, 1, 0))          # -> HWIO

    return {
        "w1": xavier_conv(k1, in_ch, out_ch),
        "b1": jnp.zeros((out_ch,), jnp.float32),
        "g1": jnp.ones((out_ch,), jnp.float32),
        "bt1": jnp.zeros((out_ch,), jnp.float32),
        "w2": xavier_conv(k2, out_ch, out_ch),
        "b2": jnp.zeros((out_ch,), jnp.float32),
        "g2": jnp.ones((out_ch,), jnp.float32),
        "bt2": jnp.zeros((out_ch,), jnp.float32),
    }


if __name__ == "__main__":
    key = jax.random.PRNGKey(0)
    k_x1, k_x2, k_p = jax.random.split(key, 3)

    # up(in_ch=8, out_ch=4): x1 is the low-res feature (in_ch//2 channels),
    # x2 is the skip connection (in_ch//2 channels).
    in_ch, out_ch = 8, 4
    x1 = jax.random.normal(k_x1, (2, in_ch // 2, 8, 8), jnp.float32)    # NCHW
    x2 = jax.random.normal(k_x2, (2, in_ch // 2, 16, 16), jnp.float32)  # NCHW
    params = make_params(k_p, in_ch, out_ch)

    # tile_h=8 -> two row tiles per batch element, exercising the halo-row
    # views and the per-tile BN-stats path of the fused conv kernel.
    up_fn = jax.jit(up_forward, static_argnames=("tile_h",))
    out = jax.block_until_ready(up_fn(x1, x2, params, tile_h=8))
    ref = jax.block_until_ready(up_forward_ref(x1, x2, params))

    assert out.shape == (2, out_ch, 16, 16), out.shape
    # bf16 MXU inputs + bf16 inter-layer activations -> scaled tolerance.
    err = float(jnp.max(jnp.abs(out - ref) / (1.0 + jnp.abs(ref))))
    assert err < 5e-2, err

    print("KERNEL_OK")
</pallas_src>

<mosaic_0001>
module attributes {stable_mosaic.version = 11 : i64} {
  func.func @_conv_bn_kernel(%arg0: i32, %arg1: i32, %arg2: memref<1x8x16x128xbf16, #tpu.memory_space<vmem>>, %arg3: memref<1x1x16x128xbf16, #tpu.memory_space<vmem>>, %arg4: memref<1x1x16x128xbf16, #tpu.memory_space<vmem>>, %arg5: memref<3x384x128xbf16, #tpu.memory_space<vmem>>, %arg6: memref<1x128xf32, #tpu.memory_space<vmem>>, %arg7: memref<1x128xf32, #tpu.memory_space<vmem>>, %arg8: memref<1x128xf32, #tpu.memory_space<vmem>>, %arg9: memref<1x128x128xbf16, #tpu.memory_space<vmem>>, %arg10: memref<1x1x1x128xf32, #tpu.memory_space<vmem>>, %arg11: memref<1x1x1x128xf32, #tpu.memory_space<vmem>>, %arg12: memref<10x18x128xbf16, #tpu.memory_space<vmem>>) attributes {dimension_semantics = [#tpu.dimension_semantics<parallel>, #tpu.dimension_semantics<parallel>], iteration_bounds = array<i64: 2, 2>, scalar_prefetch = 0 : i64, scratch_operands = 1 : i64, tpu.core_type = #tpu.core_type<tc>, window_params = [{transform_indices = @transform_0, window_bounds = array<i64: 1, 8, 16, 128>}, {transform_indices = @transform_1, window_bounds = array<i64: 1, 1, 16, 128>}, {transform_indices = @transform_2, window_bounds = array<i64: 1, 1, 16, 128>}, {pipeline_mode = #tpu.pipeline_mode<synchronous>, transform_indices = @transform_3, window_bounds = array<i64: 3, 384, 128>}, {pipeline_mode = #tpu.pipeline_mode<synchronous>, transform_indices = @transform_4, window_bounds = array<i64: 1, 128>}, {pipeline_mode = #tpu.pipeline_mode<synchronous>, transform_indices = @transform_5, window_bounds = array<i64: 1, 128>}, {pipeline_mode = #tpu.pipeline_mode<synchronous>, transform_indices = @transform_6, window_bounds = array<i64: 1, 128>}, {transform_indices = @transform_7, window_bounds = array<i64: 1, 128, 128>}, {transform_indices = @transform_8, window_bounds = array<i64: 1, 1, 1, 128>}, {transform_indices = @transform_9, window_bounds = array<i64: 1, 1, 1, 128>}]} {
    %cst = arith.constant 0.000000e+00 : bf16
    %0 = vector.broadcast %cst : bf16 to vector<10x1x128xbf16>
    %c0 = arith.constant 0 : index
    %c0_0 = arith.constant 0 : index
    %c0_1 = arith.constant 0 : index
    %1 = vector.load %arg12[%c0, %c0_0, %c0_1] : memref<10x18x128xbf16, #tpu.memory_space<vmem>>, vector<10x1x128xbf16>
    tpu.vector_store %arg12[%c0, %c0_0, %c0_1], %0 {strides = array<i32>} : memref<10x18x128xbf16, #tpu.memory_space<vmem>>, vector<10x1x128xbf16>,
    %c0_2 = arith.constant 0 : index
    %c17 = arith.constant 17 : index
    %c0_3 = arith.constant 0 : index
    %2 = vector.load %arg12[%c0_2, %c17, %c0_3] : memref<10x18x128xbf16, #tpu.memory_space<vmem>>, vector<10x1x128xbf16>
    tpu.vector_store %arg12[%c0_2, %c17, %c0_3], %0 {strides = array<i32>} : memref<10x18x128xbf16, #tpu.memory_space<vmem>>, vector<10x1x128xbf16>,
    %c0_4 = arith.constant 0 : index
    %c0_5 = arith.constant 0 : index
    %c0_6 = arith.constant 0 : index
    %c0_7 = arith.constant 0 : index
    %3 = vector.load %arg3[%c0_4, %c0_5, %c0_6, %c0_7] : memref<1x1x16x128xbf16, #tpu.memory_space<vmem>>, vector<1x1x16x128xbf16>
    %4 = vector.shape_cast %3 : vector<1x1x16x128xbf16> to vector<1x16x128xbf16>
    %c0_i32 = arith.constant 0 : i32
    %5 = arith.cmpi sgt, %arg1, %c0_i32 : i32
    %cst_8 = arith.constant 0.000000e+00 : bf16
    %6 = vector.broadcast %cst_8 : bf16 to vector<1x16x128xbf16>
    %7 = arith.select %5, %4, %6 : vector<1x16x128xbf16>
    %c0_9 = arith.constant 0 : index
    %c1 = arith.constant 1 : index
    %c0_10 = arith.constant 0 : index
    %8 = vector.load %arg12[%c0_9, %c1, %c0_10] : memref<10x18x128xbf16, #tpu.memory_space<vmem>>, vector<1x16x128xbf16>
    tpu.vector_store %arg12[%c0_9, %c1, %c0_10], %7 {strides = array<i32>} : memref<10x18x128xbf16, #tpu.memory_space<vmem>>, vector<1x16x128xbf16>,
    %c0_11 = arith.constant 0 : index
    %c0_12 = arith.constant 0 : index
    %c0_13 = arith.constant 0 : index
    %c0_14 = arith.constant 0 : index
    %9 = vector.load %arg2[%c0_11, %c0_12, %c0_13, %c0_14] : memref<1x8x16x128xbf16, #tpu.memory_space<vmem>>, vector<1x8x16x128xbf16>
    %10 = vector.shape_cast %9 : vector<1x8x16x128xbf16> to vector<8x16x128xbf16>
    %c1_15 = arith.constant 1 : index
    %c1_16 = arith.constant 1 : index
    %c0_17 = arith.constant 0 : index
    %11 = vector.load %arg12[%c1_15, %c1_16, %c0_17] : memref<10x18x128xbf16, #tpu.memory_space<vmem>>, vector<8x16x128xbf16>
    tpu.vector_store %arg12[%c1_15, %c1_16, %c0_17], %10 {strides = array<i32>} : memref<10x18x128xbf16, #tpu.memory_space<vmem>>, vector<8x16x128xbf16>,
    %c0_18 = arith.constant 0 : index
    %c0_19 = arith.constant 0 : index
    %c0_20 = arith.constant 0 : index
    %c0_21 = arith.constant 0 : index
    %12 = vector.load %arg4[%c0_18, %c0_19, %c0_20, %c0_21] : memref<1x1x16x128xbf16, #tpu.memory_space<vmem>>, vector<1x1x16x128xbf16>
    %13 = vector.shape_cast %12 : vector<1x1x16x128xbf16> to vector<1x16x128xbf16>
    %c1_i32 = arith.constant 1 : i32
    %14 = arith.cmpi slt, %arg1, %c1_i32 : i32
    %cst_22 = arith.constant 0.000000e+00 : bf16
    %15 = vector.broadcast %cst_22 : bf16 to vector<1x16x128xbf16>
    %16 = arith.select %14, %13, %15 : vector<1x16x128xbf16>
    %c9 = arith.constant 9 : index
    %c1_23 = arith.constant 1 : index
    %c0_24 = arith.constant 0 : index
    %17 = vector.load %arg12[%c9, %c1_23, %c0_24] : memref<10x18x128xbf16, #tpu.memory_space<vmem>>, vector<1x16x128xbf16>
    tpu.vector_store %arg12[%c9, %c1_23, %c0_24], %16 {strides = array<i32>} : memref<10x18x128xbf16, #tpu.memory_space<vmem>>, vector<1x16x128xbf16>,
    %c0_25 = arith.constant 0 : index
    %c0_26 = arith.constant 0 : index
    %c0_27 = arith.constant 0 : index
    %18 = vector.load %arg12[%c0_25, %c0_26, %c0_27] : memref<10x18x128xbf16, #tpu.memory_space<vmem>>, vector<10x18x128xbf16>
    %c0_28 = arith.constant 0 : index
    %c0_29 = arith.constant 0 : index
    %19 = vector.load %arg6[%c0_28, %c0_29] : memref<1x128xf32, #tpu.memory_space<vmem>>, vector<1x128xf32>
    %20 = vector.shape_cast %19 : vector<1x128xf32> to vector<1x128xf32>
    %21 = vector.broadcast %20 : vector<1x128xf32> to vector<128x128xf32>
    %22 = vector.extract_strided_slice %18 {offsets = [0, 0, 0], sizes = [8, 16, 128], strides = [1, 1, 1]} : vector<10x18x128xbf16> to vector<8x16x128xbf16>
    %23 = vector.extract_strided_slice %18 {offsets = [0, 1, 0], sizes = [8, 16, 128], strides = [1, 1, 1]} : vector<10x18x128xbf16> to vector<8x16x128xbf16>
    %24 = vector.extract_strided_slice %18 {offsets = [0, 2, 0], sizes = [8, 16, 128], strides = [1, 1, 1]} : vector<10x18x128xbf16> to vector<8x16x128xbf16>
    %25 = tpu.concatenate %22, %23, %24 in 2 : vector<8x16x128xbf16>, vector<8x16x128xbf16>, vector<8x16x128xbf16> -> vector<8x16x384xbf16>
    %26 = vector.shape_cast %25 : vector<8x16x384xbf16> to vector<128x384xbf16>
    %c0_30 = arith.constant 0 : index
    %c0_31 = arith.constant 0 : index
    %c0_32 = arith.constant 0 : index
    %27 = vector.load %arg5[%c0_30, %c0_31, %c0_32] : memref<3x384x128xbf16, #tpu.memory_space<vmem>>, vector<1x384x128xbf16>
    %28 = vector.shape_cast %27 : vector<1x384x128xbf16> to vector<384x128xbf16>
    %cst_33 = arith.constant dense<0.000000e+00> : vector<128x128xf32>
    %29 = tpu.matmul %26, %28, %cst_33 {dimension_numbers = #tpu.dot_dimension_numbers<[1], [0], [0], [1], [0, 0, 1, 1], [], []>} : vector<128x384xbf16>, vector<384x128xbf16>, vector<128x128xf32> -> vector<128x128xf32>
    %30 = arith.addf %21, %29 : vector<128x128xf32>
    %31 = vector.extract_strided_slice %18 {offsets = [1, 0, 0], sizes = [8, 16, 128], strides = [1, 1, 1]} : vector<10x18x128xbf16> to vector<8x16x128xbf16>
    %32 = vector.extract_strided_slice %18 {offsets = [1, 1, 0], sizes = [8, 16, 128], strides = [1, 1, 1]} : vector<10x18x128xbf16> to vector<8x16x128xbf16>
    %33 = vector.extract_strided_slice %18 {offsets = [1, 2, 0], sizes = [8, 16, 128], strides = [1, 1, 1]} : vector<10x18x128xbf16> to vector<8x16x128xbf16>
    %34 = tpu.concatenate %31, %32, %33 in 2 : vector<8x16x128xbf16>, vector<8x16x128xbf16>, vector<8x16x128xbf16> -> vector<8x16x384xbf16>
    %35 = vector.shape_cast %34 : vector<8x16x384xbf16> to vector<128x384xbf16>
    %c1_34 = arith.constant 1 : index
    %c0_35 = arith.constant 0 : index
    %c0_36 = arith.constant 0 : index
    %36 = vector.load %arg5[%c1_34, %c0_35, %c0_36] : memref<3x384x128xbf16, #tpu.memory_space<vmem>>, vector<1x384x128xbf16>
    %37 = vector.shape_cast %36 : vector<1x384x128xbf16> to vector<384x128xbf16>
    %cst_37 = arith.constant dense<0.000000e+00> : vector<128x128xf32>
    %38 = tpu.matmul %35, %37, %cst_37 {dimension_numbers = #tpu.dot_dimension_numbers<[1], [0], [0], [1], [0, 0, 1, 1], [], []>} : vector<128x384xbf16>, vector<384x128xbf16>, vector<128x128xf32> -> vector<128x128xf32>
    %39 = arith.addf %30, %38 : vector<128x128xf32>
    %40 = vector.extract_strided_slice %18 {offsets = [2, 0, 0], sizes = [8, 16, 128], strides = [1, 1, 1]} : vector<10x18x128xbf16> to vector<8x16x128xbf16>
    %41 = vector.extract_strided_slice %18 {offsets = [2, 1, 0], sizes = [8, 16, 128], strides = [1, 1, 1]} : vector<10x18x128xbf16> to vector<8x16x128xbf16>
    %42 = vector.extract_strided_slice %18 {offsets = [2, 2, 0], sizes = [8, 16, 128], strides = [1, 1, 1]} : vector<10x18x128xbf16> to vector<8x16x128xbf16>
    %43 = tpu.concatenate %40, %41, %42 in 2 : vector<8x16x128xbf16>, vector<8x16x128xbf16>, vector<8x16x128xbf16> -> vector<8x16x384xbf16>
    %44 = vector.shape_cast %43 : vector<8x16x384xbf16> to vector<128x384xbf16>
    %c2 = arith.constant 2 : index
    %c0_38 = arith.constant 0 : index
    %c0_39 = arith.constant 0 : index
    %45 = vector.load %arg5[%c2, %c0_38, %c0_39] : memref<3x384x128xbf16, #tpu.memory_space<vmem>>, vector<1x384x128xbf16>
    %46 = vector.shape_cast %45 : vector<1x384x128xbf16> to vector<384x128xbf16>
    %cst_40 = arith.constant dense<0.000000e+00> : vector<128x128xf32>
    %47 = tpu.matmul %44, %46, %cst_40 {dimension_numbers = #tpu.dot_dimension_numbers<[1], [0], [0], [1], [0, 0, 1, 1], [], []>} : vector<128x384xbf16>, vector<384x128xbf16>, vector<128x128xf32> -> vector<128x128xf32>
    %48 = arith.addf %39, %47 : vector<128x128xf32>
    %cst_41 = arith.constant dense<0.000000e+00> : vector<128xf32>
    %49 = vector.multi_reduction <add>, %48, %cst_41 [0] : vector<128x128xf32> to vector<128xf32>
    %50 = vector.shape_cast %49 : vector<128xf32> to vector<1x128xf32>
    %c0_42 = arith.constant 0 : index
    %c0_43 = arith.constant 0 : index
    %c0_44 = arith.constant 0 : index
    %c0_45 = arith.constant 0 : index
    %51 = vector.load %arg10[%c0_42, %c0_43, %c0_44, %c0_45] : memref<1x1x1x128xf32, #tpu.memory_space<vmem>>, vector<1x1x1x128xf32>
    %52 = vector.shape_cast %51 : vector<1x1x1x128xf32> to vector<1x128xf32>
    %53 = vector.shape_cast %50 : vector<1x128xf32> to vector<1x1x1x128xf32>
    tpu.vector_store %arg10[%c0_42, %c0_43, %c0_44, %c0_45], %53 {strides = array<i32>} : memref<1x1x1x128xf32, #tpu.memory_space<vmem>>, vector<1x1x1x128xf32>,
    %54 = arith.mulf %48, %48 : vector<128x128xf32>
    %cst_46 = arith.constant dense<0.000000e+00> : vector<128xf32>
    %55 = vector.multi_reduction <add>, %54, %cst_46 [0] : vector<128x128xf32> to vector<128xf32>
    %56 = vector.shape_cast %55 : vector<128xf32> to vector<1x128xf32>
    %c0_47 = arith.constant 0 : index
    %c0_48 = arith.constant 0 : index
    %c0_49 = arith.constant 0 : index
    %c0_50 = arith.constant 0 : index
    %57 = vector.load %arg11[%c0_47, %c0_48, %c0_49, %c0_50] : memref<1x1x1x128xf32, #tpu.memory_space<vmem>>, vector<1x1x1x128xf32>
    %58 = vector.shape_cast %57 : vector<1x1x1x128xf32> to vector<1x128xf32>
    %59 = vector.shape_cast %56 : vector<1x128xf32> to vector<1x1x1x128xf32>
    tpu.vector_store %arg11[%c0_47, %c0_48, %c0_49, %c0_50], %59 {strides = array<i32>} : memref<1x1x1x128xf32, #tpu.memory_space<vmem>>, vector<1x1x1x128xf32>,
    %60 = arith.truncf %48 : vector<128x128xf32> to vector<128x128xbf16>
    %c0_51 = arith.constant 0 : index
    %c0_52 = arith.constant 0 : index
    %c0_53 = arith.constant 0 : index
    %61 = vector.load %arg9[%c0_51, %c0_52, %c0_53] : memref<1x128x128xbf16, #tpu.memory_space<vmem>>, vector<1x128x128xbf16>
    %62 = vector.shape_cast %61 : vector<1x128x128xbf16> to vector<128x128xbf16>
    %63 = vector.shape_cast %60 : vector<128x128xbf16> to vector<1x128x128xbf16>
    tpu.vector_store %arg9[%c0_51, %c0_52, %c0_53], %63 {strides = array<i32>} : memref<1x128x128xbf16, #tpu.memory_space<vmem>>, vector<1x128x128xbf16>,
    return
  }
  func.func @transform_0(%arg0: i32, %arg1: i32) -> (i32, i32, i32, i32) {
    %c0_i32 = arith.constant 0 : i32
    %c0_i32_0 = arith.constant 0 : i32
    %c0_i32_1 = arith.constant 0 : i32
    return %arg0, %arg1, %c0_i32, %c0_i32_0 : i32, i32, i32, i32
  }
  func.func @transform_1(%arg0: i32, %arg1: i32) -> (i32, i32, i32, i32) {
    %c8_i32 = arith.constant 8 : i32
    %0 = arith.muli %arg1, %c8_i32 : i32
    %c1_i32 = arith.constant 1 : i32
    %1 = arith.subi %0, %c1_i32 : i32
    %c0_i32 = arith.constant 0 : i32
    %2 = arith.maxsi %1, %c0_i32 : i32
    %c0_i32_0 = arith.constant 0 : i32
    %c0_i32_1 = arith.constant 0 : i32
    %c0_i32_2 = arith.constant 0 : i32
    return %arg0, %2, %c0_i32_0, %c0_i32_1 : i32, i32, i32, i32
  }
  func.func @transform_2(%arg0: i32, %arg1: i32) -> (i32, i32, i32, i32) {
    %c1_i32 = arith.constant 1 : i32
    %0 = arith.addi %arg1, %c1_i32 : i32
    %c8_i32 = arith.constant 8 : i32
    %1 = arith.muli %0, %c8_i32 : i32
    %c15_i32 = arith.constant 15 : i32
    %2 = arith.minsi %1, %c15_i32 : i32
    %c0_i32 = arith.constant 0 : i32
    %c0_i32_0 = arith.constant 0 : i32
    %c0_i32_1 = arith.constant 0 : i32
    return %arg0, %2, %c0_i32, %c0_i32_0 : i32, i32, i32, i32
  }
  func.func @transform_3(%arg0: i32, %arg1: i32) -> (i32, i32, i32) {
    %c0_i32 = arith.constant 0 : i32
    %c0_i32_0 = arith.constant 0 : i32
    %c0_i32_1 = arith.constant 0 : i32
    %c0_i32_2 = arith.constant 0 : i32
    return %c0_i32, %c0_i32_0, %c0_i32_1 : i32, i32, i32
  }
  func.func @transform_4(%arg0: i32, %arg1: i32) -> (i32, i32) {
    %c0_i32 = arith.constant 0 : i32
    %c0_i32_0 = arith.constant 0 : i32
    %c0_i32_1 = arith.constant 0 : i32
    return %c0_i32, %c0_i32_0 : i32, i32
  }
  func.func @transform_5(%arg0: i32, %arg1: i32) -> (i32, i32) {
    %c0_i32 = arith.constant 0 : i32
    %c0_i32_0 = arith.constant 0 : i32
    %c0_i32_1 = arith.constant 0 : i32
    return %c0_i32, %c0_i32_0 : i32, i32
  }
  func.func @transform_6(%arg0: i32, %arg1: i32) -> (i32, i32) {
    %c0_i32 = arith.constant 0 : i32
    %c0_i32_0 = arith.constant 0 : i32
    %c0_i32_1 = arith.constant 0 : i32
    return %c0_i32, %c0_i32_0 : i32, i32
  }
  func.func @transform_7(%arg0: i32, %arg1: i32) -> (i32, i32, i32) {
    %c0_i32 = arith.constant 0 : i32
    %c0_i32_0 = arith.constant 0 : i32
    return %arg0, %arg1, %c0_i32 : i32, i32, i32
  }
  func.func @transform_8(%arg0: i32, %arg1: i32) -> (i32, i32, i32, i32) {
    %c0_i32 = arith.constant 0 : i32
    %c0_i32_0 = arith.constant 0 : i32
    %c0_i32_1 = arith.constant 0 : i32
    return %arg0, %arg1, %c0_i32, %c0_i32_0 : i32, i32, i32, i32
  }
  func.func @transform_9(%arg0: i32, %arg1: i32) -> (i32, i32, i32, i32) {
    %c0_i32 = arith.constant 0 : i32
    %c0_i32_0 = arith.constant 0 : i32
    %c0_i32_1 = arith.constant 0 : i32
    return %arg0, %arg1, %c0_i32, %c0_i32_0 : i32, i32, i32, i32
  }
}

module attributes {stable_mosaic.version = 11 : i64} {
  func.func @_conv_bn_kernel(%arg0: i32, %arg1: i32, %arg2: memref<1x8x16x128xbf16, #tpu.memory_space<vmem>>, %arg3: memref<1x1x16x128xbf16, #tpu.memory_space<vmem>>, %arg4: memref<1x1x16x128xbf16, #tpu.memory_space<vmem>>, %arg5: memref<3x384x128xbf16, #tpu.memory_space<vmem>>, %arg6: memref<1x128xf32, #tpu.memory_space<vmem>>, %arg7: memref<1x128xf32, #tpu.memory_space<vmem>>, %arg8: memref<1x128xf32, #tpu.memory_space<vmem>>, %arg9: memref<1x128x128xbf16, #tpu.memory_space<vmem>>, %arg10: memref<1x1x1x128xf32, #tpu.memory_space<vmem>>, %arg11: memref<1x1x1x128xf32, #tpu.memory_space<vmem>>, %arg12: memref<10x18x128xbf16, #tpu.memory_space<vmem>>) attributes {dimension_semantics = [#tpu.dimension_semantics<parallel>, #tpu.dimension_semantics<parallel>], iteration_bounds = array<i64: 2, 2>, scalar_prefetch = 0 : i64, scratch_operands = 1 : i64, tpu.core_type = #tpu.core_type<tc>, window_params = [{transform_indices = @transform_0, window_bounds = array<i64: 1, 8, 16, 128>}, {transform_indices = @transform_1, window_bounds = array<i64: 1, 1, 16, 128>}, {transform_indices = @transform_2, window_bounds = array<i64: 1, 1, 16, 128>}, {pipeline_mode = #tpu.pipeline_mode<synchronous>, transform_indices = @transform_3, window_bounds = array<i64: 3, 384, 128>}, {pipeline_mode = #tpu.pipeline_mode<synchronous>, transform_indices = @transform_4, window_bounds = array<i64: 1, 128>}, {pipeline_mode = #tpu.pipeline_mode<synchronous>, transform_indices = @transform_5, window_bounds = array<i64: 1, 128>}, {pipeline_mode = #tpu.pipeline_mode<synchronous>, transform_indices = @transform_6, window_bounds = array<i64: 1, 128>}, {transform_indices = @transform_7, window_bounds = array<i64: 1, 128, 128>}, {transform_indices = @transform_8, window_bounds = array<i64: 1, 1, 1, 128>}, {transform_indices = @transform_9, window_bounds = array<i64: 1, 1, 1, 128>}]} {
    %cst = arith.constant 0.000000e+00 : bf16
    %0 = vector.broadcast %cst : bf16 to vector<10x1x128xbf16>
    %c0 = arith.constant 0 : index
    %c0_0 = arith.constant 0 : index
    %c0_1 = arith.constant 0 : index
    %1 = vector.load %arg12[%c0, %c0_0, %c0_1] : memref<10x18x128xbf16, #tpu.memory_space<vmem>>, vector<10x1x128xbf16>
    tpu.vector_store %arg12[%c0, %c0_0, %c0_1], %0 {strides = array<i32>} : memref<10x18x128xbf16, #tpu.memory_space<vmem>>, vector<10x1x128xbf16>,
    %c0_2 = arith.constant 0 : index
    %c17 = arith.constant 17 : index
    %c0_3 = arith.constant 0 : index
    %2 = vector.load %arg12[%c0_2, %c17, %c0_3] : memref<10x18x128xbf16, #tpu.memory_space<vmem>>, vector<10x1x128xbf16>
    tpu.vector_store %arg12[%c0_2, %c17, %c0_3], %0 {strides = array<i32>} : memref<10x18x128xbf16, #tpu.memory_space<vmem>>, vector<10x1x128xbf16>,
    %c0_4 = arith.constant 0 : index
    %c0_5 = arith.constant 0 : index
    %c0_6 = arith.constant 0 : index
    %c0_7 = arith.constant 0 : index
    %3 = vector.load %arg3[%c0_4, %c0_5, %c0_6, %c0_7] : memref<1x1x16x128xbf16, #tpu.memory_space<vmem>>, vector<1x1x16x128xbf16>
    %4 = vector.shape_cast %3 : vector<1x1x16x128xbf16> to vector<1x16x128xbf16>
    %c0_i32 = arith.constant 0 : i32
    %5 = arith.cmpi sgt, %arg1, %c0_i32 : i32
    %6 = arith.extf %4 : vector<1x16x128xbf16> to vector<1x16x128xf32>
    %c0_8 = arith.constant 0 : index
    %c0_9 = arith.constant 0 : index
    %7 = vector.load %arg7[%c0_8, %c0_9] : memref<1x128xf32, #tpu.memory_space<vmem>>, vector<1x128xf32>
    %8 = vector.shape_cast %7 : vector<1x128xf32> to vector<1x1x128xf32>
    %9 = vector.broadcast %8 : vector<1x1x128xf32> to vector<1x16x128xf32>
    %10 = arith.mulf %6, %9 : vector<1x16x128xf32>
    %c0_10 = arith.constant 0 : index
    %c0_11 = arith.constant 0 : index
    %11 = vector.load %arg8[%c0_10, %c0_11] : memref<1x128xf32, #tpu.memory_space<vmem>>, vector<1x128xf32>
    %12 = vector.shape_cast %11 : vector<1x128xf32> to vector<1x1x128xf32>
    %13 = vector.broadcast %12 : vector<1x1x128xf32> to vector<1x16x128xf32>
    %14 = arith.addf %10, %13 : vector<1x16x128xf32>
    %cst_12 = arith.constant 0.000000e+00 : f32
    %15 = vector.broadcast %cst_12 : f32 to vector<1x16x128xf32>
    %16 = arith.maximumf %14, %15 : vector<1x16x128xf32>
    %cst_13 = arith.constant 0.000000e+00 : f32
    %17 = vector.broadcast %cst_13 : f32 to vector<1x16x128xf32>
    %18 = arith.select %5, %16, %17 : vector<1x16x128xf32>
    %19 = arith.truncf %18 : vector<1x16x128xf32> to vector<1x16x128xbf16>
    %c0_14 = arith.constant 0 : index
    %c1 = arith.constant 1 : index
    %c0_15 = arith.constant 0 : index
    %20 = vector.load %arg12[%c0_14, %c1, %c0_15] : memref<10x18x128xbf16, #tpu.memory_space<vmem>>, vector<1x16x128xbf16>
    tpu.vector_store %arg12[%c0_14, %c1, %c0_15], %19 {strides = array<i32>} : memref<10x18x128xbf16, #tpu.memory_space<vmem>>, vector<1x16x128xbf16>,
    %c0_16 = arith.constant 0 : index
    %c0_17 = arith.constant 0 : index
    %c0_18 = arith.constant 0 : index
    %c0_19 = arith.constant 0 : index
    %21 = vector.load %arg2[%c0_16, %c0_17, %c0_18, %c0_19] : memref<1x8x16x128xbf16, #tpu.memory_space<vmem>>, vector<1x8x16x128xbf16>
    %22 = vector.shape_cast %21 : vector<1x8x16x128xbf16> to vector<8x16x128xbf16>
    %23 = arith.extf %22 : vector<8x16x128xbf16> to vector<8x16x128xf32>
    %c0_20 = arith.constant 0 : index
    %c0_21 = arith.constant 0 : index
    %24 = vector.load %arg7[%c0_20, %c0_21] : memref<1x128xf32, #tpu.memory_space<vmem>>, vector<1x128xf32>
    %25 = vector.shape_cast %24 : vector<1x128xf32> to vector<1x1x128xf32>
    %26 = vector.broadcast %25 : vector<1x1x128xf32> to vector<8x16x128xf32>
    %27 = arith.mulf %23, %26 : vector<8x16x128xf32>
    %c0_22 = arith.constant 0 : index
    %c0_23 = arith.constant 0 : index
    %28 = vector.load %arg8[%c0_22, %c0_23] : memref<1x128xf32, #tpu.memory_space<vmem>>, vector<1x128xf32>
    %29 = vector.shape_cast %28 : vector<1x128xf32> to vector<1x1x128xf32>
    %30 = vector.broadcast %29 : vector<1x1x128xf32> to vector<8x16x128xf32>
    %31 = arith.addf %27, %30 : vector<8x16x128xf32>
    %cst_24 = arith.constant 0.000000e+00 : f32
    %32 = vector.broadcast %cst_24 : f32 to vector<8x16x128xf32>
    %33 = arith.maximumf %31, %32 : vector<8x16x128xf32>
    %34 = arith.truncf %33 : vector<8x16x128xf32> to vector<8x16x128xbf16>
    %c1_25 = arith.constant 1 : index
    %c1_26 = arith.constant 1 : index
    %c0_27 = arith.constant 0 : index
    %35 = vector.load %arg12[%c1_25, %c1_26, %c0_27] : memref<10x18x128xbf16, #tpu.memory_space<vmem>>, vector<8x16x128xbf16>
    tpu.vector_store %arg12[%c1_25, %c1_26, %c0_27], %34 {strides = array<i32>} : memref<10x18x128xbf16, #tpu.memory_space<vmem>>, vector<8x16x128xbf16>,
    %c0_28 = arith.constant 0 : index
    %c0_29 = arith.constant 0 : index
    %c0_30 = arith.constant 0 : index
    %c0_31 = arith.constant 0 : index
    %36 = vector.load %arg4[%c0_28, %c0_29, %c0_30, %c0_31] : memref<1x1x16x128xbf16, #tpu.memory_space<vmem>>, vector<1x1x16x128xbf16>
    %37 = vector.shape_cast %36 : vector<1x1x16x128xbf16> to vector<1x16x128xbf16>
    %c1_i32 = arith.constant 1 : i32
    %38 = arith.cmpi slt, %arg1, %c1_i32 : i32
    %39 = arith.extf %37 : vector<1x16x128xbf16> to vector<1x16x128xf32>
    %c0_32 = arith.constant 0 : index
    %c0_33 = arith.constant 0 : index
    %40 = vector.load %arg7[%c0_32, %c0_33] : memref<1x128xf32, #tpu.memory_space<vmem>>, vector<1x128xf32>
    %41 = vector.shape_cast %40 : vector<1x128xf32> to vector<1x1x128xf32>
    %42 = vector.broadcast %41 : vector<1x1x128xf32> to vector<1x16x128xf32>
    %43 = arith.mulf %39, %42 : vector<1x16x128xf32>
    %c0_34 = arith.constant 0 : index
    %c0_35 = arith.constant 0 : index
    %44 = vector.load %arg8[%c0_34, %c0_35] : memref<1x128xf32, #tpu.memory_space<vmem>>, vector<1x128xf32>
    %45 = vector.shape_cast %44 : vector<1x128xf32> to vector<1x1x128xf32>
    %46 = vector.broadcast %45 : vector<1x1x128xf32> to vector<1x16x128xf32>
    %47 = arith.addf %43, %46 : vector<1x16x128xf32>
    %cst_36 = arith.constant 0.000000e+00 : f32
    %48 = vector.broadcast %cst_36 : f32 to vector<1x16x128xf32>
    %49 = arith.maximumf %47, %48 : vector<1x16x128xf32>
    %cst_37 = arith.constant 0.000000e+00 : f32
    %50 = vector.broadcast %cst_37 : f32 to vector<1x16x128xf32>
    %51 = arith.select %38, %49, %50 : vector<1x16x128xf32>
    %52 = arith.truncf %51 : vector<1x16x128xf32> to vector<1x16x128xbf16>
    %c9 = arith.constant 9 : index
    %c1_38 = arith.constant 1 : index
    %c0_39 = arith.constant 0 : index
    %53 = vector.load %arg12[%c9, %c1_38, %c0_39] : memref<10x18x128xbf16, #tpu.memory_space<vmem>>, vector<1x16x128xbf16>
    tpu.vector_store %arg12[%c9, %c1_38, %c0_39], %52 {strides = array<i32>} : memref<10x18x128xbf16, #tpu.memory_space<vmem>>, vector<1x16x128xbf16>,
    %c0_40 = arith.constant 0 : index
    %c0_41 = arith.constant 0 : index
    %c0_42 = arith.constant 0 : index
    %54 = vector.load %arg12[%c0_40, %c0_41, %c0_42] : memref<10x18x128xbf16, #tpu.memory_space<vmem>>, vector<10x18x128xbf16>
    %c0_43 = arith.constant 0 : index
    %c0_44 = arith.constant 0 : index
    %55 = vector.load %arg6[%c0_43, %c0_44] : memref<1x128xf32, #tpu.memory_space<vmem>>, vector<1x128xf32>
    %56 = vector.shape_cast %55 : vector<1x128xf32> to vector<1x128xf32>
    %57 = vector.broadcast %56 : vector<1x128xf32> to vector<128x128xf32>
    %58 = vector.extract_strided_slice %54 {offsets = [0, 0, 0], sizes = [8, 16, 128], strides = [1, 1, 1]} : vector<10x18x128xbf16> to vector<8x16x128xbf16>
    %59 = vector.extract_strided_slice %54 {offsets = [0, 1, 0], sizes = [8, 16, 128], strides = [1, 1, 1]} : vector<10x18x128xbf16> to vector<8x16x128xbf16>
    %60 = vector.extract_strided_slice %54 {offsets = [0, 2, 0], sizes = [8, 16, 128], strides = [1, 1, 1]} : vector<10x18x128xbf16> to vector<8x16x128xbf16>
    %61 = tpu.concatenate %58, %59, %60 in 2 : vector<8x16x128xbf16>, vector<8x16x128xbf16>, vector<8x16x128xbf16> -> vector<8x16x384xbf16>
    %62 = vector.shape_cast %61 : vector<8x16x384xbf16> to vector<128x384xbf16>
    %c0_45 = arith.constant 0 : index
    %c0_46 = arith.constant 0 : index
    %c0_47 = arith.constant 0 : index
    %63 = vector.load %arg5[%c0_45, %c0_46, %c0_47] : memref<3x384x128xbf16, #tpu.memory_space<vmem>>, vector<1x384x128xbf16>
    %64 = vector.shape_cast %63 : vector<1x384x128xbf16> to vector<384x128xbf16>
    %cst_48 = arith.constant dense<0.000000e+00> : vector<128x128xf32>
    %65 = tpu.matmul %62, %64, %cst_48 {dimension_numbers = #tpu.dot_dimension_numbers<[1], [0], [0], [1], [0, 0, 1, 1], [], []>} : vector<128x384xbf16>, vector<384x128xbf16>, vector<128x128xf32> -> vector<128x128xf32>
    %66 = arith.addf %57, %65 : vector<128x128xf32>
    %67 = vector.extract_strided_slice %54 {offsets = [1, 0, 0], sizes = [8, 16, 128], strides = [1, 1, 1]} : vector<10x18x128xbf16> to vector<8x16x128xbf16>
    %68 = vector.extract_strided_slice %54 {offsets = [1, 1, 0], sizes = [8, 16, 128], strides = [1, 1, 1]} : vector<10x18x128xbf16> to vector<8x16x128xbf16>
    %69 = vector.extract_strided_slice %54 {offsets = [1, 2, 0], sizes = [8, 16, 128], strides = [1, 1, 1]} : vector<10x18x128xbf16> to vector<8x16x128xbf16>
    %70 = tpu.concatenate %67, %68, %69 in 2 : vector<8x16x128xbf16>, vector<8x16x128xbf16>, vector<8x16x128xbf16> -> vector<8x16x384xbf16>
    %71 = vector.shape_cast %70 : vector<8x16x384xbf16> to vector<128x384xbf16>
    %c1_49 = arith.constant 1 : index
    %c0_50 = arith.constant 0 : index
    %c0_51 = arith.constant 0 : index
    %72 = vector.load %arg5[%c1_49, %c0_50, %c0_51] : memref<3x384x128xbf16, #tpu.memory_space<vmem>>, vector<1x384x128xbf16>
    %73 = vector.shape_cast %72 : vector<1x384x128xbf16> to vector<384x128xbf16>
    %cst_52 = arith.constant dense<0.000000e+00> : vector<128x128xf32>
    %74 = tpu.matmul %71, %73, %cst_52 {dimension_numbers = #tpu.dot_dimension_numbers<[1], [0], [0], [1], [0, 0, 1, 1], [], []>} : vector<128x384xbf16>, vector<384x128xbf16>, vector<128x128xf32> -> vector<128x128xf32>
    %75 = arith.addf %66, %74 : vector<128x128xf32>
    %76 = vector.extract_strided_slice %54 {offsets = [2, 0, 0], sizes = [8, 16, 128], strides = [1, 1, 1]} : vector<10x18x128xbf16> to vector<8x16x128xbf16>
    %77 = vector.extract_strided_slice %54 {offsets = [2, 1, 0], sizes = [8, 16, 128], strides = [1, 1, 1]} : vector<10x18x128xbf16> to vector<8x16x128xbf16>
    %78 = vector.extract_strided_slice %54 {offsets = [2, 2, 0], sizes = [8, 16, 128], strides = [1, 1, 1]} : vector<10x18x128xbf16> to vector<8x16x128xbf16>
    %79 = tpu.concatenate %76, %77, %78 in 2 : vector<8x16x128xbf16>, vector<8x16x128xbf16>, vector<8x16x128xbf16> -> vector<8x16x384xbf16>
    %80 = vector.shape_cast %79 : vector<8x16x384xbf16> to vector<128x384xbf16>
    %c2 = arith.constant 2 : index
    %c0_53 = arith.constant 0 : index
    %c0_54 = arith.constant 0 : index
    %81 = vector.load %arg5[%c2, %c0_53, %c0_54] : memref<3x384x128xbf16, #tpu.memory_space<vmem>>, vector<1x384x128xbf16>
    %82 = vector.shape_cast %81 : vector<1x384x128xbf16> to vector<384x128xbf16>
    %cst_55 = arith.constant dense<0.000000e+00> : vector<128x128xf32>
    %83 = tpu.matmul %80, %82, %cst_55 {dimension_numbers = #tpu.dot_dimension_numbers<[1], [0], [0], [1], [0, 0, 1, 1], [], []>} : vector<128x384xbf16>, vector<384x128xbf16>, vector<128x128xf32> -> vector<128x128xf32>
    %84 = arith.addf %75, %83 : vector<128x128xf32>
    %cst_56 = arith.constant dense<0.000000e+00> : vector<128xf32>
    %85 = vector.multi_reduction <add>, %84, %cst_56 [0] : vector<128x128xf32> to vector<128xf32>
    %86 = vector.shape_cast %85 : vector<128xf32> to vector<1x128xf32>
    %c0_57 = arith.constant 0 : index
    %c0_58 = arith.constant 0 : index
    %c0_59 = arith.constant 0 : index
    %c0_60 = arith.constant 0 : index
    %87 = vector.load %arg10[%c0_57, %c0_58, %c0_59, %c0_60] : memref<1x1x1x128xf32, #tpu.memory_space<vmem>>, vector<1x1x1x128xf32>
    %88 = vector.shape_cast %87 : vector<1x1x1x128xf32> to vector<1x128xf32>
    %89 = vector.shape_cast %86 : vector<1x128xf32> to vector<1x1x1x128xf32>
    tpu.vector_store %arg10[%c0_57, %c0_58, %c0_59, %c0_60], %89 {strides = array<i32>} : memref<1x1x1x128xf32, #tpu.memory_space<vmem>>, vector<1x1x1x128xf32>,
    %90 = arith.mulf %84, %84 : vector<128x128xf32>
    %cst_61 = arith.constant dense<0.000000e+00> : vector<128xf32>
    %91 = vector.multi_reduction <add>, %90, %cst_61 [0] : vector<128x128xf32> to vector<128xf32>
    %92 = vector.shape_cast %91 : vector<128xf32> to vector<1x128xf32>
    %c0_62 = arith.constant 0 : index
    %c0_63 = arith.constant 0 : index
    %c0_64 = arith.constant 0 : index
    %c0_65 = arith.constant 0 : index
    %93 = vector.load %arg11[%c0_62, %c0_63, %c0_64, %c0_65] : memref<1x1x1x128xf32, #tpu.memory_space<vmem>>, vector<1x1x1x128xf32>
    %94 = vector.shape_cast %93 : vector<1x1x1x128xf32> to vector<1x128xf32>
    %95 = vector.shape_cast %92 : vector<1x128xf32> to vector<1x1x1x128xf32>
    tpu.vector_store %arg11[%c0_62, %c0_63, %c0_64, %c0_65], %95 {strides = array<i32>} : memref<1x1x1x128xf32, #tpu.memory_space<vmem>>, vector<1x1x1x128xf32>,
    %96 = arith.truncf %84 : vector<128x128xf32> to vector<128x128xbf16>
    %c0_66 = arith.constant 0 : index
    %c0_67 = arith.constant 0 : index
    %c0_68 = arith.constant 0 : index
    %97 = vector.load %arg9[%c0_66, %c0_67, %c0_68] : memref<1x128x128xbf16, #tpu.memory_space<vmem>>, vector<1x128x128xbf16>
    %98 = vector.shape_cast %97 : vector<1x128x128xbf16> to vector<128x128xbf16>
    %99 = vector.shape_cast %96 : vector<128x128xbf16> to vector<1x128x128xbf16>
    tpu.vector_store %arg9[%c0_66, %c0_67, %c0_68], %99 {strides = array<i32>} : memref<1x128x128xbf16, #tpu.memory_space<vmem>>, vector<1x128x128xbf16>,
    return
  }
  func.func @transform_0(%arg0: i32, %arg1: i32) -> (i32, i32, i32, i32) {
    %c0_i32 = arith.constant 0 : i32
    %c0_i32_0 = arith.constant 0 : i32
    %c0_i32_1 = arith.constant 0 : i32
    return %arg0, %arg1, %c0_i32, %c0_i32_0 : i32, i32, i32, i32
  }
  func.func @transform_1(%arg0: i32, %arg1: i32) -> (i32, i32, i32, i32) {
    %c8_i32 = arith.constant 8 : i32
    %0 = arith.muli %arg1, %c8_i32 : i32
    %c1_i32 = arith.constant 1 : i32
    %1 = arith.subi %0, %c1_i32 : i32
    %c0_i32 = arith.constant 0 : i32
    %2 = arith.maxsi %1, %c0_i32 : i32
    %c0_i32_0 = arith.constant 0 : i32
    %c0_i32_1 = arith.constant 0 : i32
    %c0_i32_2 = arith.constant 0 : i32
    return %arg0, %2, %c0_i32_0, %c0_i32_1 : i32, i32, i32, i32
  }
  func.func @transform_2(%arg0: i32, %arg1: i32) -> (i32, i32, i32, i32) {
    %c1_i32 = arith.constant 1 : i32
    %0 = arith.addi %arg1, %c1_i32 : i32
    %c8_i32 = arith.constant 8 : i32
    %1 = arith.muli %0, %c8_i32 : i32
    %c15_i32 = arith.constant 15 : i32
    %2 = arith.minsi %1, %c15_i32 : i32
    %c0_i32 = arith.constant 0 : i32
    %c0_i32_0 = arith.constant 0 : i32
    %c0_i32_1 = arith.constant 0 : i32
    return %arg0, %2, %c0_i32, %c0_i32_0 : i32, i32, i32, i32
  }
  func.func @transform_3(%arg0: i32, %arg1: i32) -> (i32, i32, i32) {
    %c0_i32 = arith.constant 0 : i32
    %c0_i32_0 = arith.constant 0 : i32
    %c0_i32_1 = arith.constant 0 : i32
    %c0_i32_2 = arith.constant 0 : i32
    return %c0_i32, %c0_i32_0, %c0_i32_1 : i32, i32, i32
  }
  func.func @transform_4(%arg0: i32, %arg1: i32) -> (i32, i32) {
    %c0_i32 = arith.constant 0 : i32
    %c0_i32_0 = arith.constant 0 : i32
    %c0_i32_1 = arith.constant 0 : i32
    return %c0_i32, %c0_i32_0 : i32, i32
  }
  func.func @transform_5(%arg0: i32, %arg1: i32) -> (i32, i32) {
    %c0_i32 = arith.constant 0 : i32
    %c0_i32_0 = arith.constant 0 : i32
    %c0_i32_1 = arith.constant 0 : i32
    return %c0_i32, %c0_i32_0 : i32, i32
  }
  func.func @transform_6(%arg0: i32, %arg1: i32) -> (i32, i32) {
    %c0_i32 = arith.constant 0 : i32
    %c0_i32_0 = arith.constant 0 : i32
    %c0_i32_1 = arith.constant 0 : i32
    return %c0_i32, %c0_i32_0 : i32, i32
  }
  func.func @transform_7(%arg0: i32, %arg1: i32) -> (i32, i32, i32) {
    %c0_i32 = arith.constant 0 : i32
    %c0_i32_0 = arith.constant 0 : i32
    return %arg0, %arg1, %c0_i32 : i32, i32, i32
  }
  func.func @transform_8(%arg0: i32, %arg1: i32) -> (i32, i32, i32, i32) {
    %c0_i32 = arith.constant 0 : i32
    %c0_i32_0 = arith.constant 0 : i32
    %c0_i32_1 = arith.constant 0 : i32
    return %arg0, %arg1, %c0_i32, %c0_i32_0 : i32, i32, i32, i32
  }
  func.func @transform_9(%arg0: i32, %arg1: i32) -> (i32, i32, i32, i32) {
    %c0_i32 = arith.constant 0 : i32
    %c0_i32_0 = arith.constant 0 : i32
    %c0_i32_1 = arith.constant 0 : i32
    return %arg0, %arg1, %c0_i32, %c0_i32_0 : i32, i32, i32, i32
  }
}

module attributes {stable_mosaic.version = 11 : i64} {
  func.func @_affine_relu_kernel(%arg0: i32, %arg1: i32, %arg2: memref<1x256x128xbf16, #tpu.memory_space<vmem>>, %arg3: memref<1x128xf32, #tpu.memory_space<vmem>>, %arg4: memref<1x128xf32, #tpu.memory_space<vmem>>, %arg5: memref<1x256x128xf32, #tpu.memory_space<vmem>>) attributes {dimension_semantics = [#tpu.dimension_semantics<parallel>, #tpu.dimension_semantics<parallel>], iteration_bounds = array<i64: 2, 1>, scalar_prefetch = 0 : i64, scratch_operands = 0 : i64, tpu.core_type = #tpu.core_type<tc>, window_params = [{transform_indices = @transform_0, window_bounds = array<i64: 1, 256, 128>}, {pipeline_mode = #tpu.pipeline_mode<synchronous>, transform_indices = @transform_1, window_bounds = array<i64: 1, 128>}, {pipeline_mode = #tpu.pipeline_mode<synchronous>, transform_indices = @transform_2, window_bounds = array<i64: 1, 128>}, {transform_indices = @transform_3, window_bounds = array<i64: 1, 256, 128>}]} {
    %c0 = arith.constant 0 : index
    %c0_0 = arith.constant 0 : index
    %c0_1 = arith.constant 0 : index
    %0 = vector.load %arg2[%c0, %c0_0, %c0_1] : memref<1x256x128xbf16, #tpu.memory_space<vmem>>, vector<1x256x128xbf16>
    %1 = vector.shape_cast %0 : vector<1x256x128xbf16> to vector<256x128xbf16>
    %2 = arith.extf %1 : vector<256x128xbf16> to vector<256x128xf32>
    %c0_2 = arith.constant 0 : index
    %c0_3 = arith.constant 0 : index
    %3 = vector.load %arg3[%c0_2, %c0_3] : memref<1x128xf32, #tpu.memory_space<vmem>>, vector<1x128xf32>
    %4 = vector.broadcast %3 : vector<1x128xf32> to vector<256x128xf32>
    %5 = arith.mulf %2, %4 : vector<256x128xf32>
    %c0_4 = arith.constant 0 : index
    %c0_5 = arith.constant 0 : index
    %6 = vector.load %arg4[%c0_4, %c0_5] : memref<1x128xf32, #tpu.memory_space<vmem>>, vector<1x128xf32>
    %7 = vector.broadcast %6 : vector<1x128xf32> to vector<256x128xf32>
    %8 = arith.addf %5, %7 : vector<256x128xf32>
    %cst = arith.constant 0.000000e+00 : f32
    %9 = vector.broadcast %cst : f32 to vector<256x128xf32>
    %10 = arith.maximumf %8, %9 : vector<256x128xf32>
    %c0_6 = arith.constant 0 : index
    %c0_7 = arith.constant 0 : index
    %c0_8 = arith.constant 0 : index
    %11 = vector.load %arg5[%c0_6, %c0_7, %c0_8] : memref<1x256x128xf32, #tpu.memory_space<vmem>>, vector<1x256x128xf32>
    %12 = vector.shape_cast %11 : vector<1x256x128xf32> to vector<256x128xf32>
    %13 = vector.shape_cast %10 : vector<256x128xf32> to vector<1x256x128xf32>
    tpu.vector_store %arg5[%c0_6, %c0_7, %c0_8], %13 {strides = array<i32>} : memref<1x256x128xf32, #tpu.memory_space<vmem>>, vector<1x256x128xf32>,
    return
  }
  func.func @transform_0(%arg0: i32, %arg1: i32) -> (i32, i32, i32) {
    %c0_i32 = arith.constant 0 : i32
    %c0_i32_0 = arith.constant 0 : i32
    return %arg0, %arg1, %c0_i32 : i32, i32, i32
  }
  func.func @transform_1(%arg0: i32, %arg1: i32) -> (i32, i32) {
    %c0_i32 = arith.constant 0 : i32
    %c0_i32_0 = arith.constant 0 : i32
    %c0_i32_1 = arith.constant 0 : i32
    return %c0_i32, %c0_i32_0 : i32, i32
  }
  func.func @transform_2(%arg0: i32, %arg1: i32) -> (i32, i32) {
    %c0_i32 = arith.constant 0 : i32
    %c0_i32_0 = arith.constant 0 : i32
    %c0_i32_1 = arith.constant 0 : i32
    return %c0_i32, %c0_i32_0 : i32, i32
  }
  func.func @transform_3(%arg0: i32, %arg1: i32) -> (i32, i32, i32) {
    %c0_i32 = arith.constant 0 : i32
    %c0_i32_0 = arith.constant 0 : i32
    return %arg0, %arg1, %c0_i32 : i32, i32, i32
  }
}

</mosaic_0001>

<bundles_post_ra>
// kernel: up_forward.5
= control target key start
LH: loop header
LB: loop body
LE: loop exit
PB: predicated region body
PF: predicated region fallthrough
CT: control target
= control target key end

     0   :  { %s659_s12 = smov 0   ;;  %s661_s13 = smov 0   ;;  %s822_s0 = inlined_call_operand.vmem [shape: bf16[2,256,128], index: 0, kind: input, shape index: {}]   ;;  %s823_s1 = inlined_call_operand.vmem [shape: f32[1,128], index: 1, kind: input, shape index: {}]   ;;  %s824_s2 = inlined_call_operand.vmem [shape: f32[1,128], index: 2, kind: input, shape index: {}]   ;;  %s825_s3 = inlined_call_operand.vmem [shape: f32[2,256,128], index: 3, kind: output, shape index: {}]  }
   0x1   :  { %s663_s14 = smov 0  }
   0x2 LB: > { %s25_s15 = sadd.s32 1, %s633_s13  ;;  %p501_p0 = scmp.ge.s32.totalorder %s637_s14, 1  ;;  %s637_s14 = sphi %s663_s14, %s13_s14   ;;  %s633_s13 = sphi %s661_s13, %s827_s13   ;;  %s629_s12 = sphi %s659_s12, %s826_s12  }
   0x3   : > { %p27_p1 = scmp.ge.s32.totalorder %s25_s15, 2  ;;  %p158_p2 = scmp.lt.s32.totalorder %s637_s14, 3 }
   0x5   : > { %s829_s15 = smov (%p27_p1, %s25_s15), 0  ;;  %p159_p3 = pnand %p501_p0, %p158_p2 }
   0x6   : > { %p191_p4 = scmp.lt.s32.totalorder (!%p159_p3), %s629_s12, 1 }
   0x7   : > { %162 = sbr.rel (%p159_p3) target bundleno = 56 (0x38), region = 32 }
   0xc   : > { %s831_s12 = smov (!%p191_p4, %s629_s12), 1  ;;  %v688_v0 = vld [vmem:[%s823_s1] ss:$0 sm:$0xff] }
   0xd   : > { %s508_s16 = sshll.u32 %s831_s12, 7  ;;  %v696_v5 = vld [vmem:[%s824_s2] ss:$0 sm:$0xff]  ;;  %s509_s24 = sshll.u32 %s831_s12, 8 }
   0xe   : > { %s683_s19 = scalar_lea.vmem %s822_s0, %s508_s16  ;;  %s715_s27 = scalar_lea.vmem %s825_s3, %s509_s24 }
   0xf   : > { %v511_v1 = vld [vmem:[%s683_s19] sm:$0xff]   ;;  %v574_v2 = vld [vmem:[%s683_s19 + $0x8] sm:$0xff]   ;;  %v575_v3 = vld [vmem:[%s683_s19 + $0x10] sm:$0xff]  }
  0x10   : > { %v512_v4 = vunpack.c.l.bf16 %v511_v1  ;;  %v513_v6 = vunpack.c.h.bf16 %v511_v1  ;;  %v516_v7 = vunpack.c.l.bf16 %v574_v2  ;;  %v517_v8 = vunpack.c.h.bf16 %v574_v2  ;;  %v576_v9 = vld [vmem:[%s683_s19 + $0x18] sm:$0xff]   ;;  %v577_v30 = vld [vmem:[%s683_s19 + $0x20] sm:$0xff]   ;;  %v578_v31 = vld [vmem:[%s683_s19 + $0x28] sm:$0xff]  }
  0x11   : > { %v520_v10 = vunpack.c.l.bf16 %v575_v3  ;;  %v521_v11 = vunpack.c.h.bf16 %v575_v3  ;;  %v524_v12 = vunpack.c.l.bf16 %v576_v9  ;;  %v525_v13 = vunpack.c.h.bf16 %v576_v9  ;;  %v579_v36 = vld [vmem:[%s683_s19 + $0x30] sm:$0xff]   ;;  %v580_v37 = vld [vmem:[%s683_s19 + $0x38] sm:$0xff]   ;;  %v581_v3 = vld [vmem:[%s683_s19 + $0x40] sm:$0xff]  }
  0x12   : > { %v278_v14 = vmul.f32 %v688_v0, %v512_v4  ;;  %v279_v15 = vmul.f32 %v688_v0, %v513_v6  ;;  %v280_v16 = vmul.f32 %v688_v0, %v516_v7  ;;  %v281_v17 = vmul.f32 %v688_v0, %v517_v8  ;;  %v582_v4 = vld [vmem:[%s683_s19 + $0x48] sm:$0xff]   ;;  %v583_v6 = vld [vmem:[%s683_s19 + $0x50] sm:$0xff]  }
  0x13   : > { %v282_v18 = vmul.f32 %v688_v0, %v520_v10  ;;  %v283_v19 = vmul.f32 %v688_v0, %v521_v11  ;;  %v284_v20 = vmul.f32 %v688_v0, %v524_v12  ;;  %v285_v21 = vmul.f32 %v688_v0, %v525_v13  ;;  %v584_v11 = vld [vmem:[%s683_s19 + $0x58] sm:$0xff]  }
  0x14   : > { %v314_v22 = vadd.f32 %v696_v5, %v278_v14  ;;  %v315_v23 = vadd.f32 %v696_v5, %v279_v15  ;;  %v316_v24 = vadd.f32 %v696_v5, %v280_v16  ;;  %v317_v25 = vadd.f32 %v696_v5, %v281_v17 }
  0x15   : > { %v318_v26 = vadd.f32 %v696_v5, %v282_v18  ;;  %v319_v27 = vadd.f32 %v696_v5, %v283_v19  ;;  %v320_v28 = vadd.f32 %v696_v5, %v284_v20  ;;  %v321_v29 = vadd.f32 %v696_v5, %v285_v21 }
  0x16   : > { %v346_v32 = vmax.f32 %v314_v22, 0.0  ;;  %v347_v33 = vmax.f32 %v315_v23, 0.0  ;;  %v348_v34 = vmax.f32 %v316_v24, 0.0  ;;  %v349_v35 = vmax.f32 %v317_v25, 0.0 }
  0x17   : > { %v350_v38 = vmax.f32 %v318_v26, 0.0  ;;  %v351_v39 = vmax.f32 %v319_v27, 0.0  ;;  %v352_v40 = vmax.f32 %v320_v28, 0.0  ;;  %v353_v41 = vmax.f32 %v321_v29, 0.0 }
  0x18   : > { %378 = vst [vmem:[%s715_s27] sm:$0xff] %v346_v32  ;;  %v528_v42 = vunpack.c.l.bf16 %v577_v30  ;;  %v529_v43 = vunpack.c.h.bf16 %v577_v30  ;;  %v532_v44 = vunpack.c.l.bf16 %v578_v31  ;;  %v533_v45 = vunpack.c.h.bf16 %v578_v31 }
  0x19   : > { %379 = vst [vmem:[%s715_s27 + $0x8] sm:$0xff] %v347_v33  ;;  %v536_v46 = vunpack.c.l.bf16 %v579_v36  ;;  %v537_v47 = vunpack.c.h.bf16 %v579_v36  ;;  %v540_v48 = vunpack.c.l.bf16 %v580_v37  ;;  %v541_v49 = vunpack.c.h.bf16 %v580_v37 }
  0x1a   : > { %380 = vst [vmem:[%s715_s27 + $0x10] sm:$0xff] %v348_v34  ;;  %v286_v50 = vmul.f32 %v688_v0, %v528_v42  ;;  %v287_v51 = vmul.f32 %v688_v0, %v529_v43  ;;  %v288_v52 = vmul.f32 %v688_v0, %v532_v44  ;;  %v289_v53 = vmul.f32 %v688_v0, %v533_v45  ;;  %v587_v42 = vld [vmem:[%s683_s19 + $0x70] sm:$0xff]  }
  0x1b   : > { %381 = vst [vmem:[%s715_s27 + $0x18] sm:$0xff] %v349_v35  ;;  %v290_v54 = vmul.f32 %v688_v0, %v536_v46  ;;  %v291_v55 = vmul.f32 %v688_v0, %v537_v47  ;;  %v292_v56 = vmul.f32 %v688_v0, %v540_v48  ;;  %v293_v57 = vmul.f32 %v688_v0, %v541_v49  ;;  %v588_v47 = vld [vmem:[%s683_s19 + $0x78] sm:$0xff]  }
  0x1c   : > { %382 = vst [vmem:[%s715_s27 + $0x20] sm:$0xff] %v350_v38  ;;  %v322_v58 = vadd.f32 %v696_v5, %v286_v50  ;;  %v323_v59 = vadd.f32 %v696_v5, %v287_v51  ;;  %v324_v60 = vadd.f32 %v696_v5, %v288_v52  ;;  %v325_v61 = vadd.f32 %v696_v5, %v289_v53 }
  0x1d   : > { %383 = vst [vmem:[%s715_s27 + $0x28] sm:$0xff] %v351_v39  ;;  %v326_v62 = vadd.f32 %v696_v5, %v290_v54  ;;  %v327_v63 = vadd.f32 %v696_v5, %v291_v55  ;;  %v328_v1 = vadd.f32 %v696_v5, %v292_v56  ;;  %v329_v2 = vadd.f32 %v696_v5, %v293_v57 }
  0x1e   : > { %384 = vst [vmem:[%s715_s27 + $0x30] sm:$0xff] %v352_v40  ;;  %v354_v7 = vmax.f32 %v322_v58, 0.0  ;;  %v355_v8 = vmax.f32 %v323_v59, 0.0  ;;  %v356_v9 = vmax.f32 %v324_v60, 0.0  ;;  %v357_v10 = vmax.f32 %v325_v61, 0.0  ;;  %v585_v40 = vld [vmem:[%s683_s19 + $0x60] sm:$0xff]  }
  0x1f   : > { %385 = vst [vmem:[%s715_s27 + $0x38] sm:$0xff] %v353_v41  ;;  %v358_v12 = vmax.f32 %v326_v62, 0.0  ;;  %v359_v13 = vmax.f32 %v327_v63, 0.0  ;;  %v360_v14 = vmax.f32 %v328_v1, 0.0  ;;  %v361_v15 = vmax.f32 %v329_v2, 0.0  ;;  %v586_v41 = vld [vmem:[%s683_s19 + $0x68] sm:$0xff]  }
  0x20   : > { %386 = vst [vmem:[%s715_s27 + $0x40] sm:$0xff] %v354_v7  ;;  %v544_v16 = vunpack.c.l.bf16 %v581_v3  ;;  %v545_v17 = vunpack.c.h.bf16 %v581_v3  ;;  %v548_v18 = vunpack.c.l.bf16 %v582_v4  ;;  %v549_v19 = vunpack.c.h.bf16 %v582_v4 }
  0x21   : > { %387 = vst [vmem:[%s715_s27 + $0x48] sm:$0xff] %v355_v8  ;;  %v552_v20 = vunpack.c.l.bf16 %v583_v6  ;;  %v553_v21 = vunpack.c.h.bf16 %v583_v6  ;;  %v556_v22 = vunpack.c.l.bf16 %v584_v11  ;;  %v557_v23 = vunpack.c.h.bf16 %v584_v11 }
  0x22   : > { %388 = vst [vmem:[%s715_s27 + $0x50] sm:$0xff] %v356_v9  ;;  %v294_v24 = vmul.f32 %v688_v0, %v544_v16  ;;  %v295_v25 = vmul.f32 %v688_v0, %v545_v17  ;;  %v296_v26 = vmul.f32 %v688_v0, %v548_v18  ;;  %v297_v27 = vmul.f32 %v688_v0, %v549_v19 }
  0x23   : > { %389 = vst [vmem:[%s715_s27 + $0x58] sm:$0xff] %v357_v10  ;;  %v298_v28 = vmul.f32 %v688_v0, %v552_v20  ;;  %v299_v29 = vmul.f32 %v688_v0, %v553_v21  ;;  %v300_v30 = vmul.f32 %v688_v0, %v556_v22  ;;  %v301_v31 = vmul.f32 %v688_v0, %v557_v23 }
  0x24   : > { %390 = vst [vmem:[%s715_s27 + $0x60] sm:$0xff] %v358_v12  ;;  %v330_v32 = vadd.f32 %v696_v5, %v294_v24  ;;  %v331_v33 = vadd.f32 %v696_v5, %v295_v25  ;;  %v332_v34 = vadd.f32 %v696_v5, %v296_v26  ;;  %v333_v35 = vadd.f32 %v696_v5, %v297_v27 }
  0x25   : > { %391 = vst [vmem:[%s715_s27 + $0x68] sm:$0xff] %v359_v13  ;;  %v334_v36 = vadd.f32 %v696_v5, %v298_v28  ;;  %v335_v37 = vadd.f32 %v696_v5, %v299_v29  ;;  %v336_v38 = vadd.f32 %v696_v5, %v300_v30  ;;  %v337_v39 = vadd.f32 %v696_v5, %v301_v31 }
  0x26   : > { %392 = vst [vmem:[%s715_s27 + $0x70] sm:$0xff] %v360_v14  ;;  %v362_v43 = vmax.f32 %v330_v32, 0.0  ;;  %v363_v44 = vmax.f32 %v331_v33, 0.0  ;;  %v364_v45 = vmax.f32 %v332_v34, 0.0  ;;  %v365_v46 = vmax.f32 %v333_v35, 0.0 }
  0x27   : > { %393 = vst [vmem:[%s715_s27 + $0x78] sm:$0xff] %v361_v15  ;;  %v366_v48 = vmax.f32 %v334_v36, 0.0  ;;  %v367_v49 = vmax.f32 %v335_v37, 0.0  ;;  %v368_v50 = vmax.f32 %v336_v38, 0.0  ;;  %v369_v51 = vmax.f32 %v337_v39, 0.0 }
  0x28   : > { %394 = vst [vmem:[%s715_s27 + $0x80] sm:$0xff] %v362_v43  ;;  %v560_v52 = vunpack.c.l.bf16 %v585_v40  ;;  %v561_v53 = vunpack.c.h.bf16 %v585_v40  ;;  %v564_v54 = vunpack.c.l.bf16 %v586_v41  ;;  %v565_v55 = vunpack.c.h.bf16 %v586_v41 }
  0x29   : > { %395 = vst [vmem:[%s715_s27 + $0x88] sm:$0xff] %v363_v44  ;;  %v568_v56 = vunpack.c.l.bf16 %v587_v42  ;;  %v569_v57 = vunpack.c.h.bf16 %v587_v42  ;;  %v572_v58 = vunpack.c.l.bf16 %v588_v47  ;;  %v573_v59 = vunpack.c.h.bf16 %v588_v47 }
  0x2a   : > { %396 = vst [vmem:[%s715_s27 + $0x90] sm:$0xff] %v364_v45  ;;  %v302_v60 = vmul.f32 %v688_v0, %v560_v52  ;;  %v303_v61 = vmul.f32 %v688_v0, %v561_v53  ;;  %v304_v62 = vmul.f32 %v688_v0, %v564_v54  ;;  %v305_v63 = vmul.f32 %v688_v0, %v565_v55 }
  0x2b   : > { %397 = vst [vmem:[%s715_s27 + $0x98] sm:$0xff] %v365_v46  ;;  %v306_v1 = vmul.f32 %v688_v0, %v568_v56  ;;  %v307_v2 = vmul.f32 %v688_v0, %v569_v57  ;;  %v308_v3 = vmul.f32 %v688_v0, %v572_v58  ;;  %v309_v4 = vmul.f32 %v688_v0, %v573_v59 }
  0x2c   : > { %398 = vst [vmem:[%s715_s27 + $0xa0] sm:$0xff] %v366_v48  ;;  %v338_v6 = vadd.f32 %v696_v5, %v302_v60  ;;  %v339_v7 = vadd.f32 %v696_v5, %v303_v61  ;;  %v340_v8 = vadd.f32 %v696_v5, %v304_v62  ;;  %v341_v9 = vadd.f32 %v696_v5, %v305_v63 }
  0x2d   : > { %399 = vst [vmem:[%s715_s27 + $0xa8] sm:$0xff] %v367_v49  ;;  %v342_v10 = vadd.f32 %v696_v5, %v306_v1  ;;  %v343_v11 = vadd.f32 %v696_v5, %v307_v2  ;;  %v344_v14 = vadd.f32 %v696_v5, %v308_v3  ;;  %v345_v16 = vadd.f32 %v696_v5, %v309_v4 }
  0x2e   : > { %400 = vst [vmem:[%s715_s27 + $0xb0] sm:$0xff] %v368_v50  ;;  %v370_v0 = vmax.f32 %v338_v6, 0.0  ;;  %v371_v12 = vmax.f32 %v339_v7, 0.0  ;;  %v372_v13 = vmax.f32 %v340_v8, 0.0  ;;  %v373_v15 = vmax.f32 %v341_v9, 0.0 }
  0x2f   : > { %401 = vst [vmem:[%s715_s27 + $0xb8] sm:$0xff] %v369_v51  ;;  %v374_v17 = vmax.f32 %v342_v10, 0.0  ;;  %v375_v18 = vmax.f32 %v343_v11, 0.0  ;;  %v376_v19 = vmax.f32 %v344_v14, 0.0  ;;  %v377_v20 = vmax.f32 %v345_v16, 0.0 }
  0x30   : > { %402 = vst [vmem:[%s715_s27 + $0xc0] sm:$0xff] %v370_v0 }
  0x31   : > { %403 = vst [vmem:[%s715_s27 + $0xc8] sm:$0xff] %v371_v12 }
  0x32   : > { %404 = vst [vmem:[%s715_s27 + $0xd0] sm:$0xff] %v372_v13 }
  0x33   : > { %405 = vst [vmem:[%s715_s27 + $0xd8] sm:$0xff] %v373_v15 }
  0x34   : > { %406 = vst [vmem:[%s715_s27 + $0xe0] sm:$0xff] %v374_v17 }
  0x35   : > { %407 = vst [vmem:[%s715_s27 + $0xe8] sm:$0xff] %v375_v18 }
  0x36   : > { %408 = vst [vmem:[%s715_s27 + $0xf0] sm:$0xff] %v376_v19 }
  0x37   : > { %409 = vst [vmem:[%s715_s27 + $0xf8] sm:$0xff] %v377_v20 }
  0x38 PF: > { %s13_s14 = sadd.s32 1, %s637_s14   ;;  %s826_s12 = smov %s633_s13 }
  0x39   : > { %p10_p5 = scmp.ge.s32.totalorder %s13_s14, 4   ;;  %s827_s13 = smov %s829_s15 }
  0x3b   :  { %12 = sbr.rel (!%p10_p5) target bundleno = 2 (0x2), region = 62 }

// kernel: up_forward.3
= control target key start
LH: loop header
LB: loop body
LE: loop exit
PB: predicated region body
PF: predicated region fallthrough
CT: control target
= control target key end

     0   :  { %s3337_s30 = smov 0   ;;  %s3339_s10 = smov 0   ;;  %s4179_s0 = inlined_call_operand.vmem [shape: bf16[2,16,16,128], index: 0, kind: input, shape index: {}, may-alias: {0,1,2}]   ;;  %s4180_s1 = inlined_call_operand.vmem [shape: bf16[2,16,16,128], index: 1, kind: input, shape index: {}, may-alias: {0,1,2}]   ;;  %s4181_s2 = inlined_call_operand.vmem [shape: bf16[2,16,16,128], index: 2, kind: input, shape index: {}, may-alias: {0,1,2}]   ;;  %s4182_s3 = inlined_call_operand.vmem [shape: bf16[3,384,128], index: 3, kind: input, shape index: {}]   ;;  %s4183_s4 = inlined_call_operand.vmem [shape: f32[1,128], index: 4, kind: input, shape index: {}]   ;;  %s4184_s5 = inlined_call_operand.vmem [shape: f32[1,128], index: 5, kind: input, shape index: {}]   ;;  %s4185_s6 = inlined_call_operand.vmem [shape: f32[1,128], index: 6, kind: input, shape index: {}]   ;;  %s4186_s7 = inlined_call_operand.vmem [shape: bf16[2,256,128], index: 7, kind: output, shape index: {0}]   ;;  %s4187_s8 = inlined_call_operand.vmem [shape: f32[2,2,1,128], index: 8, kind: output, shape index: {1}]   ;;  %s4188_s9 = inlined_call_operand.vmem [shape: f32[2,2,1,128], index: 9, kind: output, shape index: {2}]  }
   0x1   :  { %s3341_s11 = smov 0   ;;  %s3343_s12 = smov 0  }
   0x2   :  { %s3345_s5 = smov 0  }
   0x3 LB: > { %s29_s6 = sadd.s32 1, %s3277_s11  ;;  %s32_s13 = sadd.s32 1, %s3281_s12  ;;  %s3285_s5 = sphi %s3345_s5, %s20_s5   ;;  %s3281_s12 = sphi %s3343_s12, %s4203_s12   ;;  %s3277_s11 = sphi %s3341_s11, %s4202_s11   ;;  %s3273_s10 = sphi %s3339_s10, %s4201_s10   ;;  %s3269_s30 = sphi %s3337_s30, %s4200_s30  }
   0x4   : > { %p30_p0 = scmp.ge.s32.totalorder %s29_s6, 2  ;;  %p2592_p1 = scmp.ge.s32.totalorder %s3285_s5, 1 }
   0x5   : > { %p382_p2 = scmp.lt.s32.totalorder %s3285_s5, 5 }
   0x6   : > { %s4205_s6 = smov (%p30_p0, %s29_s6), 0  ;;  %s4207_s13 = smov (!%p30_p0, %s32_s13), %s3281_s12 }
   0x7   : > { %p383_p3 = pnand %p2592_p1, %p382_p2  ;;  %p34_p4 = scmp.ge.s32.totalorder %s4207_s13, 2 }
   0x8   : > { %s3373_s16 = sshll.u32 (!%p383_p3), %s3269_s30, 3  ;;  %p468_p5 = scmp.lt.s32.totalorder (!%p383_p3), %s3273_s10, 1 }
   0x9   : > { %s4209_s13 = smov (%p34_p4, %s4207_s13), 0  ;;  %386 = sbr.rel (%p383_p3) target bundleno = 484 (0x1e4), region = 48 }
   0xa   : > { %p470_p6 = scmp.lt.s32.totalorder (!%p383_p3), %s3373_s16, 15  ;;  %s3377_s17 = sadd.s32 (!%p383_p3), 4294967295, %s3373_s16 }
   0xb   : > { %p480_p7 = scmp.gt.s32.totalorder (!%p383_p3), %s3377_s17, 0  ;;  %p604_p8 = scmp.gt.s32.totalorder (!%p383_p3), %s3269_s30, 0 }
   0xc   : > { %p2599_p9 = scmp.lt.s32.totalorder (!%p383_p3), %s3377_s17, 15  ;;  %s3052_s14 = sadd.s32 (!%p383_p3), 8, %s3373_s16 }
   0xd   : > { %p3981_p10 = scmp.lt.s32.totalorder (!%p383_p3), %s3052_s14, 15  ;;  %p524_p11 = scmp.lt.s32.totalorder (!%p383_p3), %s3269_s30, 1 }
   0xe   : > { %v3070_v0 = vld [vmem:[%s4182_s3 + $0x38] sm:$0xff]  ;;  %vm537_vm0 = vcmask 1040384   ;;  %v3069_v1 = vld [vmem:[%s4182_s3 + $0x30] sm:$0xff]  ;;  %s4211_s10 = smov (!%p468_p5, %s3273_s10), 1  ;;  %vm538_vm1 = vsmask.f32 256 }
   0xf   : > { %1346 = vmatpush.bf16.msra.mxu0 %v3070_v0  ;;  %3182 = vmatpush.bf16.msra.mxu1 %v3070_v0  ;;  %s471_s20 = scalar_select %p470_p6, %s3373_s16, 15  ;;  %vm3387_vm2 = vmand %vm537_vm0, %vm538_vm1  ;;  %v540_v3 = vld [vmem:[#allocation2] sm:$0x1]  ;;  %v3068_v4 = vld [vmem:[%s4182_s3 + $0x28] sm:$0xff]  ;;  %vm570_vm3 = vsmask.f32 7938 }
  0x10   : > { %3183 = vmatpush.bf16.msra.mxu2 %v3070_v0  ;;  %3184 = vmatpush.bf16.msra.mxu3 %v3070_v0  ;;  %s3395_s23 = sshll.u32 %s4211_s10, 5  ;;  %v541_v5 = vsel %vm3387_vm2, 0, %v540_v3  ;;  %v546_v6 = vld [vmem:[#allocation2 + $0x18] sm:$0x1]  ;;  %v552_v8 = vld [vmem:[#allocation2 + $0x30] sm:$0x1]  ;;  %vm3589_vm9 = vmand %vm537_vm0, %vm570_vm3 }
  0x11   : > { %s2594_s24 = sshll.u32 %s471_s20, 1  ;;  %542 = vst [vmem:[#allocation2] sm:$0x1] %v541_v5  ;;  %v547_v7 = vsel %vm3387_vm2, 0, %v546_v6  ;;  %v553_v9 = vsel %vm3387_vm2, 0, %v552_v8  ;;  %v3067_v10 = vld [vmem:[%s4182_s3 + $0x20] sm:$0xff] }
  0x12   : > { %s474_s25 = sadd.s32 %s3395_s23, %s2594_s24  ;;  %548 = vst [vmem:[#allocation2 + $0x18] sm:$0x1] %v547_v7  ;;  %vm610_vm4 = vsmask.f32 4368  ;;  %v558_v11 = vld [vmem:[#allocation2 + $0x48] sm:$0x1] }
  0x13   : > { %1347 = vmatpush.bf16.msra.mxu0 %v3069_v1  ;;  %3185 = vmatpush.bf16.msra.mxu1 %v3069_v1  ;;  %s2596_s26 = sshll.u32 %s474_s25, 2  ;;  %554 = vst [vmem:[#allocation2 + $0x30] sm:$0x1] %v553_v9  ;;  %vm632_vm5 = vcmask 1043456   ;;  %v559_v20 = vsel %vm3387_vm2, 0, %v558_v11  ;;  %vm3430_vm6 = vmor %vm538_vm1, %vm610_vm4  ;;  %v3066_v26 = vld [vmem:[%s4182_s3 + $0x18] sm:$0xff] }
  0x14   : > { %3186 = vmatpush.bf16.msra.mxu2 %v3069_v1  ;;  %3187 = vmatpush.bf16.msra.mxu3 %v3069_v1  ;;  %s3413_s15 = scalar_lea.vmem %s4179_s0, %s2596_s26  ;;  %vm3445_vm8 = vmand %vm632_vm5, %vm570_vm3  ;;  %560 = vst [vmem:[#allocation2 + $0x48] sm:$0x1] %v559_v20  ;;  %v3065_v48 = vld [vmem:[%s4182_s3 + $0x10] sm:$0xff]  ;;  %v3064_v62 = vld [vmem:[%s4182_s3 + $0x8] sm:$0xff]  ;;  %vm1121_vm10 = vcmask 1046528   ;;  %s4215_s14 = smov (!%p3981_p10, %s3052_s14), 15 }
  0x15   : > { %s481_s18 = scalar_select %p480_p7, %s3377_s17, 0  ;;  %v643_v12 = vld [vmem:[%s3413_s15 + $0x8] sm:$0xf]  ;;  %v644_v13 = vld [vmem:[%s3413_s15 + $0xc] sm:$0xf]  ;;  %v3086_v27 = vld [vmem:[%s4182_s3 + $0xb8] sm:$0xff] }
  0x16   : > { %s605_s19 = scalar_select %p604_p8, 1, 0  ;;  %v675_v14 = vshrl.u32 %v643_v12, 16  ;;  %v678_v15 = vshll.u32 %v643_v12, 16  ;;  %v683_v16 = vshrl.u32 %v644_v13, 16  ;;  %v686_v17 = vshll.u32 %v644_v13, 16 }
  0x17   : > { %1348 = vmatpush.bf16.msra.mxu0 %v3068_v4  ;;  %3188 = vmatpush.bf16.msra.mxu1 %v3068_v4  ;;  %s4213_s18 = smov (!%p2599_p9, %s481_s18), 15  ;;  %v647_v18 = vld [vmem:[%s3413_s15 + $0x18] sm:$0xf]  ;;  %v648_v19 = vld [vmem:[%s3413_s15 + $0x1c] sm:$0xf]  ;;  %s4217_s14 = smov (!%p3981_p10, %s4215_s14), 15 }
  0x18   : > { %3189 = vmatpush.bf16.msra.mxu2 %v3068_v4  ;;  %3190 = vmatpush.bf16.msra.mxu3 %v3068_v4  ;;  %v606_v21 = vstv %s605_s19  ;;  %v677_v23 = vrot.slane %v675_v14, 7  ;;  %v3434_v24 = vrot.slane %v683_v16, 7  ;;  %v709_v25 = vshrl.u32 %v647_v18, 16  ;;  %s2604_s21 = sshll.u32 %s4213_s18, 1  ;;  %v651_v39 = vld [vmem:[%s3413_s15 + $0x28] sm:$0xf] }
  0x19   : > { %vm3439_vm7 = vcmp.eq.s32.totalorder %v606_v21, 1  ;;  %v712_v29 = vshll.u32 %v647_v18, 16  ;;  %v717_v30 = vshrl.u32 %v648_v19, 16  ;;  %v720_v31 = vshll.u32 %v648_v19, 16  ;;  %s488_s22 = sadd.s32 %s2604_s21, %s3395_s23  ;;  %v825_v35 = vld [vmem:[#allocation2 + $0x18] sm:$0xf] }
  0x1a   : > { %v680_v32 = vor.u32 %v678_v15, %v677_v23  ;;  %v681_v33 = vrot.slane %v677_v23, 4  ;;  %v688_v34 = vor.u32 %v686_v17, %v3434_v24  ;;  %v711_v36 = vrot.slane %v709_v25, 7  ;;  %s2606_s24 = sshll.u32 %s488_s22, 2  ;;  %v839_v38 = vld [vmem:[#allocation2 + $0x30] sm:$0xf]  ;;  %v3063_v19 = vld [vmem:[%s4182_s3] sm:$0xff] }
  0x1b   : > { %1349 = vmatpush.bf16.msra.mxu0 %v3067_v10  ;;  %3191 = vmatpush.bf16.msra.mxu1 %v3067_v10  ;;  %v3451_v37 = vrot.slane %v717_v30, 7  ;;  %s490_s27 = scalar_lea.vmem %s4180_s1, %s2606_s24  ;;  %v652_v44 = vld [vmem:[%s3413_s15 + $0x2c] sm:$0xf]  ;;  %v743_v52 = vshrl.u32 %v651_v39, 16  ;;  %v634_v57 = vld [vmem:[#allocation2] sm:$0xf] }
  0x1c   : > { %3192 = vmatpush.bf16.msra.mxu2 %v3067_v10  ;;  %3193 = vmatpush.bf16.msra.mxu3 %v3067_v10  ;;  %v689_v40 = vsel %vm3430_vm6, %v681_v33, %v688_v34  ;;  %v826_v41 = vsel %vm3445_vm8, %v680_v32, %v825_v35  ;;  %v714_v42 = vor.u32 %v712_v29, %v711_v36  ;;  %v715_v43 = vrot.slane %v711_v36, 4  ;;  %v602_v45 = vld [vmem:[%s490_s27] sm:$0xf]  ;;  %v603_v46 = vld [vmem:[%s490_s27 + $0x4] sm:$0xf]  ;;  %v3094_v29 = vld [vmem:[%s4182_s3 + $0xf8] sm:$0xff] }
  0x1d   : > { %827 = vst [vmem:[#allocation2 + $0x18] sm:$0xf] %v826_v41  ;;  %v722_v47 = vor.u32 %v720_v31, %v3451_v37  ;;  %v608_v49 = vsel %vm3439_vm7, %v602_v45, 0  ;;  %v609_v50 = vsel %vm3439_vm7, %v603_v46, 0  ;;  %v745_v59 = vrot.slane %v743_v52, 7  ;;  %v3102_v34 = vld [vmem:[%s4182_s3 + $0x138] sm:$0xff] }
  0x1e   : > { %828 = vst [vmem:[#allocation2 + $0x1c] sm:$0xf] %v689_v40  ;;  %v840_v51 = vsel %vm3445_vm8, %v714_v42, %v839_v38  ;;  %v613_v53 = vshrl.u32 %v608_v49, 16  ;;  %v616_v54 = vshll.u32 %v608_v49, 16  ;;  %v621_v55 = vshrl.u32 %v609_v50, 16  ;;  %v3078_v40 = vld [vmem:[%s4182_s3 + $0x78] sm:$0xff] }
  0x1f   : > { %1350 = vmatpush.bf16.msra.mxu0 %v3066_v26  ;;  %3194 = vmatpush.bf16.msra.mxu1 %v3066_v26  ;;  %v624_v56 = vshll.u32 %v609_v50, 16  ;;  %841 = vst [vmem:[#allocation2 + $0x30] sm:$0xf] %v840_v51  ;;  %v723_v58 = vsel %vm3430_vm6, %v715_v43, %v722_v47  ;;  %v746_v60 = vshll.u32 %v651_v39, 16  ;;  %v751_v61 = vshrl.u32 %v652_v44, 16  ;;  %s2611_s16 = sshll.u32 %s4217_s14, 1 }
  0x20   : > { %3195 = vmatpush.bf16.msra.mxu2 %v3066_v26  ;;  %3196 = vmatpush.bf16.msra.mxu3 %v3066_v26  ;;  %v615_v63 = vrot.slane %v613_v53, 7  ;;  %v3477_v0 = vrot.slane %v621_v55, 7  ;;  %842 = vst [vmem:[#allocation2 + $0x34] sm:$0xf] %v723_v58  ;;  %v754_v1 = vshll.u32 %v652_v44, 16  ;;  %v749_v4 = vrot.slane %v745_v59, 4  ;;  %s505_s19 = sadd.s32 %s2611_s16, %s3395_s23 }
  0x21   : > { %v748_v3 = vor.u32 %v746_v60, %v745_v59  ;;  %v3479_v5 = vrot.slane %v751_v61, 7  ;;  %v853_v6 = vld [vmem:[#allocation2 + $0x48] sm:$0xf]  ;;  %v543_v7 = vld [vmem:[#allocation2 + $0xc] sm:$0x1]  ;;  %s2613_s20 = sshll.u32 %s505_s19, 2 }
  0x22   : > { %v618_v8 = vor.u32 %v616_v54, %v615_v63  ;;  %v619_v9 = vrot.slane %v615_v63, 4  ;;  %v626_v10 = vor.u32 %v624_v56, %v3477_v0  ;;  %v3483_v11 = vld [vmem:[%s3413_s15] sm:$0xf]  ;;  %v642_v12 = vld [vmem:[%s3413_s15 + $0x4] sm:$0xf]  ;;  %v544_v15 = vsel %vm3387_vm2, 0, %v543_v7  ;;  %s507_s24 = scalar_lea.vmem %s4181_s2, %s2613_s20 }
  0x23   : > { %1351 = vmatpush.bf16.msra.mxu0 %v3065_v48  ;;  %3197 = vmatpush.bf16.msra.mxu1 %v3065_v48  ;;  %v756_v13 = vor.u32 %v754_v1, %v3479_v5  ;;  %v854_v14 = vsel %vm3445_vm8, %v748_v3, %v853_v6  ;;  %v658_v16 = vshrl.u32 %v3483_v11, 16  ;;  %v549_v17 = vld [vmem:[#allocation2 + $0x24] sm:$0x1]  ;;  %v3493_v18 = vld [vmem:[%s3413_s15 + $0x10] sm:$0xf]  ;;  %v661_v23 = vshll.u32 %v3483_v11, 16 }
  0x24   : > { %3198 = vmatpush.bf16.msra.mxu2 %v3065_v48  ;;  %3199 = vmatpush.bf16.msra.mxu3 %v3065_v48  ;;  %v627_v20 = vsel %vm3430_vm6, %v619_v9, %v626_v10  ;;  %v635_v21 = vsel %vm3445_vm8, %v618_v8, %v634_v57  ;;  %855 = vst [vmem:[#allocation2 + $0x48] sm:$0xf] %v854_v14  ;;  %v666_v25 = vshrl.u32 %v642_v12, 16  ;;  %v669_v31 = vshll.u32 %v642_v12, 16  ;;  %v646_v36 = vld [vmem:[%s3413_s15 + $0x14] sm:$0xf] }
  0x25   : > { %636 = vst [vmem:[#allocation2] sm:$0xf] %v635_v21  ;;  %v757_v26 = vsel %vm3430_vm6, %v749_v4, %v756_v13  ;;  %v660_v30 = vrot.slane %v658_v16, 7  ;;  %v550_v32 = vsel %vm3387_vm2, 0, %v549_v17  ;;  %v3513_v33 = vld [vmem:[#allocation2 + $0x18] sm:$0xff]  ;;  %v692_v38 = vshrl.u32 %v3493_v18, 16 }
  0x26   : > { %637 = vst [vmem:[#allocation2 + $0x4] sm:$0xf] %v627_v20  ;;  %v3518_v35 = vrot.slane %v666_v25, 7  ;;  %v695_v42 = vshll.u32 %v3493_v18, 16  ;;  %v700_v43 = vshrl.u32 %v646_v36, 16  ;;  %v703_v46 = vshll.u32 %v646_v36, 16 }
  0x27   : > { %1352 = vmatpush.bf16.msra.mxu0 %v3064_v62  ;;  %3200 = vmatpush.bf16.msra.mxu1 %v3064_v62  ;;  %v3522_v39 = vld [vmem:[#allocation2 + $0x30] sm:$0xff]  ;;  %856 = vst [vmem:[#allocation2 + $0x4c] sm:$0xf] %v757_v26  ;;  %v664_v41 = vrot.slane %v660_v30, 4  ;;  %v694_v45 = vrot.slane %v692_v38, 7  ;;  %v663_v63 = vor.u32 %v661_v23, %v660_v30  ;;  %v3084_v8 = vld [vmem:[%s4182_s3 + $0xa8] sm:$0xff] }
  0x28   : > { %3201 = vmatpush.bf16.msra.mxu2 %v3064_v62  ;;  %3202 = vmatpush.bf16.msra.mxu3 %v3064_v62  ;;  %545 = vst [vmem:[#allocation2 + $0xc] sm:$0x1] %v544_v15  ;;  %v671_v44 = vor.u32 %v669_v31, %v3518_v35  ;;  %v555_v47 = vld [vmem:[#allocation2 + $0x3c] sm:$0x1]  ;;  %v3085_v48 = vld [vmem:[%s4182_s3 + $0xb0] sm:$0xff]  ;;  %v3532_v49 = vrot.slane %v700_v43, 7 }
  0x29   : > { %551 = vst [vmem:[#allocation2 + $0x24] sm:$0x1] %v550_v32  ;;  %v556_v50 = vsel %vm3387_vm2, 0, %v555_v47  ;;  %v649_v51 = vld [vmem:[%s3413_s15 + $0x20] sm:$0xf]  ;;  %v698_v53 = vrot.slane %v694_v45, 4  ;;  %v697_v1 = vor.u32 %v695_v42, %v694_v45 }
  0x2a   : > { %v672_v52 = vsel %vm3430_vm6, %v664_v41, %v671_v44  ;;  %557 = vst [vmem:[#allocation2 + $0x3c] sm:$0x1] %v556_v50  ;;  %v650_v54 = vld [vmem:[%s3413_s15 + $0x24] sm:$0xf]  ;;  %v726_v55 = vshrl.u32 %v649_v51, 16  ;;  %v3093_v56 = vld [vmem:[%s4182_s3 + $0xf0] sm:$0xff]  ;;  %v705_v58 = vor.u32 %v703_v46, %v3532_v49 }
  0x2b   : > { %1353 = vmatpush.bf16.msra.mxu0 %v3063_v19  ;;  %3203 = vmatpush.bf16.msra.mxu1 %v3063_v19  ;;  %v3077_v57 = vld [vmem:[%s4182_s3 + $0x70] sm:$0xff]  ;;  %821 = vst [vmem:[#allocation2 + $0x10] sm:$0xf] %v672_v52  ;;  %v729_v59 = vshll.u32 %v649_v51, 16  ;;  %v734_v60 = vshrl.u32 %v650_v54, 16  ;;  %v737_v61 = vshll.u32 %v650_v54, 16 }
  0x2c   : > { %3204 = vmatpush.bf16.msra.mxu2 %v3063_v19  ;;  %3205 = vmatpush.bf16.msra.mxu3 %v3063_v19  ;;  %v3101_v62 = vld [vmem:[%s4182_s3 + $0x130] sm:$0xff]  ;;  %v728_v3 = vrot.slane %v726_v55, 7  ;;  %v706_v9 = vsel %vm3430_vm6, %v698_v53, %v705_v58  ;;  %v3100_v25 = vld [vmem:[%s4182_s3 + $0x128] sm:$0xff]  ;;  %v3083_v43 = vld [vmem:[%s4182_s3 + $0xa0] sm:$0xff]  ;;  %vm1016_vm11 = vsmask.f32 7424 }
  0x2d   : > { %v561_v4 = vld [vmem:[#allocation2 + $0x54] sm:$0x1]  ;;  %v653_v6 = vld [vmem:[%s3413_s15 + $0x30] sm:$0xf]  ;;  %v3552_v7 = vld [vmem:[#allocation2] sm:$0xff]  ;;  %v3560_v10 = vrot.slane %v734_v60, 7 }
  0x2e   : > { %1364 = vmatmul.bf16.vlgmr.msra.gmra.mxu1 %v3513_v33  ;;  %v562_v11 = vsel %vm3387_vm2, 0, %v561_v4  ;;  %v654_v12 = vld [vmem:[%s3413_s15 + $0x34] sm:$0xf]  ;;  %v760_v13 = vshrl.u32 %v653_v6, 16  ;;  %v3565_v14 = vld [vmem:[#allocation2 + $0x48] sm:$0xff]  ;;  %v731_v15 = vor.u32 %v729_v59, %v728_v3  ;;  %v732_v16 = vrot.slane %v728_v3, 4  ;;  %1354 = vmatmul.bf16.vlgmr.msra.gmra.mxu0 %v3552_v7 }
  0x2f   : > { %1777 = vmatpush.bf16.msrb.mxu0 %v3102_v34  ;;  %1374 = vmatmul.bf16.vlgmr.msra.gmra.mxu2 %v3522_v39  ;;  %835 = vst [vmem:[#allocation2 + $0x28] sm:$0xf] %v706_v9  ;;  %v763_v17 = vshll.u32 %v653_v6, 16  ;;  %v768_v18 = vshrl.u32 %v654_v12, 16  ;;  %v818_v19 = vld [vmem:[#allocation2 + $0xc] sm:$0xf]  ;;  %v739_v20 = vor.u32 %v737_v61, %v3560_v10 }
  0x30   : > { %1444 = vmatpush.bf16.msrb.mxu2 %v3086_v27  ;;  %1728 = vmatpush.bf16.msrb.mxu3 %v3094_v29  ;;  %563 = vst [vmem:[#allocation2 + $0x54] sm:$0x1] %v562_v11  ;;  %v762_v21 = vrot.slane %v760_v13, 7  ;;  %v771_v23 = vshll.u32 %v654_v12, 16  ;;  %v819_v26 = vsel %vm3445_vm8, %v663_v63, %v818_v19  ;;  %v832_v27 = vld [vmem:[#allocation2 + $0x24] sm:$0xf] }
  0x31   : > { %1395 = vmatpush.bf16.msrb.mxu1 %v3078_v40  ;;  %1384 = vmatmul.bf16.vlgmr.msra.gmra.mxu3 %v3565_v14  ;;  %v3575_v29 = vrot.slane %v768_v18, 7  ;;  %v3092_v30 = vld [vmem:[%s4182_s3 + $0xe8] sm:$0xff]  ;;  %820 = vst [vmem:[#allocation2 + $0xc] sm:$0xf] %v819_v26  ;;  %v833_v32 = vsel %vm3445_vm8, %v697_v1, %v832_v27  ;;  %v740_v34 = vsel %vm3430_vm6, %v732_v16, %v739_v20  ;;  %v846_v36 = vld [vmem:[#allocation2 + $0x3c] sm:$0xf] }
  0x32   : > { %v3076_v31 = vld [vmem:[%s4182_s3 + $0x68] sm:$0xff]  ;;  %834 = vst [vmem:[#allocation2 + $0x24] sm:$0xf] %v833_v32  ;;  %v847_v40 = vsel %vm3445_vm8, %v731_v15, %v846_v36  ;;  %v766_v41 = vrot.slane %v762_v21, 4  ;;  %v765_v44 = vor.u32 %v763_v17, %v762_v21  ;;  %v3099_v45 = vld [vmem:[%s4182_s3 + $0x120] sm:$0xff]  ;;  %v3082_v54 = vld [vmem:[%s4182_s3 + $0x98] sm:$0xff] }
  0x33   : > { %1778 = vmatpush.bf16.msrb.mxu0 %v3101_v62  ;;  %v773_v42 = vor.u32 %v771_v23, %v3575_v29  ;;  %848 = vst [vmem:[#allocation2 + $0x3c] sm:$0xf] %v847_v40  ;;  %v572_v47 = vld [vmem:[#allocation2 + $0x8] sm:$0x1]  ;;  %v3075_v50 = vld [vmem:[%s4182_s3 + $0x60] sm:$0xff]  ;;  %v3074_v60 = vld [vmem:[%s4182_s3 + $0x58] sm:$0xff] }
  0x34   : > { %1445 = vmatpush.bf16.msrb.mxu2 %v3085_v48  ;;  %1729 = vmatpush.bf16.msrb.mxu3 %v3093_v56  ;;  %849 = vst [vmem:[#allocation2 + $0x40] sm:$0xf] %v740_v34  ;;  %v3091_v48 = vld [vmem:[%s4182_s3 + $0xe0] sm:$0xff]  ;;  %v573_v51 = vsel %vm3589_vm9, 0, %v572_v47  ;;  %v575_v55 = vld [vmem:[#allocation2 + $0x14] sm:$0x1] }
  0x35   : > { %1396 = vmatpush.bf16.msrb.mxu1 %v3077_v57  ;;  %v774_v46 = vsel %vm3430_vm6, %v766_v41, %v773_v42  ;;  %574 = vst [vmem:[#allocation2 + $0x8] sm:$0x1] %v573_v51  ;;  %v3090_v56 = vld [vmem:[%s4182_s3 + $0xd8] sm:$0xff]  ;;  %v576_v58 = vsel %vm3589_vm9, 0, %v575_v55  ;;  %v578_v61 = vld [vmem:[#allocation2 + $0x20] sm:$0x1] }
  0x36   : > { %863 = vst [vmem:[#allocation2 + $0x58] sm:$0xf] %v774_v46  ;;  %v3098_v57 = vld [vmem:[%s4182_s3 + $0x118] sm:$0xff]  ;;  %v628_v62 = vrot.slane %v3477_v0, 4  ;;  %v3081_v1 = vld [vmem:[%s4182_s3 + $0x90] sm:$0xff]  ;;  %v579_v3 = vsel %vm3589_vm9, 0, %v578_v61 }
  0x37   : > { %1779 = vmatpush.bf16.msrb.mxu0 %v3100_v25  ;;  %v860_v52 = vld [vmem:[#allocation2 + $0x54] sm:$0xf]  ;;  %577 = vst [vmem:[#allocation2 + $0x14] sm:$0x1] %v576_v58  ;;  %v581_v4 = vld [vmem:[#allocation2 + $0x2c] sm:$0x1] }
  0x38   : > { %1446 = vmatpush.bf16.msrb.mxu2 %v3084_v8  ;;  %1730 = vmatpush.bf16.msrb.mxu3 %v3092_v30  ;;  %v861_v53 = vsel %vm3445_vm8, %v765_v44, %v860_v52  ;;  %v3631_v63 = vld [vmem:[#allocation2 + $0xc] sm:$0xff]  ;;  %580 = vst [vmem:[#allocation2 + $0x20] sm:$0x1] %v579_v3  ;;  %v582_v8 = vsel %vm3589_vm9, 0, %v581_v4  ;;  %v673_v11 = vrot.slane %v3518_v35, 4  ;;  %v690_v17 = vrot.slane %v3434_v24, 4 }
  0x39   : > { %1397 = vmatpush.bf16.msrb.mxu1 %v3076_v31  ;;  %862 = vst [vmem:[#allocation2 + $0x54] sm:$0xf] %v861_v53  ;;  %v3625_v59 = vld [vmem:[#allocation2 + $0x24] sm:$0xff]  ;;  %v3097_v0 = vld [vmem:[%s4182_s3 + $0x110] sm:$0xff]  ;;  %v707_v21 = vrot.slane %v3532_v49, 4  ;;  %v1020_v27 = vshll.u32 %v3552_v7, 16 }
  0x3a   : > { %583 = vst [vmem:[#allocation2 + $0x2c] sm:$0x1] %v582_v8  ;;  %v3089_v12 = vld [vmem:[%s4182_s3 + $0xd0] sm:$0xff]  ;;  %v3080_v35 = vld [vmem:[%s4182_s3 + $0x88] sm:$0xff]  ;;  %v3079_v26 = vld [vmem:[%s4182_s3 + $0x80] sm:$0xff]  ;;  %v1030_v58 = vshrl.u32 %v3631_v63, 16 }
  0x3b   : > { %1780 = vmatpush.bf16.msrb.mxu0 %v3099_v45  ;;  %v3638_v6 = vld [vmem:[#allocation2 + $0x3c] sm:$0xff]  ;;  %v3073_v13 = vld [vmem:[%s4182_s3 + $0x50] sm:$0xff]  ;;  %v3096_v18 = vld [vmem:[%s4182_s3 + $0x108] sm:$0xff]  ;;  %v1018_v45 = vshrl.u32 %v3552_v7, 16  ;;  %v1022_v46 = vrot.slane %v1020_v27, 1  ;;  %v1125_v27 = vrot.slane %v3631_v63, 1 }
  0x3c   : > { %1447 = vmatpush.bf16.msrb.mxu2 %v3083_v43  ;;  %1731 = vmatpush.bf16.msrb.mxu3 %v3091_v48  ;;  %v638_v9 = vld [vmem:[#allocation2 + $0x8] sm:$0x1]  ;;  %v3095_v30 = vld [vmem:[%s4182_s3 + $0x100] sm:$0xff]  ;;  %v3118_v31 = vld [vmem:[%s4182_s3 + $0x1b8] sm:$0xff]  ;;  %v1032_v43 = vshll.u32 %v3631_v63, 16  ;;  %s2614_s27 = sshll.u32 %s3269_s30, 4 }
  0x3d   : > { %1398 = vmatpush.bf16.msrb.mxu1 %v3075_v50  ;;  %v639_v15 = vsel %vm3387_vm2, %v628_v62, %v638_v9  ;;  %v3088_v23 = vld [vmem:[%s4182_s3 + $0xc8] sm:$0xff]  ;;  %v3087_v34 = vld [vmem:[%s4182_s3 + $0xc0] sm:$0xff]  ;;  %v3134_v36 = vld [vmem:[%s4182_s3 + $0x238] sm:$0xff]  ;;  %v1023_v61 = vor.u32 %v1022_v46, %v1018_v45  ;;  %s877_s17 = scalar_select %p524_p11, 1, 0 }
  0x3e   : > { %1369 = vmatmul.bf16.gmra.mxu1 %v3625_v59  ;;  %1359 = vmatmul.bf16.gmra.mxu0 %v3631_v63  ;;  %640 = vst [vmem:[#allocation2 + $0x8] sm:$0x1] %v639_v15  ;;  %v822_v19 = vld [vmem:[#allocation2 + $0x14] sm:$0x1]  ;;  %v3072_v24 = vld [vmem:[%s4182_s3 + $0x48] sm:$0xff]  ;;  %v3071_v41 = vld [vmem:[%s4182_s3 + $0x40] sm:$0xff] }
  0x3f   : > { %1781 = vmatpush.bf16.msrb.mxu0 %v3098_v57  ;;  %1379 = vmatmul.bf16.gmra.mxu2 %v3638_v6  ;;  %v823_v20 = vsel %vm3387_vm2, %v673_v11, %v822_v19  ;;  %v829_v25 = vld [vmem:[#allocation2 + $0x20] sm:$0x1]  ;;  %v3126_v47 = vld [vmem:[%s4182_s3 + $0x1f8] sm:$0xff]  ;;  %v3117_v51 = vld [vmem:[%s4182_s3 + $0x1b0] sm:$0xff]  ;;  %v724_v15 = vrot.slane %v3451_v37, 4  ;;  %p515_p12 = scmp.lt.s32.totalorder %s2614_s27, 31 }
  0x40   : > { %1448 = vmatpush.bf16.msrb.mxu2 %v3082_v54  ;;  %1732 = vmatpush.bf16.msrb.mxu3 %v3090_v56  ;;  %v3657_v16 = vld [vmem:[#allocation2 + $0x54] sm:$0xff]  ;;  %824 = vst [vmem:[#allocation2 + $0x14] sm:$0x1] %v823_v20  ;;  %v830_v49 = vsel %vm3387_vm2, %v690_v17, %v829_v25  ;;  %v1122_v54 = vrot.slane %v3552_v7, 1  ;;  %v3124_v37 = vld [vmem:[%s4182_s3 + $0x1e8] sm:$0xff]  ;;  %v1044_v25 = vshll.u32 %v3513_v33, 16 }
  0x41   : > { %1399 = vmatpush.bf16.msrb.mxu1 %v3074_v60  ;;  %1389 = vmatmul.bf16.gmra.mxu3 %v3657_v16  ;;  %831 = vst [vmem:[#allocation2 + $0x20] sm:$0x1] %v830_v49  ;;  %v836_v32 = vld [vmem:[#allocation2 + $0x2c] sm:$0x1]  ;;  %v3110_v48 = vld [vmem:[%s4182_s3 + $0x178] sm:$0xff]  ;;  %v3133_v56 = vld [vmem:[%s4182_s3 + $0x230] sm:$0xff] }
  0x42   : > { %v837_v40 = vsel %vm3387_vm2, %v707_v21, %v836_v32  ;;  %v584_v50 = vld [vmem:[#allocation2 + $0x38] sm:$0x1]  ;;  %v1034_v60 = vrot.slane %v1032_v43, 1  ;;  %v3125_v7 = vld [vmem:[%s4182_s3 + $0x1f0] sm:$0xff]  ;;  %v3116_v21 = vld [vmem:[%s4182_s3 + $0x1a8] sm:$0xff]  ;;  %v1046_v32 = vrot.slane %v1044_v25, 1 }
  0x43   : > { %1782 = vmatpush.bf16.msrb.mxu0 %v3097_v0  ;;  %838 = vst [vmem:[#allocation2 + $0x2c] sm:$0x1] %v837_v40  ;;  %v585_v52 = vsel %vm3589_vm9, 0, %v584_v50  ;;  %v3109_v3 = vld [vmem:[%s4182_s3 + $0x170] sm:$0xff]  ;;  %v3107_v50 = vld [vmem:[%s4182_s3 + $0x160] sm:$0xff]  ;;  %s4219_s27 = smov (!%p515_p12, %s2614_s27), 31 }
  0x44   : > { %1449 = vmatpush.bf16.msrb.mxu2 %v3081_v1  ;;  %1733 = vmatpush.bf16.msrb.mxu3 %v3089_v12  ;;  %586 = vst [vmem:[#allocation2 + $0x38] sm:$0x1] %v585_v52  ;;  %v1035_v11 = vor.u32 %v1034_v60, %v1030_v58  ;;  %v1056_v52 = vshll.u32 %v3625_v59, 16  ;;  %s518_s28 = sadd.s32 %s3395_s23, %s4219_s27  ;;  %s4221_s30 = smov (!%p524_p11, %s3269_s30), 1 }
  0x45   : > { %1400 = vmatpush.bf16.msrb.mxu1 %v3073_v13  ;;  %v912_v42 = vld [vmem:[#allocation2 + $0x8] sm:$0x1]  ;;  %s2617_s23 = sshll.u32 %s4211_s10, 1 }
  0x46   : > { %v1000_v44 = vunpack.c.l.b16 %v912_v42  ;;  %v1058_v58 = vrot.slane %v1056_v52, 1  ;;  %v564_v52 = vld [vmem:[#allocation2 + $0x60] sm:$0x1]  ;;  %s527_s16 = sadd.s32 %s2617_s23, %s4221_s30 }
  0x47   : > { %1783 = vmatpush.bf16.msrb.mxu0 %v3096_v18  ;;  %v915_v55 = vld [vmem:[#allocation2 + $0x14] sm:$0x1] }
  0x48   : > { %1450 = vmatpush.bf16.msrb.mxu2 %v3080_v35  ;;  %1734 = vmatpush.bf16.msrb.mxu3 %v3088_v23  ;;  %v1008_v53 = vpack.c.b16 %v1000_v44, %v1000_v44  ;;  %v1001_v57 = vunpack.c.l.b16 %v915_v55  ;;  %v918_v9 = vld [vmem:[#allocation2 + $0x20] sm:$0x1]  ;;  %v3108_v23 = vld [vmem:[%s4182_s3 + $0x168] sm:$0xff] }
  0x49   : > { %1401 = vmatpush.bf16.msrb.mxu1 %v3072_v24  ;;  %v1002_v17 = vunpack.c.l.b16 %v918_v9 }
  0x4a   : > { %v1025_v62 = vshll.u32 %v1008_v53, 16  ;;  %v1123_v1 = vrot.slane %v1008_v53, 1  ;;  %v1009_v4 = vpack.c.b16 %v1001_v57, %v1001_v57  ;;  %v921_v43 = vld [vmem:[#allocation2 + $0x2c] sm:$0x1]  ;;  %v3131_v53 = vld [vmem:[%s4182_s3 + $0x220] sm:$0xff]  ;;  %v1054_v57 = vshrl.u32 %v3625_v59, 16 }
  0x4b   : > { %1784 = vmatpush.bf16.msrb.mxu0 %v3095_v30  ;;  %v843_v18 = vld [vmem:[#allocation2 + $0x38] sm:$0x1]  ;;  %v1010_v24 = vpack.c.b16 %v1002_v17, %v1002_v17  ;;  %v587_v30 = vld [vmem:[#allocation2 + $0x44] sm:$0x1]  ;;  %v1003_v45 = vunpack.c.l.b16 %v921_v43 }
  0x4c   : > { %1451 = vmatpush.bf16.msrb.mxu2 %v3079_v26  ;;  %1735 = vmatpush.bf16.msrb.mxu3 %v3087_v34  ;;  %v1027_v8 = vrot.slane %v1025_v62, 1  ;;  %v1124_v0 = vsel %vm1121_vm10, %v1122_v54, %v1123_v1  ;;  %v1037_v12 = vshll.u32 %v1009_v4, 16  ;;  %v844_v19 = vsel %vm3387_vm2, %v724_v15, %v843_v18  ;;  %v3132_v26 = vld [vmem:[%s4182_s3 + $0x228] sm:$0xff]  ;;  %v3130_v17 = vld [vmem:[%s4182_s3 + $0x218] sm:$0xff] }
  0x4d   : > { %1402 = vmatpush.bf16.msrb.mxu1 %v3071_v41  ;;  %845 = vst [vmem:[#allocation2 + $0x38] sm:$0x1] %v844_v19  ;;  %v1126_v49 = vrot.slane %v1009_v4, 1  ;;  %v1049_v34 = vshll.u32 %v1010_v24, 16  ;;  %v1128_v54 = vrot.slane %v3513_v33, 1  ;;  %v1129_v55 = vrot.slane %v1010_v24, 1 }
  0x4e   : > { %v1028_v13 = vsel %vm1016_vm11, %v1023_v61, %v1027_v8  ;;  %v1039_v35 = vrot.slane %v1037_v12, 1  ;;  %v1059_v1 = vor.u32 %v1058_v58, %v1054_v57  ;;  %v758_v4 = vrot.slane %v3479_v5, 4  ;;  %v3114_v12 = vld [vmem:[%s4182_s3 + $0x198] sm:$0xff] }
  0x4f   : > { %2208 = vmatpush.bf16.msra.mxu0 %v3134_v36  ;;  %1452 = vmatmul.bf16.vlgmr.msrb.gmra.mxu2 %v1124_v0  ;;  %v588_v36 = vsel %vm3589_vm9, 0, %v587_v30  ;;  %v3748_v40 = vsel %vm1121_vm10, %v1125_v27, %v1126_v49  ;;  %v1051_v42 = vrot.slane %v1049_v34, 1  ;;  %v3777_v62 = vsel %vm1121_vm10, %v1128_v54, %v1129_v55  ;;  %v3122_v5 = vld [vmem:[%s4182_s3 + $0x1d8] sm:$0xff] }
  0x50   : > { %2110 = vmatpush.bf16.msra.mxu2 %v3118_v31  ;;  %2159 = vmatpush.bf16.msra.mxu3 %v3126_v47  ;;  %v1040_v20 = vsel %vm1016_vm11, %v1035_v11, %v1039_v35  ;;  %v1042_v31 = vshrl.u32 %v3513_v33, 16  ;;  %589 = vst [vmem:[#allocation2 + $0x44] sm:$0x1] %v588_v36  ;;  %v1068_v35 = vshll.u32 %v3522_v39, 16  ;;  %v1131_v18 = vrot.slane %v3625_v59, 1 }
  0x51   : > { %1826 = vmatpush.bf16.msra.mxu1 %v3110_v48  ;;  %1736 = vmatmul.bf16.vlgmr.msrb.gmra.mxu3 %v3631_v63  ;;  %v741_v63 = vrot.slane %v3560_v10, 4  ;;  %v3115_v48 = vld [vmem:[%s4182_s3 + $0x1a0] sm:$0xff]  ;;  %v775_v30 = vrot.slane %v3575_v29, 4  ;;  %v3121_v29 = vld [vmem:[%s4182_s3 + $0x1d0] sm:$0xff]  ;;  %v565_v54 = vsel %vm3387_vm2, 0, %v564_v52 }
  0x52   : > { %1403 = vmatmul.bf16.vlgmr.msrb.gmra.mxu1 %v1028_v13  ;;  %1785 = vmatmul.bf16.vlgmr.msrb.gmra.mxu0 %v1040_v20  ;;  %v1047_v41 = vor.u32 %v1046_v32, %v1042_v31  ;;  %v3123_v10 = vld [vmem:[%s4182_s3 + $0x1e0] sm:$0xff]  ;;  %v3106_v13 = vld [vmem:[%s4182_s3 + $0x158] sm:$0xff]  ;;  %566 = vst [vmem:[#allocation2 + $0x60] sm:$0x1] %v565_v54 }
  0x53   : > { %2209 = vmatpush.bf16.msra.mxu0 %v3133_v56  ;;  %v590_v56 = vld [vmem:[#allocation2 + $0x50] sm:$0x1]  ;;  %v656_v55 = vld [vmem:[%s3413_s15 + $0x3c] sm:$0xf]  ;;  %v655_v57 = vld [vmem:[%s3413_s15 + $0x38] sm:$0xf] }
  0x54   : > { %2111 = vmatpush.bf16.msra.mxu2 %v3117_v51  ;;  %2160 = vmatpush.bf16.msra.mxu3 %v3125_v7  ;;  %v3753_v44 = vsel %vm1016_vm11, %v1047_v41, %v1051_v42  ;;  %v1011_v51 = vpack.c.b16 %v1003_v45, %v1003_v45  ;;  %v591_v61 = vsel %vm3589_vm9, 0, %v590_v56  ;;  %v3113_v41 = vld [vmem:[%s4182_s3 + $0x190] sm:$0xff]  ;;  %v785_v58 = vshrl.u32 %v656_v55, 16  ;;  %v3127_v52 = vld [vmem:[%s4182_s3 + $0x200] sm:$0xff]  ;;  %s2616_s15 = sshll.u32 %s518_s28, 2 }
  0x55   : > { %1827 = vmatpush.bf16.msra.mxu1 %v3109_v3  ;;  %592 = vst [vmem:[#allocation2 + $0x50] sm:$0x1] %v591_v61  ;;  %v924_v3 = vld [vmem:[#allocation2 + $0x38] sm:$0x1]  ;;  %v3105_v42 = vld [vmem:[%s4182_s3 + $0x150] sm:$0xff]  ;;  %s4105_s18 = scalar_lea.vmem %s4186_s7, %s2616_s15 }
  0x56   : > { %v1061_v60 = vshll.u32 %v1011_v51, 16  ;;  %v1004_v0 = vunpack.c.l.b16 %v924_v3  ;;  %v1132_v19 = vrot.slane %v1011_v51, 1  ;;  %v3129_v45 = vld [vmem:[%s4182_s3 + $0x210] sm:$0xff]  ;;  %v787_v3 = vrot.slane %v785_v58, 7 }
  0x57   : > { %2210 = vmatpush.bf16.msra.mxu0 %v3132_v26  ;;  %v850_v46 = vld [vmem:[#allocation2 + $0x44] sm:$0x1] }
  0x58   : > { %2112 = vmatpush.bf16.msra.mxu2 %v3116_v21  ;;  %2161 = vmatpush.bf16.msra.mxu3 %v3124_v37  ;;  %v851_v47 = vsel %vm3387_vm2, %v741_v63, %v850_v46  ;;  %v1063_v7 = vrot.slane %v1061_v60, 1  ;;  %v1012_v15 = vpack.c.b16 %v1004_v0, %v1004_v0  ;;  %v1066_v21 = vshrl.u32 %v3522_v39, 16 }
  0x59   : > { %1828 = vmatpush.bf16.msra.mxu1 %v3108_v23  ;;  %852 = vst [vmem:[#allocation2 + $0x44] sm:$0x1] %v851_v47  ;;  %v1070_v37 = vrot.slane %v1068_v35, 1  ;;  %v3807_v25 = vsel %vm1121_vm10, %v1131_v18, %v1132_v19  ;;  %v1080_v63 = vshll.u32 %v3638_v6, 16  ;;  %v1134_v46 = vrot.slane %v3522_v39, 1 }
  0x5a   : > { %v3783_v8 = vsel %vm1016_vm11, %v1059_v1, %v1063_v7  ;;  %v1073_v23 = vshll.u32 %v1012_v15, 16  ;;  %v1135_v47 = vrot.slane %v1012_v15, 1  ;;  %v777_v1 = vshrl.u32 %v655_v57, 16  ;;  %v867_v18 = vld [vmem:[#allocation2 + $0x60] sm:$0xf] }
  0x5b   : > { %2211 = vmatpush.bf16.msra.mxu0 %v3131_v53  ;;  %v1071_v26 = vor.u32 %v1070_v37, %v1066_v21  ;;  %v780_v0 = vshll.u32 %v655_v57, 16  ;;  %v3120_v21 = vld [vmem:[%s4182_s3 + $0x1c8] sm:$0xff] }
  0x5c   : > { %2113 = vmatpush.bf16.msra.mxu2 %v3115_v48  ;;  %2162 = vmatpush.bf16.msra.mxu3 %v3123_v10  ;;  %v857_v9 = vld [vmem:[#allocation2 + $0x50] sm:$0x1]  ;;  %v1075_v27 = vrot.slane %v1073_v23, 1  ;;  %v596_v48 = vld [vmem:[#allocation2 + $0x68] sm:$0x1]  ;;  %v1078_v10 = vshrl.u32 %v3638_v6, 16  ;;  %v3843_v56 = vsel %vm1121_vm10, %v1134_v46, %v1135_v47 }
  0x5d   : > { %1829 = vmatpush.bf16.msra.mxu1 %v3107_v50  ;;  %v858_v11 = vsel %vm3387_vm2, %v758_v4, %v857_v9  ;;  %v1082_v50 = vrot.slane %v1080_v63, 1  ;;  %v597_v53 = vsel %vm3589_vm9, 0, %v596_v48  ;;  %v779_v4 = vrot.slane %v777_v1, 7  ;;  %v3119_v48 = vld [vmem:[%s4182_s3 + $0x1c0] sm:$0xff] }
  0x5e   : > { %859 = vst [vmem:[#allocation2 + $0x50] sm:$0x1] %v858_v11  ;;  %v3813_v31 = vsel %vm1016_vm11, %v1071_v26, %v1075_v27  ;;  %v788_v9 = vshll.u32 %v656_v55, 16  ;;  %v792_v11 = vrot.slane %v787_v3, 4  ;;  %v1092_v26 = vshll.u32 %v3565_v14, 16  ;;  %v3104_v27 = vld [vmem:[%s4182_s3 + $0x148] sm:$0xff] }
  0x5f   : > { %1457 = vmatmul.bf16.gmra.mxu2 %v3748_v40  ;;  %2212 = vmatpush.bf16.msra.mxu0 %v3130_v17  ;;  %598 = vst [vmem:[#allocation2 + $0x68] sm:$0x1] %v597_v53  ;;  %v1083_v60 = vor.u32 %v1082_v50, %v1078_v10  ;;  %v782_v15 = vor.u32 %v780_v0, %v779_v4  ;;  %v783_v35 = vrot.slane %v779_v4, 4  ;;  %v1104_v50 = vshll.u32 %v3657_v16, 16 }
  0x60   : > { %2114 = vmatpush.bf16.msra.mxu2 %v3114_v12  ;;  %2163 = vmatpush.bf16.msra.mxu3 %v3122_v5  ;;  %v927_v49 = vld [vmem:[#allocation2 + $0x44] sm:$0x1]  ;;  %v790_v17 = vor.u32 %v788_v9, %v787_v3  ;;  %v1140_v53 = vrot.slane %v3565_v14, 1  ;;  %v1102_v55 = vshrl.u32 %v3657_v16, 16 }
  0x61   : > { %1741 = vmatmul.bf16.gmra.mxu3 %v3513_v33  ;;  %1830 = vmatpush.bf16.msra.mxu1 %v3106_v13  ;;  %v1005_v32 = vunpack.c.l.b16 %v927_v49  ;;  %v868_v23 = vsel %vm3445_vm8, %v782_v15, %v867_v18  ;;  %v3128_v49 = vld [vmem:[%s4182_s3 + $0x208] sm:$0xff]  ;;  %v1106_v57 = vrot.slane %v1104_v50, 1 }
  0x62   : > { %1408 = vmatmul.bf16.gmra.mxu1 %v1040_v20  ;;  %1790 = vmatmul.bf16.gmra.mxu0 %v3753_v44  ;;  %v593_v20 = vld [vmem:[#allocation2 + $0x5c] sm:$0x1]  ;;  %v791_v37 = vsel %vm3430_vm6, %v783_v35, %v790_v17  ;;  %869 = vst [vmem:[#allocation2 + $0x60] sm:$0xf] %v868_v23 }
  0x63   : > { %v594_v24 = vsel %vm3589_vm9, 0, %v593_v20  ;;  %v3828_v43 = vpack.c.b16 %v1005_v32, %v1005_v32  ;;  %2213 = vmatpush.bf16.msra.mxu0 %v3129_v45  ;;  %v3112_v20 = vld [vmem:[%s4182_s3 + $0x188] sm:$0xff]  ;;  %870 = vst [vmem:[#allocation2 + $0x64] sm:$0xf] %v791_v37 }
  0x64   : > { %595 = vst [vmem:[#allocation2 + $0x5c] sm:$0x1] %v594_v24  ;;  %2115 = vmatpush.bf16.msra.mxu2 %v3113_v41  ;;  %2164 = vmatpush.bf16.msra.mxu3 %v3121_v29 }
  0x65   : > { %1831 = vmatpush.bf16.msra.mxu1 %v3105_v42  ;;  %v1085_v51 = vshll.u32 %v3828_v43, 16  ;;  %v930_v7 = vld [vmem:[#allocation2 + $0x50] sm:$0x1]  ;;  %v1138_v32 = vrot.slane %v3828_v43, 1  ;;  %v3111_v43 = vld [vmem:[%s4182_s3 + $0x180] sm:$0xff] }
  0x66   : > { %v1006_v5 = vunpack.c.l.b16 %v930_v7  ;;  %v871_v13 = vld [vmem:[#allocation2 + $0x68] sm:$0x1]  ;;  %v1107_v7 = vor.u32 %v1106_v57, %v1102_v55 }
  0x67   : > { %v1087_v61 = vrot.slane %v1085_v51, 1  ;;  %v872_v19 = vsel %vm3387_vm2, %v792_v11, %v871_v13  ;;  %2214 = vmatpush.bf16.msra.mxu0 %v3128_v49  ;;  %v3103_v51 = vld [vmem:[%s4182_s3 + $0x140] sm:$0xff] }
  0x68   : > { %873 = vst [vmem:[#allocation2 + $0x68] sm:$0x1] %v872_v19  ;;  %v1014_v24 = vpack.c.b16 %v1006_v5, %v1006_v5  ;;  %2116 = vmatpush.bf16.msra.mxu2 %v3112_v20  ;;  %2165 = vmatpush.bf16.msra.mxu3 %v3120_v21  ;;  %v1143_v19 = vrot.slane %v3657_v16, 1 }
  0x69   : > { %v3849_v12 = vsel %vm1016_vm11, %v1083_v60, %v1087_v61  ;;  %1832 = vmatpush.bf16.msra.mxu1 %v3104_v27 }
  0x6a   : > { %v1097_v41 = vshll.u32 %v1014_v24, 16  ;;  %v1141_v54 = vrot.slane %v1014_v24, 1  ;;  %v3912_v11 = vld [vmem:[#allocation2 + $0x60] sm:$0xff] }
  0x6b   : > { %v864_v34 = vld [vmem:[#allocation2 + $0x5c] sm:$0x1]  ;;  %2215 = vmatpush.bf16.msra.mxu0 %v3127_v52  ;;  %v1521_v18 = vshll.u32 %v3912_v11, 16  ;;  %v1519_v37 = vshrl.u32 %v3912_v11, 16 }
  0x6c   : > { %v865_v36 = vsel %vm3387_vm2, %v775_v30, %v864_v34  ;;  %v1137_v30 = vrot.slane %v3638_v6, 1  ;;  %v1090_v34 = vshrl.u32 %v3565_v14, 16  ;;  %v1099_v63 = vrot.slane %v1097_v41, 1  ;;  %2117 = vmatpush.bf16.msra.mxu2 %v3111_v43  ;;  %2166 = vmatpush.bf16.msra.mxu3 %v3119_v48 }
  0x6d   : > { %866 = vst [vmem:[#allocation2 + $0x5c] sm:$0x1] %v865_v36  ;;  %v1094_v36 = vrot.slane %v1092_v26, 1  ;;  %1833 = vmatpush.bf16.msra.mxu1 %v3103_v51  ;;  %v3903_v61 = vsel %vm1121_vm10, %v1140_v53, %v1141_v54  ;;  %v1523_v23 = vrot.slane %v1521_v18, 1 }
  0x6e   : > { %v3876_v29 = vsel %vm1121_vm10, %v1137_v30, %v1138_v32 }
  0x6f   : > { %1462 = vmatmul.bf16.gmra.mxu2 %v3777_v62  ;;  %v1095_v42 = vor.u32 %v1094_v36, %v1090_v34  ;;  %v936_v4 = vld [vmem:[#allocation2 + $0x68] sm:$0x1]  ;;  %v1524_v32 = vor.u32 %v1523_v23, %v1519_v37 }
  0x70   : > { %v1516_v5 = vunpack.c.l.b16 %v936_v4 }
  0x71   : > { %1746 = vmatmul.bf16.gmra.mxu3 %v3625_v59  ;;  %v3881_v46 = vsel %vm1016_vm11, %v1095_v42, %v1099_v63 }
  0x72   : > { %1413 = vmatmul.bf16.gmra.mxu1 %v3753_v44  ;;  %1795 = vmatmul.bf16.gmra.mxu0 %v3783_v8  ;;  %v3920_v17 = vpack.c.b16 %v1516_v5, %v1516_v5 }
  0x74   : > { %v933_v45 = vld [vmem:[#allocation2 + $0x5c] sm:$0x1]  ;;  %v1526_v24 = vshll.u32 %v3920_v17, 16 }
  0x75   : > { %v1007_v47 = vunpack.c.l.b16 %v933_v45 }
  0x76   : > { %v1528_v34 = vrot.slane %v1526_v24, 1 }
  0x77   : > { %v1015_v10 = vpack.c.b16 %v1007_v47, %v1007_v47 }
  0x78   : > { %v3938_v36 = vsel %vm1016_vm11, %v1524_v32, %v1528_v34 }
  0x79   : > { %v1109_v58 = vshll.u32 %v1015_v10, 16  ;;  %v1144_v20 = vrot.slane %v1015_v10, 1 }
  0x7b   : > { %v1111_v3 = vrot.slane %v1109_v58, 1  ;;  %v3933_v49 = vsel %vm1121_vm10, %v1143_v19, %v1144_v20 }
  0x7d   : > { %v3908_v0 = vsel %vm1016_vm11, %v1107_v7, %v1111_v3 }
  0x7f   : > { %1467 = vmatmul.bf16.gmra.mxu2 %v3807_v25 }
  0x81   : > { %1751 = vmatmul.bf16.gmra.mxu3 %v3522_v39 }
  0x82   : > { %1418 = vmatmul.bf16.gmra.mxu1 %v3783_v8  ;;  %1800 = vmatmul.bf16.gmra.mxu0 %v3813_v31 }
  0x8f   : > { %1472 = vmatmul.bf16.gmra.mxu2 %v3843_v56 }
  0x91   : > { %1756 = vmatmul.bf16.gmra.mxu3 %v3638_v6 }
  0x92   : > { %1423 = vmatmul.bf16.gmra.mxu1 %v3813_v31  ;;  %1805 = vmatmul.bf16.gmra.mxu0 %v3849_v12 }
  0x9f   : > { %1477 = vmatmul.bf16.gmra.mxu2 %v3876_v29 }
  0xa1   : > { %1761 = vmatmul.bf16.gmra.mxu3 %v3565_v14 }
  0xa2   : > { %1428 = vmatmul.bf16.gmra.mxu1 %v3849_v12  ;;  %1810 = vmatmul.bf16.gmra.mxu0 %v3881_v46 }
  0xab   : > { %v3900_v60 = vpop.f32.mrf.mxu1  ;;  %v1355_v1 = vpop.f32.mrf.mxu0 }
  0xaf   : > { %1482 = vmatmul.bf16.gmra.mxu2 %v3903_v61 }
  0xb1   : > { %1766 = vmatmul.bf16.gmra.mxu3 %v3657_v16 }
  0xb2   : > { %1433 = vmatmul.bf16.gmra.mxu1 %v3881_v46  ;;  %v3910_v9 = vpop.f32.mrf.mxu2  ;;  %1815 = vmatmul.bf16.gmra.mxu0 %v3908_v0 }
  0xb3   : > { %v3915_v13 = vpop.f32.mrf.mxu1  ;;  %v1357_v35 = vpop.f32.mrf.mxu0 }
  0xb4   : > { %v3918_v15 = vpop.f32.mrf.mxu3 }
  0xba   : > { %v3924_v21 = vpop.f32.mrf.mxu2 }
  0xbb   : > { %v3928_v26 = vpop.f32.mrf.mxu1  ;;  %v1360_v30 = vpop.f32.mrf.mxu0 }
  0xbc   : > { %v3930_v27 = vpop.f32.mrf.mxu3 }
  0xbf   : > { %1487 = vmatmul.bf16.gmra.mxu2 %v3933_v49 }
  0xc1   : > { %1771 = vmatmul.bf16.gmra.mxu3 %v3912_v11 }
  0xc2   : > { %1438 = vmatmul.bf16.gmra.mxu1 %v3908_v0  ;;  %v3940_v41 = vpop.f32.mrf.mxu2  ;;  %1820 = vmatmul.bf16.gmra.mxu0 %v3938_v36 }
  0xc3   : > { %v3944_v42 = vpop.f32.mrf.mxu1  ;;  %v1362_v45 = vpop.f32.mrf.mxu0 }
  0xc4   : > { %v3946_v63 = vpop.f32.mrf.mxu3 }
  0xca   : > { %v3948_v47 = vpop.f32.mrf.mxu2 }
  0xcc   : > { %v3950_v43 = vpop.f32.mrf.mxu3 }
  0xcf   : > { %v1404_v48 = vpop.f32.mrf.mxu1  ;;  %2118 = vmatmul.bf16.vlgmr.msra.gmra.mxu2 %v3513_v33  ;;  %v1786_v50 = vpop.f32.mrf.mxu0 }
  0xd0   : > { %v1405_v10 = vadd.f32 %v1404_v48, %v1355_v1 }
  0xd1   : > { %2167 = vmatmul.bf16.vlgmr.msra.gmra.mxu3 %v3753_v44 }
  0xd2   : > { %1834 = vmatmul.bf16.vlgmr.msra.gmra.mxu1 %v3748_v40  ;;  %v1453_v51 = vpop.f32.mrf.mxu2  ;;  %2216 = vmatmul.bf16.vlgmr.msra.gmra.mxu0 %v3777_v62 }
  0xd3   : > { %v3955_v52 = vadd.f32 %v1453_v51, %v1405_v10 }
  0xd4   : > { %v1737_v53 = vpop.f32.mrf.mxu3 }
  0xd5   : > { %v3958_v54 = vadd.f32 %v1786_v50, %v1737_v53 }
  0xd7   : > { %v1406_v55 = vpop.f32.mrf.mxu1  ;;  %v1788_v58 = vpop.f32.mrf.mxu0 }
  0xd8   : > { %v1407_v57 = vadd.f32 %v1406_v55, %v1357_v35 }
  0xda   : > { %v1455_v7 = vpop.f32.mrf.mxu2 }
  0xdb   : > { %v3960_v1 = vadd.f32 %v1455_v7, %v1407_v57 }
  0xdc   : > { %v1739_v33 = vpop.f32.mrf.mxu3 }
  0xdd   : > { %v3962_v3 = vadd.f32 %v1788_v58, %v1739_v33 }
  0xdf   : > { %v1409_v40 = vpop.f32.mrf.mxu1  ;;  %2123 = vmatmul.bf16.gmra.mxu2 %v3625_v59  ;;  %v1791_v44 = vpop.f32.mrf.mxu0 }
  0xe0   : > { %v1410_v4 = vadd.f32 %v1409_v40, %v1360_v30 }
  0xe1   : > { %2172 = vmatmul.bf16.gmra.mxu3 %v3783_v8 }
  0xe2   : > { %1839 = vmatmul.bf16.gmra.mxu1 %v3777_v62  ;;  %v1458_v5 = vpop.f32.mrf.mxu2  ;;  %2221 = vmatmul.bf16.gmra.mxu0 %v3807_v25 }
  0xe3   : > { %v3967_v18 = vadd.f32 %v1458_v5, %v1410_v4  ;;  %v878_v5 = vstv %s877_s17  ;;  %s528_s17 = scalar_lea.vmem %s4187_s8, %s527_s16 }
  0xe4   : > { %v1742_v35 = vpop.f32.mrf.mxu3  ;;  %vm879_vm12 = vcmp.eq.s32.totalorder %v878_v5, 1 }
  0xe5   : > { %v3970_v19 = vadd.f32 %v1791_v44, %v1742_v35  ;;  %v567_v44 = vld [vmem:[#allocation2 + $0x6c] sm:$0x1] }
  0xe7   : > { %v1411_v20 = vpop.f32.mrf.mxu1  ;;  %v1793_v23 = vpop.f32.mrf.mxu0 }
  0xe8   : > { %v1412_v37 = vadd.f32 %v1411_v20, %v1362_v45 }
  0xea   : > { %v1460_v24 = vpop.f32.mrf.mxu2 }
  0xeb   : > { %v3972_v30 = vadd.f32 %v1460_v24, %v1412_v37  ;;  %v568_v37 = vsel %vm3387_vm2, 0, %v567_v44 }
  0xec   : > { %v1744_v59 = vpop.f32.mrf.mxu3  ;;  %569 = vst [vmem:[#allocation2 + $0x6c] sm:$0x1] %v568_v37 }
  0xed   : > { %v3974_v32 = vadd.f32 %v1793_v23, %v1744_v59  ;;  %v875_v23 = vld [vmem:[%s507_s24 + $0x4] sm:$0xf] }
  0xee   : > { %v881_v59 = vsel %vm879_vm12, %v875_v23, 0 }
  0xef   : > { %v1414_v62 = vpop.f32.mrf.mxu1  ;;  %2128 = vmatmul.bf16.gmra.mxu2 %v3522_v39  ;;  %v1796_v34 = vpop.f32.mrf.mxu0 }
  0xf0   : > { %v1415_v8 = vadd.f32 %v1414_v62, %v3900_v60 }
  0xf1   : > { %2177 = vmatmul.bf16.gmra.mxu3 %v3813_v31 }
  0xf2   : > { %1844 = vmatmul.bf16.gmra.mxu1 %v3807_v25  ;;  %v1463_v48 = vpop.f32.mrf.mxu2  ;;  %2226 = vmatmul.bf16.gmra.mxu0 %v3843_v56 }
  0xf3   : > { %v3985_v45 = vadd.f32 %v1463_v48, %v1415_v8  ;;  %v891_v8 = vshrl.u32 %v881_v59, 16 }
  0xf4   : > { %v1747_v60 = vpop.f32.mrf.mxu3 }
  0xf5   : > { %v3988_v10 = vadd.f32 %v1796_v34, %v1747_v60 }
  0xf7   : > { %v1416_v39 = vpop.f32.mrf.mxu1  ;;  %v1798_v31 = vpop.f32.mrf.mxu0 }
  0xf8   : > { %v1417_v25 = vadd.f32 %v1416_v39, %v3915_v13  ;;  %v893_v39 = vrot.slane %v891_v8, 7 }
  0xfa   : > { %v1465_v50 = vpop.f32.mrf.mxu2 }
  0xfb   : > { %v3995_v51 = vadd.f32 %v1465_v50, %v1417_v25  ;;  %v894_v50 = vshll.u32 %v881_v59, 16 }
  0xfc   : > { %v1749_v53 = vpop.f32.mrf.mxu3 }
  0xfd   : > { %v3997_v55 = vadd.f32 %v1798_v31, %v1749_v53  ;;  %v898_v53 = vrot.slane %v893_v39, 4 }
  0xff   : > { %v1419_v57 = vpop.f32.mrf.mxu1  ;;  %2133 = vmatmul.bf16.gmra.mxu2 %v3638_v6  ;;  %v1801_v7 = vpop.f32.mrf.mxu0 }
 0x100   : > { %v1420_v58 = vadd.f32 %v1419_v57, %v3928_v26 }
 0x101   : > { %2182 = vmatmul.bf16.gmra.mxu3 %v3849_v12 }
 0x102   : > { %1849 = vmatmul.bf16.gmra.mxu1 %v3843_v56  ;;  %v1468_v13 = vpop.f32.mrf.mxu2  ;;  %2231 = vmatmul.bf16.gmra.mxu0 %v3876_v29  ;;  %v599_v56 = vld [vmem:[#allocation2 + $0x74] sm:$0x1] }
 0x103   : > { %v4005_v33 = vadd.f32 %v1468_v13, %v1420_v58  ;;  %v600_v35 = vsel %vm3589_vm9, 0, %v599_v56  ;;  %v903_v56 = vld [vmem:[#allocation2 + $0x6c] sm:$0xf] }
 0x104   : > { %v1752_v40 = vpop.f32.mrf.mxu3  ;;  %601 = vst [vmem:[#allocation2 + $0x74] sm:$0x1] %v600_v35 }
 0x105   : > { %v4010_v4 = vadd.f32 %v1801_v7, %v1752_v40 }
 0x107   : > { %v1421_v26 = vpop.f32.mrf.mxu1  ;;  %v1803_v12 = vpop.f32.mrf.mxu0 }
 0x108   : > { %v1422_v6 = vadd.f32 %v1421_v26, %v3944_v42  ;;  %v874_v42 = vld [vmem:[%s507_s24] sm:$0xf]  ;;  %s535_s24 = scalar_lea.vmem %s4188_s9, %s527_s16 }
 0x109   : > { %v880_v62 = vsel %vm879_vm12, %v874_v42, 0 }
 0x10a   : > { %v1470_v20 = vpop.f32.mrf.mxu2  ;;  %v883_v48 = vshrl.u32 %v880_v62, 16  ;;  %v886_v31 = vshll.u32 %v880_v62, 16 }
 0x10b   : > { %v4020_v24 = vadd.f32 %v1470_v20, %v1422_v6  ;;  %v907_v40 = vld [vmem:[#allocation2 + $0x74] sm:$0x1]  ;;  %v896_v6 = vor.u32 %v894_v50, %v893_v39 }
 0x10c   : > { %v1754_v34 = vpop.f32.mrf.mxu3  ;;  %v885_v25 = vrot.slane %v883_v48, 7 }
 0x10d   : > { %v4022_v60 = vadd.f32 %v1803_v12, %v1754_v34 }
 0x10e   : > { %v888_v7 = vor.u32 %v886_v31, %v885_v25  ;;  %v889_v13 = vrot.slane %v885_v25, 4 }
 0x10f   : > { %v1424_v38 = vpop.f32.mrf.mxu1  ;;  %2138 = vmatmul.bf16.gmra.mxu2 %v3565_v14  ;;  %v1806_v58 = vpop.f32.mrf.mxu0  ;;  %v908_v14 = vsel %vm3387_vm2, %v898_v53, %v907_v40 }
 0x110   : > { %v1425_v57 = vadd.f32 %v1424_v38, %v3910_v9  ;;  %v904_v44 = vsel %vm3445_vm8, %v888_v7, %v903_v56  ;;  %909 = vst [vmem:[#allocation2 + $0x74] sm:$0x1] %v908_v14 }
 0x111   : > { %2187 = vmatmul.bf16.gmra.mxu3 %v3881_v46  ;;  %905 = vst [vmem:[#allocation2 + $0x6c] sm:$0xf] %v904_v44 }
 0x112   : > { %1854 = vmatmul.bf16.gmra.mxu1 %v3876_v29  ;;  %v1473_v26 = vpop.f32.mrf.mxu2  ;;  %2236 = vmatmul.bf16.gmra.mxu0 %v3903_v61  ;;  %v897_v29 = vsel %vm3430_vm6, %v889_v13, %v896_v6 }
 0x113   : > { %v4030_v12 = vadd.f32 %v1473_v26, %v1425_v57  ;;  %906 = vst [vmem:[#allocation2 + $0x70] sm:$0xf] %v897_v29 }
 0x114   : > { %v1757_v9 = vpop.f32.mrf.mxu3 }
 0x115   : > { %v4037_v46 = vadd.f32 %v1806_v58, %v1757_v9 }
 0x117   : > { %v1426_v5 = vpop.f32.mrf.mxu1  ;;  %v1808_v35 = vpop.f32.mrf.mxu0 }
 0x118   : > { %v1427_v2 = vadd.f32 %v1426_v5, %v3924_v21 }
 0x11a   : > { %v1475_v20 = vpop.f32.mrf.mxu2  ;;  %v3062_v57 = vld [vmem:[#allocation2 + $0x6c] sm:$0xff] }
 0x11b   : > { %v4040_v37 = vadd.f32 %v1475_v20, %v1427_v2  ;;  %v1903_v6 = vshll.u32 %v3062_v57, 16  ;;  %v1901_v44 = vshrl.u32 %v3062_v57, 16 }
 0x11c   : > { %v1759_v28 = vpop.f32.mrf.mxu3 }
 0x11d   : > { %v4042_v23 = vadd.f32 %v1808_v35, %v1759_v28  ;;  %v1905_v29 = vrot.slane %v1903_v6, 1  ;;  %v1913_v28 = vrot.slane %v3062_v57, 1 }
 0x11f   : > { %v1429_v42 = vpop.f32.mrf.mxu1  ;;  %2143 = vmatmul.bf16.gmra.mxu2 %v3657_v16  ;;  %v1811_v59 = vpop.f32.mrf.mxu0 }
 0x120   : > { %v1430_v22 = vadd.f32 %v1429_v42, %v3940_v41  ;;  %v939_v41 = vld [vmem:[#allocation2 + $0x74] sm:$0x1] }
 0x121   : > { %2192 = vmatmul.bf16.gmra.mxu3 %v3908_v0  ;;  %v1532_v0 = vrot.slane %v3920_v17, 1  ;;  %v1898_v58 = vunpack.c.l.b16 %v939_v41 }
 0x122   : > { %1859 = vmatmul.bf16.gmra.mxu1 %v3903_v61  ;;  %v1478_v62 = vpop.f32.mrf.mxu2  ;;  %2241 = vmatmul.bf16.gmra.mxu0 %v3933_v49  ;;  %v1531_v61 = vrot.slane %v3912_v11, 1 }
 0x123   : > { %v4048_v8 = vadd.f32 %v1478_v62, %v1430_v22  ;;  %v1899_v17 = vpack.c.b16 %v1898_v58, %v1898_v58 }
 0x124   : > { %v1762_v21 = vpop.f32.mrf.mxu3  ;;  %v1533_v13 = vsel %vm1121_vm10, %v1531_v61, %v1532_v0 }
 0x125   : > { %v4051_v34 = vadd.f32 %v1811_v59, %v1762_v21  ;;  %v1914_v42 = vrot.slane %v1899_v17, 1 }
 0x127   : > { %v1431_v48 = vpop.f32.mrf.mxu1  ;;  %v1813_v39 = vpop.f32.mrf.mxu0 }
 0x128   : > { %v1432_v38 = vadd.f32 %v1431_v48, %v3948_v47 }
 0x12a   : > { %v1480_v16 = vpop.f32.mrf.mxu2 }
 0x12b   : > { %v4054_v25 = vadd.f32 %v1480_v16, %v1432_v38 }
 0x12c   : > { %v1764_v31 = vpop.f32.mrf.mxu3 }
 0x12d   : > { %v4058_v50 = vadd.f32 %v1813_v39, %v1764_v31 }
 0x12f   : > { %v1434_v53 = vpop.f32.mrf.mxu1  ;;  %2148 = vmatmul.bf16.gmra.mxu2 %v3912_v11  ;;  %v1816_v47 = vpop.f32.mrf.mxu0 }
 0x130   : > { %v1435_v7 = vadd.f32 %v1434_v53, %v3918_v15  ;;  %v1908_v15 = vshll.u32 %v1899_v17, 16 }
 0x131   : > { %2197 = vmatmul.bf16.gmra.mxu3 %v3938_v36  ;;  %v1906_v36 = vor.u32 %v1905_v29, %v1901_v44 }
 0x132   : > { %1864 = vmatmul.bf16.gmra.mxu1 %v3933_v49  ;;  %v1483_v40 = vpop.f32.mrf.mxu2  ;;  %2246 = vmatmul.bf16.gmra.mxu0 %v1533_v13  ;;  %v1910_v35 = vrot.slane %v1908_v15, 1 }
 0x133   : > { %v4065_v26 = vadd.f32 %v1483_v40, %v1435_v7 }
 0x134   : > { %v1767_v56 = vpop.f32.mrf.mxu3  ;;  %v1911_v62 = vsel %vm1016_vm11, %v1906_v36, %v1910_v35 }
 0x135   : > { %v4067_v14 = vadd.f32 %v1816_v47, %v1767_v56 }
 0x137   : > { %v1436_v11 = vpop.f32.mrf.mxu1  ;;  %v1818_v49 = vpop.f32.mrf.mxu0 }
 0x138   : > { %v1437_v9 = vadd.f32 %v1436_v11, %v3930_v27  ;;  %v1915_v27 = vsel %vm1121_vm10, %v1913_v28, %v1914_v42 }
 0x13a   : > { %v1485_v5 = vpop.f32.mrf.mxu2 }
 0x13b   : > { %v4070_v2 = vadd.f32 %v1485_v5, %v1437_v9 }
 0x13c   : > { %v1769_v20 = vpop.f32.mrf.mxu3 }
 0x13d   : > { %v4072_v22 = vadd.f32 %v1818_v49, %v1769_v20 }
 0x13f   : > { %v1439_v59 = vpop.f32.mrf.mxu1  ;;  %2153 = vmatmul.bf16.gmra.mxu2 %v3062_v57  ;;  %v1821_v48 = vpop.f32.mrf.mxu0 }
 0x140   : > { %v1440_v21 = vadd.f32 %v1439_v59, %v3946_v63  ;;  %v4085_v63 = vld [vmem:[%s4183_s4] ss:$0 sm:$0xff] }
 0x141   : > { %2202 = vmatmul.bf16.gmra.mxu3 %v1911_v62  ;;  %v1494_v44 = vadd.f32 %v4085_v63, %v3960_v1  ;;  %v1495_v20 = vadd.f32 %v4085_v63, %v3967_v18 }
 0x142   : > { %1869 = vmatmul.bf16.gmra.mxu1 %v1533_v13  ;;  %v1488_v38 = vpop.f32.mrf.mxu2  ;;  %2251 = vmatmul.bf16.gmra.mxu0 %v1915_v27  ;;  %v1493_v13 = vadd.f32 %v4085_v63, %v3955_v52 }
 0x143   : > { %v4077_v39 = vadd.f32 %v1488_v38, %v1440_v21 }
 0x144   : > { %v1772_v16 = vpop.f32.mrf.mxu3 }
 0x145   : > { %v4079_v41 = vadd.f32 %v1821_v48, %v1772_v16 }
 0x147   : > { %v1441_v31 = vpop.f32.mrf.mxu1  ;;  %v1823_v0 = vpop.f32.mrf.mxu0 }
 0x148   : > { %v1442_v61 = vadd.f32 %v1441_v31, %v3950_v43 }
 0x14a   : > { %v1490_v53 = vpop.f32.mrf.mxu2 }
 0x14b   : > { %v4087_v57 = vadd.f32 %v1490_v53, %v1442_v61 }
 0x14c   : > { %v1774_v58 = vpop.f32.mrf.mxu3 }
 0x14d   : > { %v4089_v7 = vadd.f32 %v1823_v0, %v1774_v58  ;;  %v1496_v0 = vadd.f32 %v4085_v63, %v3972_v30 }
 0x14f   : > { %v1835_v47 = vpop.f32.mrf.mxu1  ;;  %v2217_v17 = vpop.f32.mrf.mxu0 }
 0x150   : > { %v1836_v40 = vadd.f32 %v1835_v47, %v3958_v54 }
 0x152   : > { %v1875_v43 = vadd.f32 %v1836_v40, %v1493_v13  ;;  %v2119_v6 = vpop.f32.mrf.mxu2 }
 0x154   : > { %v2168_v56 = vpop.f32.mrf.mxu3 }
 0x155   : > { %v2169_v15 = vadd.f32 %v2168_v56, %v2119_v6 }
 0x157   : > { %v1837_v11 = vpop.f32.mrf.mxu1  ;;  %v2219_v49 = vpop.f32.mrf.mxu0  ;;  %v2218_v5 = vadd.f32 %v2217_v17, %v2169_v15  ;;  %v1497_v15 = vadd.f32 %v4085_v63, %v3985_v45 }
 0x158   : > { %v1838_v29 = vadd.f32 %v1837_v11, %v3962_v3 }
 0x159   : > { %v2257_v42 = vadd.f32 %v2218_v5, %v1875_v43 }
 0x15a   : > { %v1876_v9 = vadd.f32 %v1838_v29, %v1494_v44  ;;  %v2121_v52 = vpop.f32.mrf.mxu2 }
 0x15b   : > { %v2295_v48 = vmul.f32 %v2257_v42, %v2257_v42 }
 0x15c   : > { %v2170_v54 = vpop.f32.mrf.mxu3 }
 0x15d   : > { %v2171_v36 = vadd.f32 %v2170_v54, %v2121_v52 }
 0x15f   : > { %v1840_v35 = vpop.f32.mrf.mxu1  ;;  %v2220_v1 = vadd.f32 %v2219_v49, %v2171_v36  ;;  %v2222_v3 = vpop.f32.mrf.mxu0 }
 0x160   : > { %v1841_v28 = vadd.f32 %v1840_v35, %v3970_v19 }
 0x161   : > { %v2258_v62 = vadd.f32 %v2220_v1, %v1876_v9 }
 0x162   : > { %v1877_v59 = vadd.f32 %v1841_v28, %v1495_v20  ;;  %v2124_v21 = vpop.f32.mrf.mxu2 }
 0x163   : > { %v2273_v27 = vadd.f32 %v2258_v62, %v2257_v42  ;;  %v2296_v38 = vmul.f32 %v2258_v62, %v2258_v62  ;;  %v3138_v16 = vpack.c.bf16 %v2258_v62, %v2257_v42 }
 0x164   : > { %v2173_v18 = vpop.f32.mrf.mxu3 }
 0x165   : > { %v2311_v31 = vadd.f32 %v2296_v38, %v2295_v48  ;;  %3139 = vst [vmem:[%s4105_s18] sm:$0xff] %v3138_v16   ;;  %v2174_v19 = vadd.f32 %v2173_v18, %v2124_v21 }
 0x167   : > { %v1842_v61 = vpop.f32.mrf.mxu1  ;;  %v2223_v58 = vadd.f32 %v2222_v3, %v2174_v19  ;;  %v2224_v13 = vpop.f32.mrf.mxu0 }
 0x168   : > { %v1843_v53 = vadd.f32 %v1842_v61, %v3974_v32  ;;  %v1499_v61 = vadd.f32 %v4085_v63, %v4005_v33 }
 0x169   : > { %v2259_v40 = vadd.f32 %v2223_v58, %v1877_v59  ;;  %v1498_v59 = vadd.f32 %v4085_v63, %v3995_v51 }
 0x16a   : > { %v1878_v47 = vadd.f32 %v1843_v53, %v1496_v0  ;;  %v2126_v43 = vpop.f32.mrf.mxu2 }
 0x16b   : > { %v2274_v17 = vadd.f32 %v2273_v27, %v2259_v40  ;;  %v2297_v6 = vmul.f32 %v2259_v40, %v2259_v40 }
 0x16c   : > { %v2175_v56 = vpop.f32.mrf.mxu3 }
 0x16d   : > { %v2312_v11 = vadd.f32 %v2311_v31, %v2297_v6  ;;  %v2176_v44 = vadd.f32 %v2175_v56, %v2126_v43 }
 0x16f   : > { %v1845_v29 = vpop.f32.mrf.mxu1  ;;  %v2225_v30 = vadd.f32 %v2224_v13, %v2176_v44  ;;  %v2227_v32 = vpop.f32.mrf.mxu0  ;;  %v1500_v44 = vadd.f32 %v4085_v63, %v4020_v24 }
 0x170   : > { %v1846_v9 = vadd.f32 %v1845_v29, %v3988_v10 }
 0x171   : > { %v2260_v52 = vadd.f32 %v2225_v30, %v1878_v47 }
 0x172   : > { %v1879_v49 = vadd.f32 %v1846_v9, %v1497_v15  ;;  %v2129_v5 = vpop.f32.mrf.mxu2 }
 0x173   : > { %v2275_v54 = vadd.f32 %v2274_v17, %v2260_v52  ;;  %v2298_v36 = vmul.f32 %v2260_v52, %v2260_v52  ;;  %v3143_v35 = vpack.c.bf16 %v2260_v52, %v2259_v40 }
 0x174   : > { %v2178_v20 = vpop.f32.mrf.mxu3 }
 0x175   : > { %v2313_v28 = vadd.f32 %v2312_v11, %v2298_v36  ;;  %3175 = vst [vmem:[%s4105_s18 + $0x8] sm:$0xff] %v3143_v35   ;;  %v2179_v42 = vadd.f32 %v2178_v20, %v2129_v5  ;;  %v1501_v35 = vadd.f32 %v4085_v63, %v4030_v12 }
 0x177   : > { %v1847_v1 = vpop.f32.mrf.mxu1  ;;  %v2228_v3 = vadd.f32 %v2227_v32, %v2179_v42  ;;  %v2229_v62 = vpop.f32.mrf.mxu0 }
 0x178   : > { %v1848_v45 = vadd.f32 %v1847_v1, %v3997_v55 }
 0x179   : > { %v2261_v21 = vadd.f32 %v2228_v3, %v1879_v49 }
 0x17a   : > { %v1880_v10 = vadd.f32 %v1848_v45, %v1498_v59  ;;  %v2131_v48 = vpop.f32.mrf.mxu2 }
 0x17b   : > { %v2276_v27 = vadd.f32 %v2275_v54, %v2261_v21  ;;  %v2299_v38 = vmul.f32 %v2261_v21, %v2261_v21 }
 0x17c   : > { %v2180_v16 = vpop.f32.mrf.mxu3 }
 0x17d   : > { %v2314_v18 = vadd.f32 %v2313_v28, %v2299_v38  ;;  %v2181_v31 = vadd.f32 %v2180_v16, %v2131_v48 }
 0x17f   : > { %v1850_v19 = vpop.f32.mrf.mxu1  ;;  %v2230_v51 = vadd.f32 %v2229_v62, %v2181_v31  ;;  %v2232_v55 = vpop.f32.mrf.mxu0 }
 0x180   : > { %v1851_v0 = vadd.f32 %v1850_v19, %v4010_v4 }
 0x181   : > { %v2262_v58 = vadd.f32 %v2230_v51, %v1880_v10 }
 0x182   : > { %v1881_v53 = vadd.f32 %v1851_v0, %v1499_v61  ;;  %v2134_v47 = vpop.f32.mrf.mxu2 }
 0x183   : > { %v2277_v13 = vadd.f32 %v2276_v27, %v2262_v58  ;;  %v2300_v40 = vmul.f32 %v2262_v58, %v2262_v58  ;;  %v3148_v43 = vpack.c.bf16 %v2262_v58, %v2261_v21  ;;  %v1502_v27 = vadd.f32 %v4085_v63, %v4040_v37 }
 0x184   : > { %v2183_v17 = vpop.f32.mrf.mxu3  ;;  %v1503_v58 = vadd.f32 %v4085_v63, %v4048_v8 }
 0x185   : > { %v2315_v6 = vadd.f32 %v2314_v18, %v2300_v40  ;;  %3176 = vst [vmem:[%s4105_s18 + $0x10] sm:$0xff] %v3148_v43   ;;  %v2184_v56 = vadd.f32 %v2183_v17, %v2134_v47 }
 0x187   : > { %v1852_v11 = vpop.f32.mrf.mxu1  ;;  %v2233_v29 = vadd.f32 %v2232_v55, %v2184_v56  ;;  %v2234_v15 = vpop.f32.mrf.mxu0 }
 0x188   : > { %v1853_v33 = vadd.f32 %v1852_v11, %v4022_v60 }
 0x189   : > { %v2263_v9 = vadd.f32 %v2233_v29, %v1881_v53 }
 0x18a   : > { %v1882_v4 = vadd.f32 %v1853_v33, %v1500_v44  ;;  %v2136_v30 = vpop.f32.mrf.mxu2 }
 0x18b   : > { %v2278_v49 = vadd.f32 %v2277_v13, %v2263_v9  ;;  %v2301_v32 = vmul.f32 %v2263_v9, %v2263_v9 }
 0x18c   : > { %v2185_v52 = vpop.f32.mrf.mxu3 }
 0x18d   : > { %v2316_v5 = vadd.f32 %v2315_v6, %v2301_v32  ;;  %v2186_v54 = vadd.f32 %v2185_v52, %v2136_v30 }
 0x18f   : > { %v1855_v36 = vpop.f32.mrf.mxu1  ;;  %v2235_v24 = vadd.f32 %v2234_v15, %v2186_v54  ;;  %v2237_v60 = vpop.f32.mrf.mxu0 }
 0x190   : > { %v1856_v20 = vadd.f32 %v1855_v36, %v4037_v46 }
 0x191   : > { %v2264_v42 = vadd.f32 %v2235_v24, %v1882_v4  ;;  %v1504_v4 = vadd.f32 %v4085_v63, %v4054_v25 }
 0x192   : > { %v1883_v28 = vadd.f32 %v1856_v20, %v1501_v35  ;;  %v2139_v1 = vpop.f32.mrf.mxu2  ;;  %v1505_v20 = vadd.f32 %v4085_v63, %v4065_v26 }
 0x193   : > { %v2279_v59 = vadd.f32 %v2278_v49, %v2264_v42  ;;  %v2302_v45 = vmul.f32 %v2264_v42, %v2264_v42  ;;  %v3153_v3 = vpack.c.bf16 %v2264_v42, %v2263_v9 }
 0x194   : > { %v2188_v10 = vpop.f32.mrf.mxu3 }
 0x195   : > { %v2317_v62 = vadd.f32 %v2316_v5, %v2302_v45  ;;  %3177 = vst [vmem:[%s4105_s18 + $0x18] sm:$0xff] %v3153_v3   ;;  %v2189_v21 = vadd.f32 %v2188_v10, %v2139_v1 }
 0x197   : > { %v1857_v48 = vpop.f32.mrf.mxu1  ;;  %v2238_v38 = vadd.f32 %v2237_v60, %v2189_v21  ;;  %v2239_v16 = vpop.f32.mrf.mxu0 }
 0x198   : > { %v1858_v12 = vadd.f32 %v1857_v48, %v4042_v23  ;;  %v1506_v48 = vadd.f32 %v4085_v63, %v4070_v2 }
 0x199   : > { %v2265_v18 = vadd.f32 %v2238_v38, %v1883_v28 }
 0x19a   : > { %v1884_v46 = vadd.f32 %v1858_v12, %v1502_v27  ;;  %v2141_v31 = vpop.f32.mrf.mxu2 }
 0x19b   : > { %v2280_v19 = vadd.f32 %v2279_v59, %v2265_v18  ;;  %v2303_v61 = vmul.f32 %v2265_v18, %v2265_v18 }
 0x19c   : > { %v2190_v0 = vpop.f32.mrf.mxu3 }
 0x19d   : > { %v2318_v51 = vadd.f32 %v2317_v62, %v2303_v61  ;;  %v2191_v53 = vadd.f32 %v2190_v0, %v2141_v31 }
 0x19f   : > { %v1860_v55 = vpop.f32.mrf.mxu1  ;;  %v2240_v37 = vadd.f32 %v2239_v16, %v2191_v53  ;;  %v2242_v23 = vpop.f32.mrf.mxu0 }
 0x1a0   : > { %v1861_v47 = vadd.f32 %v1860_v55, %v4051_v34 }
 0x1a1   : > { %v2266_v40 = vadd.f32 %v2240_v37, %v1884_v46 }
 0x1a2   : > { %v1885_v13 = vadd.f32 %v1861_v47, %v1503_v58  ;;  %v2144_v43 = vpop.f32.mrf.mxu2 }
 0x1a3   : > { %v2281_v17 = vadd.f32 %v2280_v19, %v2266_v40  ;;  %v2304_v6 = vmul.f32 %v2266_v40, %v2266_v40  ;;  %v3158_v56 = vpack.c.bf16 %v2266_v40, %v2265_v18 }
 0x1a4   : > { %v2193_v11 = vpop.f32.mrf.mxu3 }
 0x1a5   : > { %v2319_v44 = vadd.f32 %v2318_v51, %v2304_v6  ;;  %3178 = vst [vmem:[%s4105_s18 + $0x20] sm:$0xff] %v3158_v56   ;;  %v2194_v33 = vadd.f32 %v2193_v11, %v2144_v43  ;;  %v1507_v51 = vadd.f32 %v4085_v63, %v4077_v39  ;;  %v1508_v56 = vadd.f32 %v4085_v63, %v4087_v57 }
 0x1a7   : > { %v1862_v29 = vpop.f32.mrf.mxu1  ;;  %v2243_v15 = vadd.f32 %v2242_v23, %v2194_v33  ;;  %v2244_v9 = vpop.f32.mrf.mxu0 }
 0x1a8   : > { %v1863_v8 = vadd.f32 %v1862_v29, %v4058_v50 }
 0x1a9   : > { %v2267_v30 = vadd.f32 %v2243_v15, %v1885_v13 }
 0x1aa   : > { %v1886_v34 = vadd.f32 %v1863_v8, %v1504_v4  ;;  %v2146_v49 = vpop.f32.mrf.mxu2 }
 0x1ab   : > { %v2282_v32 = vadd.f32 %v2281_v17, %v2267_v30  ;;  %v2305_v52 = vmul.f32 %v2267_v30, %v2267_v30 }
 0x1ac   : > { %v2195_v5 = vpop.f32.mrf.mxu3 }
 0x1ad   : > { %v2320_v54 = vadd.f32 %v2319_v44, %v2305_v52  ;;  %v2196_v36 = vadd.f32 %v2195_v5, %v2146_v49 }
 0x1af   : > { %v1865_v35 = vpop.f32.mrf.mxu1  ;;  %v2245_v25 = vadd.f32 %v2244_v9, %v2196_v36  ;;  %v2247_v50 = vpop.f32.mrf.mxu0 }
 0x1b0   : > { %v1866_v24 = vadd.f32 %v1865_v35, %v4067_v14 }
 0x1b1   : > { %v2268_v60 = vadd.f32 %v2245_v25, %v1886_v34 }
 0x1b2   : > { %v1887_v28 = vadd.f32 %v1866_v24, %v1505_v20  ;;  %v2149_v42 = vpop.f32.mrf.mxu2 }
 0x1b3   : > { %v2283_v1 = vadd.f32 %v2282_v32, %v2268_v60  ;;  %v2306_v59 = vmul.f32 %v2268_v60, %v2268_v60  ;;  %v3163_v45 = vpack.c.bf16 %v2268_v60, %v2267_v30 }
 0x1b4   : > { %v2198_v3 = vpop.f32.mrf.mxu3 }
 0x1b5   : > { %v2321_v10 = vadd.f32 %v2320_v54, %v2306_v59  ;;  %3179 = vst [vmem:[%s4105_s18 + $0x28] sm:$0xff] %v3163_v45   ;;  %v2199_v62 = vadd.f32 %v2198_v3, %v2149_v42 }
 0x1b7   : > { %v1867_v21 = vpop.f32.mrf.mxu1  ;;  %v2248_v27 = vadd.f32 %v2247_v50, %v2199_v62  ;;  %v2249_v46 = vpop.f32.mrf.mxu0 }
 0x1b8   : > { %v1868_v26 = vadd.f32 %v1867_v21, %v4072_v22 }
 0x1b9   : > { %v2269_v12 = vadd.f32 %v2248_v27, %v1887_v28 }
 0x1ba   : > { %v1888_v14 = vadd.f32 %v1868_v26, %v1506_v48  ;;  %v2151_v38 = vpop.f32.mrf.mxu2 }
 0x1bb   : > { %v2284_v16 = vadd.f32 %v2283_v1, %v2269_v12  ;;  %v2307_v18 = vmul.f32 %v2269_v12, %v2269_v12 }
 0x1bc   : > { %v2200_v31 = vpop.f32.mrf.mxu3 }
 0x1bd   : > { %v2322_v19 = vadd.f32 %v2321_v10, %v2307_v18  ;;  %v2201_v61 = vadd.f32 %v2200_v31, %v2151_v38 }
 0x1bf   : > { %v1870_v0 = vpop.f32.mrf.mxu1  ;;  %v2250_v2 = vadd.f32 %v2249_v46, %v2201_v61  ;;  %v2252_v23 = vpop.f32.mrf.mxu0 }
 0x1c0   : > { %v1871_v53 = vadd.f32 %v1870_v0, %v4079_v41 }
 0x1c1   : > { %v2270_v22 = vadd.f32 %v2250_v2, %v1888_v14 }
 0x1c2   : > { %v1889_v55 = vadd.f32 %v1871_v53, %v1507_v51  ;;  %v2154_v58 = vpop.f32.mrf.mxu2 }
 0x1c3   : > { %v2285_v47 = vadd.f32 %v2284_v16, %v2270_v22  ;;  %v2308_v37 = vmul.f32 %v2270_v22, %v2270_v22  ;;  %v3168_v13 = vpack.c.bf16 %v2270_v22, %v2269_v12 }
 0x1c4   : > { %v2203_v40 = vpop.f32.mrf.mxu3 }
 0x1c5   : > { %v2323_v43 = vadd.f32 %v2322_v19, %v2308_v37  ;;  %3180 = vst [vmem:[%s4105_s18 + $0x30] sm:$0xff] %v3168_v13   ;;  %v2204_v17 = vadd.f32 %v2203_v40, %v2154_v58 }
 0x1c7   : > { %v1872_v6 = vpop.f32.mrf.mxu1  ;;  %v2253_v11 = vadd.f32 %v2252_v23, %v2204_v17  ;;  %v2254_v9 = vpop.f32.mrf.mxu0 }
 0x1c8   : > { %v1873_v39 = vadd.f32 %v1872_v6, %v4089_v7 }
 0x1c9   : > { %v2271_v44 = vadd.f32 %v2253_v11, %v1889_v55 }
 0x1ca   : > { %v1890_v41 = vadd.f32 %v1873_v39, %v1508_v56  ;;  %v2156_v33 = vpop.f32.mrf.mxu2 }
 0x1cb   : > { %v2286_v29 = vadd.f32 %v2285_v47, %v2271_v44  ;;  %v2309_v4 = vmul.f32 %v2271_v44, %v2271_v44 }
 0x1cc   : > { %v2205_v8 = vpop.f32.mrf.mxu3 }
 0x1cd   : > { %v2324_v15 = vadd.f32 %v2323_v43, %v2309_v4  ;;  %v2206_v34 = vadd.f32 %v2205_v8, %v2156_v33 }
 0x1cf   : > { %v2255_v30 = vadd.f32 %v2254_v9, %v2206_v34 }
 0x1d1   : > { %v2272_v49 = vadd.f32 %v2255_v30, %v1890_v41 }
 0x1d3   : > { %v2287_v32 = vadd.f32 %v2286_v29, %v2272_v49  ;;  %v2310_v63 = vmul.f32 %v2272_v49, %v2272_v49  ;;  %v3173_v57 = vpack.c.bf16 %v2272_v49, %v2271_v44 }
 0x1d5   : > { %v2288_v7 = vrot.slane %v2287_v32, 4  ;;  %v2325_v52 = vadd.f32 %v2324_v15, %v2310_v63  ;;  %3181 = vst [vmem:[%s4105_s18 + $0x38] sm:$0xff] %v3173_v57  }
 0x1d7   : > { %v2289_v5 = vadd.f32 %v2288_v7, %v2287_v32  ;;  %v2326_v54 = vrot.slane %v2325_v52, 4 }
 0x1d9   : > { %v2290_v36 = vrot.slane %v2289_v5, 2  ;;  %v2327_v35 = vadd.f32 %v2326_v54, %v2325_v52 }
 0x1db   : > { %v2291_v20 = vadd.f32 %v2290_v36, %v2289_v5  ;;  %v2328_v24 = vrot.slane %v2327_v35, 2 }
 0x1dd   : > { %v2292_v25 = vrot.slane %v2291_v20, 1  ;;  %v2329_v28 = vadd.f32 %v2328_v24, %v2327_v35 }
 0x1df   : > { %v2293_v50 = vadd.f32 %v2292_v25, %v2291_v20  ;;  %v2330_v60 = vrot.slane %v2329_v28, 1 }
 0x1e1   : > { %2294 = vst [vmem:[%s528_s17] sm:$0x1] %v2293_v50  ;;  %v2331_v42 = vadd.f32 %v2330_v60, %v2329_v28 }
 0x1e3   : > { %2332 = vst [vmem:[%s535_s24] sm:$0x1] %v2331_v42 }
 0x1e4 PF: > { %s20_s5 = sadd.s32 1, %s3285_s5   ;;  %s4200_s30 = smov %s3277_s11 }
 0x1e5   : > { %p17_p13 = scmp.ge.s32.totalorder %s20_s5, 6   ;;  %s4201_s10 = smov %s3281_s12 }
 0x1e6   : > { %s4202_s11 = smov %s4205_s6  ;;  %s4203_s12 = smov %s4209_s13 }
 0x1e7   :  { %19 = sbr.rel (!%p17_p13) target bundleno = 3 (0x3), region = 112 }

// kernel: up_forward.4
= control target key start
LH: loop header
LB: loop body
LE: loop exit
PB: predicated region body
PF: predicated region fallthrough
CT: control target
= control target key end

     0   :  { %s3517_s30 = smov 0   ;;  %s3519_s10 = smov 0   ;;  %s4392_s0 = inlined_call_operand.vmem [shape: bf16[2,16,16,128], index: 0, kind: input, shape index: {}, may-alias: {0,1,2}]   ;;  %s4393_s1 = inlined_call_operand.vmem [shape: bf16[2,16,16,128], index: 1, kind: input, shape index: {}, may-alias: {0,1,2}]   ;;  %s4394_s2 = inlined_call_operand.vmem [shape: bf16[2,16,16,128], index: 2, kind: input, shape index: {}, may-alias: {0,1,2}]   ;;  %s4395_s3 = inlined_call_operand.vmem [shape: bf16[3,384,128], index: 3, kind: input, shape index: {}]   ;;  %s4396_s4 = inlined_call_operand.vmem [shape: f32[1,128], index: 4, kind: input, shape index: {}]   ;;  %s4397_s5 = inlined_call_operand.vmem [shape: f32[1,128], index: 5, kind: input, shape index: {}]   ;;  %s4398_s6 = inlined_call_operand.vmem [shape: f32[1,128], index: 6, kind: input, shape index: {}]   ;;  %s4399_s7 = inlined_call_operand.vmem [shape: bf16[2,256,128], index: 7, kind: output, shape index: {0}]   ;;  %s4400_s8 = inlined_call_operand.vmem [shape: f32[2,2,1,128], index: 8, kind: output, shape index: {1}]   ;;  %s4401_s9 = inlined_call_operand.vmem [shape: f32[2,2,1,128], index: 9, kind: output, shape index: {2}]  }
   0x1   :  { %s3521_s11 = smov 0   ;;  %s3523_s12 = smov 0  }
   0x2   :  { %s3525_s13 = smov 0  }
   0x3 LB: > { %s29_s14 = sadd.s32 1, %s3457_s11  ;;  %s32_s15 = sadd.s32 1, %s3461_s12  ;;  %s3465_s13 = sphi %s3525_s13, %s20_s13   ;;  %s3461_s12 = sphi %s3523_s12, %s4415_s12   ;;  %s3457_s11 = sphi %s3521_s11, %s4414_s11   ;;  %s3453_s10 = sphi %s3519_s10, %s4413_s10   ;;  %s3449_s30 = sphi %s3517_s30, %s4412_s30  }
   0x4   : > { %p30_p0 = scmp.ge.s32.totalorder %s29_s14, 2  ;;  %p2716_p1 = scmp.ge.s32.totalorder %s3465_s13, 1 }
   0x5   : > { %p382_p2 = scmp.lt.s32.totalorder %s3465_s13, 5 }
   0x6   : > { %s4417_s14 = smov (%p30_p0, %s29_s14), 0  ;;  %s4419_s15 = smov (!%p30_p0, %s32_s15), %s3461_s12 }
   0x7   : > { %p383_p3 = pnand %p2716_p1, %p382_p2  ;;  %p34_p4 = scmp.ge.s32.totalorder %s4419_s15, 2 }
   0x8   : > { %s3553_s18 = sshll.u32 (!%p383_p3), %s3449_s30, 3  ;;  %p468_p5 = scmp.lt.s32.totalorder (!%p383_p3), %s3453_s10, 1 }
   0x9   : > { %s4421_s15 = smov (%p34_p4, %s4419_s15), 0  ;;  %386 = sbr.rel (%p383_p3) target bundleno = 496 (0x1f0), region = 48 }
   0xa   : > { %p470_p6 = scmp.lt.s32.totalorder (!%p383_p3), %s3553_s18, 15  ;;  %s3574_s24 = sadd.s32 (!%p383_p3), 4294967295, %s3553_s18 }
   0xb   : > { %p480_p7 = scmp.gt.s32.totalorder (!%p383_p3), %s3574_s24, 0  ;;  %p2723_p8 = scmp.lt.s32.totalorder (!%p383_p3), %s3574_s24, 15 }
   0xc   : > { %p604_p9 = scmp.gt.s32.totalorder (!%p383_p3), %s3449_s30, 0  ;;  %s3176_s20 = sadd.s32 (!%p383_p3), 8, %s3553_s18 }
   0xd   : > { %p497_p10 = scmp.lt.s32.totalorder (!%p383_p3), %s3176_s20, 15  ;;  %p524_p11 = scmp.lt.s32.totalorder (!%p383_p3), %s3449_s30, 1 }
   0xe   : > { %v3194_v0 = vld [vmem:[%s4395_s3 + $0x38] sm:$0xff]  ;;  %vm537_vm0 = vcmask 1040384   ;;  %vm538_vm1 = vsmask.f32 256  ;;  %v3193_v1 = vld [vmem:[%s4395_s3 + $0x30] sm:$0xff]  ;;  %s4423_s10 = smov (!%p468_p5, %s3453_s10), 1 }
   0xf   : > { %3353 = vmatpush.bf16.msra.mxu1 %v3194_v0  ;;  %3354 = vmatpush.bf16.msra.mxu2 %v3194_v0  ;;  %vm3563_vm2 = vmand %vm537_vm0, %vm538_vm1  ;;  %s471_s21 = scalar_select %p470_p6, %s3553_s18, 15  ;;  %v546_v3 = vld [vmem:[#allocation2 + $0x18] sm:$0x1]  ;;  %v3192_v5 = vld [vmem:[%s4395_s3 + $0x28] sm:$0xff]  ;;  %vm570_vm3 = vsmask.f32 7938 }
  0x10   : > { %3355 = vmatpush.bf16.msra.mxu3 %v3194_v0  ;;  %1470 = vmatpush.bf16.msra.mxu0 %v3194_v0  ;;  %s3569_s22 = sshll.u32 %s4423_s10, 5  ;;  %v547_v4 = vsel %vm3563_vm2, 0, %v546_v3  ;;  %v552_v6 = vld [vmem:[#allocation2 + $0x30] sm:$0x1]  ;;  %v558_v7 = vld [vmem:[#allocation2 + $0x48] sm:$0x1]  ;;  %vm3800_vm9 = vmand %vm537_vm0, %vm570_vm3 }
  0x11   : > { %s2718_s23 = sshll.u32 %s471_s21, 1  ;;  %548 = vst [vmem:[#allocation2 + $0x18] sm:$0x1] %v547_v4  ;;  %v3583_v8 = vld [vmem:[%s4397_s5] ss:$0 sm:$0xff]  ;;  %v553_v9 = vsel %vm3563_vm2, 0, %v552_v6 }
  0x12   : > { %s474_s27 = sadd.s32 %s3569_s22, %s2718_s23  ;;  %v559_v10 = vsel %vm3563_vm2, 0, %v558_v7  ;;  %v3191_v11 = vld [vmem:[%s4395_s3 + $0x20] sm:$0xff]  ;;  %554 = vst [vmem:[#allocation2 + $0x30] sm:$0x1] %v553_v9  ;;  %vm650_vm4 = vcmask 1043456   ;;  %v3190_v34 = vld [vmem:[%s4395_s3 + $0x18] sm:$0xff] }
  0x13   : > { %3356 = vmatpush.bf16.msra.mxu1 %v3193_v1  ;;  %3357 = vmatpush.bf16.msra.mxu2 %v3193_v1  ;;  %s2720_s28 = sshll.u32 %s474_s27, 2  ;;  %v540_v12 = vld [vmem:[#allocation2] sm:$0x1]  ;;  %560 = vst [vmem:[#allocation2 + $0x48] sm:$0x1] %v559_v10  ;;  %v3189_v52 = vld [vmem:[%s4395_s3 + $0x10] sm:$0xff]  ;;  %vm3658_vm6 = vmand %vm650_vm4, %vm570_vm3 }
  0x14   : > { %3358 = vmatpush.bf16.msra.mxu3 %v3193_v1  ;;  %1471 = vmatpush.bf16.msra.mxu0 %v3193_v1  ;;  %s3596_s23 = scalar_lea.vmem %s4392_s0, %s2720_s28  ;;  %v3606_v18 = vld [vmem:[%s4398_s6] ss:$0 sm:$0xff]  ;;  %v541_v24 = vsel %vm3563_vm2, 0, %v540_v12  ;;  %vm628_vm5 = vsmask.f32 4368  ;;  %v3188_v6 = vld [vmem:[%s4395_s3 + $0x8] sm:$0xff] }
  0x15   : > { %v3339_v13 = vld [vmem:[%s3596_s23 + $0x8] sm:$0xff]   ;;  %v3341_v14 = vld [vmem:[%s3596_s23 + $0x18] sm:$0xff]   ;;  %s481_s25 = scalar_select %p480_p7, %s3574_s24, 0  ;;  %v3340_v21 = vld [vmem:[%s3596_s23 + $0x10] sm:$0xff]   ;;  %542 = vst [vmem:[#allocation2] sm:$0x1] %v541_v24 }
  0x16   : > { %v3343_v15 = vld [vmem:[%s3596_s23 + $0x28] sm:$0xff]   ;;  %v3269_v16 = vunpack.c.l.bf16 %v3339_v13  ;;  %v3270_v17 = vunpack.c.h.bf16 %v3339_v13  ;;  %v3277_v19 = vunpack.c.l.bf16 %v3341_v14  ;;  %v3278_v20 = vunpack.c.h.bf16 %v3341_v14  ;;  %s3620_s28 = scalar_select %p604_p9, 1, 0  ;;  %v549_v38 = vld [vmem:[#allocation2 + $0x24] sm:$0x1]  ;;  %vm3666_vm7 = vmor %vm538_vm1, %vm628_vm5 }
  0x17   : > { %3359 = vmatpush.bf16.msra.mxu1 %v3192_v5  ;;  %3360 = vmatpush.bf16.msra.mxu2 %v3192_v5  ;;  %v3285_v22 = vunpack.c.l.bf16 %v3343_v15  ;;  %v3286_v23 = vunpack.c.h.bf16 %v3343_v15  ;;  %s4425_s25 = smov (!%p2723_p8, %s481_s25), 15  ;;  %v3273_v25 = vunpack.c.l.bf16 %v3340_v21  ;;  %v3274_v32 = vunpack.c.h.bf16 %v3340_v21  ;;  %s4427_s20 = smov (!%p497_p10, %s3176_s20), 15 }
  0x18   : > { %3361 = vmatpush.bf16.msra.mxu3 %v3192_v5  ;;  %1472 = vmatpush.bf16.msra.mxu0 %v3192_v5  ;;  %v697_v26 = vmul.f32 %v3583_v8, %v3269_v16  ;;  %v698_v27 = vmul.f32 %v3583_v8, %v3270_v17  ;;  %v701_v28 = vmul.f32 %v3583_v8, %v3277_v19  ;;  %s2728_s24 = sshll.u32 %s4425_s25, 1  ;;  %v622_v42 = vstv %s3620_s28  ;;  %v931_v14 = vld [vmem:[#allocation2 + $0x18] sm:$0xf]  ;;  %s4429_s20 = smov (!%p497_p10, %s4427_s20), 15 }
  0x19   : > { %v702_v29 = vmul.f32 %v3583_v8, %v3278_v20  ;;  %v705_v30 = vmul.f32 %v3583_v8, %v3285_v22  ;;  %v706_v31 = vmul.f32 %v3583_v8, %v3286_v23  ;;  %v3625_v33 = vmul.f32 %v3583_v8, %v3273_v25  ;;  %s488_s17 = sadd.s32 %s2728_s24, %s3569_s22  ;;  %v945_v24 = vld [vmem:[#allocation2 + $0x30] sm:$0xf]  ;;  %v3216_v20 = vld [vmem:[%s4395_s3 + $0xe8] sm:$0xff]  ;;  %s2735_s18 = sshll.u32 %s4429_s20, 1 }
  0x1a   : > { %v717_v35 = vadd.f32 %v3606_v18, %v697_v26  ;;  %v718_v36 = vadd.f32 %v3606_v18, %v698_v27  ;;  %v721_v37 = vadd.f32 %v3606_v18, %v701_v28  ;;  %s2730_s19 = sshll.u32 %s488_s17, 2  ;;  %v550_v46 = vsel %vm3563_vm2, 0, %v549_v38  ;;  %v3419_v26 = vld [vmem:[%s4397_s5] ss:$0 sm:$0xff]  ;;  %s505_s21 = sadd.s32 %s2735_s18, %s3569_s22 }
  0x1b   : > { %3362 = vmatpush.bf16.msra.mxu1 %v3191_v11  ;;  %3363 = vmatpush.bf16.msra.mxu2 %v3191_v11  ;;  %v722_v39 = vadd.f32 %v3606_v18, %v702_v29  ;;  %v725_v40 = vadd.f32 %v3606_v18, %v705_v30  ;;  %v726_v41 = vadd.f32 %v3606_v18, %v706_v31  ;;  %s490_s25 = scalar_lea.vmem %s4393_s1, %s2730_s19  ;;  %vm3672_vm8 = vcmp.eq.s32.totalorder %v622_v42, 1  ;;  %v3187_v27 = vld [vmem:[%s4395_s3] sm:$0xff]  ;;  %s2738_s18 = sshll.u32 %s3449_s30, 4 }
  0x1c   : > { %3364 = vmatpush.bf16.msra.mxu3 %v3191_v11  ;;  %1473 = vmatpush.bf16.msra.mxu0 %v3191_v11  ;;  %v733_v43 = vmax.f32 %v717_v35, 0.0  ;;  %v734_v44 = vmax.f32 %v718_v36, 0.0  ;;  %v737_v45 = vmax.f32 %v721_v37, 0.0  ;;  %v3643_v50 = vld [vmem:[%s490_s25] sm:$0xff]   ;;  %551 = vst [vmem:[#allocation2 + $0x24] sm:$0x1] %v550_v46  ;;  %v3646_v51 = vmul.f32 %v3583_v8, %v3274_v32 }
  0x1d   : > { %v738_v47 = vmax.f32 %v722_v39, 0.0  ;;  %v741_v48 = vmax.f32 %v725_v40, 0.0  ;;  %v742_v49 = vmax.f32 %v726_v41, 0.0  ;;  %v3261_v56 = vunpack.c.l.bf16 %v3643_v50  ;;  %v959_v32 = vld [vmem:[#allocation2 + $0x48] sm:$0xf]  ;;  %v3342_v40 = vld [vmem:[%s3596_s23 + $0x20] sm:$0xff]  }
  0x1e   : > { %v749_v53 = vpack.c.bf16 %v733_v43, %v733_v43  ;;  %v750_v54 = vpack.c.bf16 %v734_v44, %v734_v44  ;;  %v753_v55 = vpack.c.bf16 %v737_v45, %v737_v45  ;;  %v3262_v60 = vunpack.c.h.bf16 %v3643_v50  ;;  %v3420_v38 = vld [vmem:[%s4398_s6] ss:$0 sm:$0xff]  ;;  %v555_v39 = vld [vmem:[#allocation2 + $0x3c] sm:$0x1]  ;;  %s2737_s25 = sshll.u32 %s505_s21, 2  ;;  %p515_p12 = scmp.lt.s32.totalorder %s2738_s18, 31 }
  0x1f   : > { %3365 = vmatpush.bf16.msra.mxu1 %v3190_v34  ;;  %3366 = vmatpush.bf16.msra.mxu2 %v3190_v34  ;;  %v754_v57 = vpack.c.bf16 %v738_v47, %v738_v47  ;;  %v757_v58 = vpack.c.bf16 %v741_v48, %v741_v48  ;;  %v758_v59 = vpack.c.bf16 %v742_v49, %v742_v49  ;;  %v3210_v44 = vld [vmem:[%s4395_s3 + $0xb8] sm:$0xff]  ;;  %vm1140_vm10 = vsmask.f32 7424  ;;  %s507_s27 = scalar_lea.vmem %s4394_s2, %s2737_s25  ;;  %s4433_s30 = smov (!%p524_p11, %s3449_s30), 1 }
  0x20   : > { %3367 = vmatpush.bf16.msra.mxu3 %v3190_v34  ;;  %1474 = vmatpush.bf16.msra.mxu0 %v3190_v34  ;;  %v781_v61 = vshrl.u32 %v749_v53, 16  ;;  %v784_v62 = vshll.u32 %v749_v53, 16  ;;  %v789_v63 = vshrl.u32 %v750_v54, 16  ;;  %v792_v0 = vshll.u32 %v750_v54, 16  ;;  %v3218_v46 = vld [vmem:[%s4395_s3 + $0xf8] sm:$0xff]  ;;  %v3712_v53 = vld [vmem:[%s3596_s23 + $0x30] sm:$0xff]  }
  0x21   : > { %v815_v1 = vshrl.u32 %v753_v55, 16  ;;  %v818_v3 = vshll.u32 %v753_v55, 16  ;;  %v823_v4 = vshrl.u32 %v754_v57, 16  ;;  %v826_v5 = vshll.u32 %v754_v57, 16  ;;  %v3202_v55 = vld [vmem:[%s4395_s3 + $0x78] sm:$0xff]  ;;  %s4431_s18 = smov (!%p515_p12, %s2738_s18), 31 }
  0x22   : > { %v783_v9 = vrot.slane %v781_v61, 7  ;;  %v3662_v10 = vrot.slane %v789_v63, 7  ;;  %v849_v11 = vshrl.u32 %v757_v58, 16  ;;  %v852_v12 = vshll.u32 %v757_v58, 16  ;;  %v3226_v50 = vld [vmem:[%s4395_s3 + $0x138] sm:$0xff]  ;;  %v3209_v63 = vld [vmem:[%s4395_s3 + $0xb0] sm:$0xff]  ;;  %s518_s21 = sadd.s32 %s3569_s22, %s4431_s18 }
  0x23   : > { %3368 = vmatpush.bf16.msra.mxu1 %v3189_v52  ;;  %3369 = vmatpush.bf16.msra.mxu2 %v3189_v52  ;;  %v817_v15 = vrot.slane %v815_v1, 7  ;;  %v3670_v16 = vrot.slane %v823_v4, 7  ;;  %v857_v17 = vshrl.u32 %v758_v59, 16  ;;  %v860_v19 = vshll.u32 %v758_v59, 16  ;;  %s999_s17 = scalar_select %p524_p11, 1, 0 }
  0x24   : > { %3370 = vmatpush.bf16.msra.mxu3 %v3189_v52  ;;  %1475 = vmatpush.bf16.msra.mxu0 %v3189_v52  ;;  %v786_v21 = vor.u32 %v784_v62, %v783_v9  ;;  %v787_v22 = vrot.slane %v783_v9, 4  ;;  %v794_v23 = vor.u32 %v792_v0, %v3662_v10  ;;  %v851_v25 = vrot.slane %v849_v11, 7  ;;  %v561_v52 = vld [vmem:[#allocation2 + $0x54] sm:$0x1]  ;;  %v543_v62 = vld [vmem:[#allocation2 + $0xc] sm:$0x1] }
  0x25   : > { %v820_v28 = vor.u32 %v818_v3, %v817_v15  ;;  %v821_v29 = vrot.slane %v817_v15, 4  ;;  %v828_v30 = vor.u32 %v826_v5, %v3670_v16  ;;  %v3684_v31 = vrot.slane %v857_v17, 7  ;;  %s2740_s25 = sshll.u32 %s518_s21, 2  ;;  %s2741_s22 = sshll.u32 %s4423_s10, 1 }
  0x26   : > { %v795_v34 = vsel %vm3666_vm7, %v787_v22, %v794_v23  ;;  %v932_v35 = vsel %vm3658_vm6, %v786_v21, %v931_v14  ;;  %v854_v36 = vor.u32 %v852_v12, %v851_v25  ;;  %v855_v37 = vrot.slane %v851_v25, 4  ;;  %v3201_v12 = vld [vmem:[%s4395_s3 + $0x70] sm:$0xff]  ;;  %s527_s28 = sadd.s32 %s2741_s22, %s4433_s30 }
  0x27   : > { %3371 = vmatpush.bf16.msra.mxu1 %v3188_v6  ;;  %3372 = vmatpush.bf16.msra.mxu2 %v3188_v6  ;;  %933 = vst [vmem:[#allocation2 + $0x18] sm:$0xf] %v932_v35  ;;  %v829_v41 = vsel %vm3666_vm7, %v821_v29, %v828_v30  ;;  %v946_v42 = vsel %vm3658_vm6, %v820_v28, %v945_v24  ;;  %v3281_v57 = vunpack.c.l.bf16 %v3342_v40  ;;  %v3282_v61 = vunpack.c.h.bf16 %v3342_v40  ;;  %v3225_v14 = vld [vmem:[%s4395_s3 + $0x130] sm:$0xff]  ;;  %v938_v35 = vld [vmem:[#allocation2 + $0x24] sm:$0xf]  ;;  %s528_s16 = scalar_lea.vmem %s4400_s8, %s527_s28  ;;  %s535_s20 = scalar_lea.vmem %s4401_s9, %s527_s28 }
  0x28   : > { %3373 = vmatpush.bf16.msra.mxu3 %v3188_v6  ;;  %1476 = vmatpush.bf16.msra.mxu0 %v3188_v6  ;;  %v862_v43 = vor.u32 %v860_v19, %v3684_v31  ;;  %934 = vst [vmem:[#allocation2 + $0x1c] sm:$0xf] %v795_v34  ;;  %v960_v45 = vsel %vm3658_vm6, %v854_v36, %v959_v32  ;;  %v562_v1 = vsel %vm3563_vm2, 0, %v561_v52  ;;  %v3289_v3 = vunpack.c.l.bf16 %v3712_v53  ;;  %v3217_v6 = vld [vmem:[%s4395_s3 + $0xf0] sm:$0xff]  ;;  %v3208_v32 = vld [vmem:[%s4395_s3 + $0xa8] sm:$0xff]  ;;  %v3264_v52 = vld [vmem:[%s3596_s23] sm:$0xff]  }
  0x29   : > { %v611_v47 = vmul.f32 %v3419_v26, %v3261_v56  ;;  %v612_v48 = vmul.f32 %v3419_v26, %v3262_v60  ;;  %v719_v49 = vadd.f32 %v3606_v18, %v3625_v33  ;;  %947 = vst [vmem:[#allocation2 + $0x30] sm:$0xf] %v946_v42  ;;  %v720_v56 = vadd.f32 %v3606_v18, %v3646_v51 }
  0x2a   : > { %v863_v54 = vsel %vm3666_vm7, %v855_v37, %v862_v43  ;;  %v556_v33 = vsel %vm3563_vm2, 0, %v555_v39  ;;  %948 = vst [vmem:[#allocation2 + $0x34] sm:$0xf] %v829_v41  ;;  %v703_v0 = vmul.f32 %v3583_v8, %v3281_v57  ;;  %v704_v11 = vmul.f32 %v3583_v8, %v3282_v61  ;;  %v3207_v57 = vld [vmem:[%s4395_s3 + $0xa0] sm:$0xff] }
  0x2b   : > { %3374 = vmatpush.bf16.msra.mxu1 %v3187_v27  ;;  %3375 = vmatpush.bf16.msra.mxu2 %v3187_v27  ;;  %v617_v58 = vadd.f32 %v3420_v38, %v611_v47  ;;  %v618_v59 = vadd.f32 %v3420_v38, %v612_v48  ;;  %v735_v60 = vmax.f32 %v719_v49, 0.0  ;;  %961 = vst [vmem:[#allocation2 + $0x48] sm:$0xf] %v960_v45  ;;  %v736_v51 = vmax.f32 %v720_v56, 0.0  ;;  %v3200_v45 = vld [vmem:[%s4395_s3 + $0x68] sm:$0xff] }
  0x2c   : > { %3376 = vmatpush.bf16.msra.mxu3 %v3187_v27  ;;  %962 = vst [vmem:[#allocation2 + $0x4c] sm:$0xf] %v863_v54  ;;  %1477 = vmatpush.bf16.msra.mxu0 %v3187_v27  ;;  %v723_v17 = vadd.f32 %v3606_v18, %v703_v0  ;;  %v3290_v19 = vunpack.c.h.bf16 %v3712_v53  ;;  %v544_v21 = vsel %vm3563_vm2, 0, %v543_v62  ;;  %v724_v36 = vadd.f32 %v3606_v18, %v704_v11  ;;  %v3223_v0 = vld [vmem:[%s4395_s3 + $0x120] sm:$0xff] }
  0x2d   : > { %v619_v4 = vmax.f32 %v617_v58, 0.0  ;;  %v620_v5 = vmax.f32 %v618_v59, 0.0  ;;  %v751_v9 = vpack.c.bf16 %v735_v60, %v735_v60  ;;  %v752_v15 = vpack.c.bf16 %v736_v51, %v736_v51  ;;  %557 = vst [vmem:[#allocation2 + $0x3c] sm:$0x1] %v556_v33  ;;  %v652_v33 = vld [vmem:[#allocation2] sm:$0xf] }
  0x2e   : > { %563 = vst [vmem:[#allocation2 + $0x54] sm:$0x1] %v562_v1  ;;  %v739_v37 = vmax.f32 %v723_v17, 0.0  ;;  %v707_v38 = vmul.f32 %v3583_v8, %v3289_v3  ;;  %v740_v49 = vmax.f32 %v724_v36, 0.0  ;;  %v708_v56 = vmul.f32 %v3583_v8, %v3290_v19  ;;  %v3215_v58 = vld [vmem:[%s4395_s3 + $0xe0] sm:$0xff] }
  0x2f   : > { %1568 = vmatpush.bf16.msrb.mxu2 %v3210_v44  ;;  %1519 = vmatpush.bf16.msrb.mxu1 %v3202_v55  ;;  %v624_v22 = vsel %vm3672_vm8, %v619_v4, 0.0  ;;  %v625_v23 = vsel %vm3672_vm8, %v620_v5, 0.0  ;;  %v798_v24 = vshrl.u32 %v751_v9, 16  ;;  %v801_v25 = vshll.u32 %v751_v9, 16  ;;  %v3751_v26 = vld [vmem:[#allocation2 + $0x18] sm:$0xff]  ;;  %v3224_v44 = vld [vmem:[%s4395_s3 + $0x128] sm:$0xff] }
  0x30   : > { %1852 = vmatpush.bf16.msrb.mxu3 %v3218_v46  ;;  %1901 = vmatpush.bf16.msrb.mxu0 %v3226_v50  ;;  %v626_v27 = vpack.c.bf16 %v624_v22, %v624_v22  ;;  %v627_v28 = vpack.c.bf16 %v625_v23, %v625_v23  ;;  %v806_v29 = vshrl.u32 %v752_v15, 16  ;;  %v809_v30 = vshll.u32 %v752_v15, 16  ;;  %545 = vst [vmem:[#allocation2 + $0xc] sm:$0x1] %v544_v21  ;;  %v3199_v3 = vld [vmem:[%s4395_s3 + $0x60] sm:$0xff]  ;;  %v3206_v21 = vld [vmem:[%s4395_s3 + $0x98] sm:$0xff] }
  0x31   : > { %v800_v34 = vrot.slane %v798_v24, 7  ;;  %1488 = vmatmul.bf16.vlgmr.msra.gmra.mxu1 %v3751_v26  ;;  %v3762_v39 = vld [vmem:[#allocation2 + $0x30] sm:$0xff]  ;;  %v755_v50 = vpack.c.bf16 %v739_v37, %v739_v37  ;;  %v756_v61 = vpack.c.bf16 %v740_v49, %v740_v49  ;;  %v3265_v1 = vunpack.c.l.bf16 %v3264_v52 }
  0x32   : > { %v631_v40 = vshrl.u32 %v626_v27, 16  ;;  %v634_v41 = vshll.u32 %v626_v27, 16  ;;  %v639_v42 = vshrl.u32 %v627_v28, 16  ;;  %v642_v43 = vshll.u32 %v627_v28, 16  ;;  %1498 = vmatmul.bf16.vlgmr.msra.gmra.mxu2 %v3762_v39  ;;  %v575_v22 = vld [vmem:[#allocation2 + $0x14] sm:$0x1] }
  0x33   : > { %1569 = vmatpush.bf16.msrb.mxu2 %v3209_v63  ;;  %1520 = vmatpush.bf16.msrb.mxu1 %v3201_v12  ;;  %v803_v46 = vor.u32 %v801_v25, %v800_v34  ;;  %v804_v47 = vrot.slane %v800_v34, 4  ;;  %v3770_v48 = vrot.slane %v806_v29, 7  ;;  %v3774_v53 = vld [vmem:[#allocation2 + $0x48] sm:$0xff]  ;;  %v832_v5 = vshrl.u32 %v755_v50, 16  ;;  %v3214_v27 = vld [vmem:[%s4395_s3 + $0xd8] sm:$0xff]  ;;  %v3213_v49 = vld [vmem:[%s4395_s3 + $0xd0] sm:$0xff] }
  0x34   : > { %1853 = vmatpush.bf16.msrb.mxu3 %v3217_v6  ;;  %1902 = vmatpush.bf16.msrb.mxu0 %v3225_v14  ;;  %v633_v54 = vrot.slane %v631_v40, 7  ;;  %v3776_v55 = vrot.slane %v639_v42, 7  ;;  %v835_v6 = vshll.u32 %v755_v50, 16  ;;  %v840_v9 = vshrl.u32 %v756_v61, 16  ;;  %v572_v12 = vld [vmem:[#allocation2 + $0x8] sm:$0x1] }
  0x35   : > { %v811_v59 = vor.u32 %v809_v30, %v3770_v48  ;;  %v939_v60 = vsel %vm3658_vm6, %v803_v46, %v938_v35  ;;  %1508 = vmatmul.bf16.vlgmr.msra.gmra.mxu3 %v3774_v53  ;;  %v843_v17 = vshll.u32 %v756_v61, 16  ;;  %v727_v19 = vadd.f32 %v3606_v18, %v707_v38  ;;  %v3222_v29 = vld [vmem:[%s4395_s3 + $0x118] sm:$0xff] }
  0x36   : > { %v636_v62 = vor.u32 %v634_v41, %v633_v54  ;;  %v637_v63 = vrot.slane %v633_v54, 4  ;;  %v644_v51 = vor.u32 %v642_v43, %v3776_v55  ;;  %940 = vst [vmem:[#allocation2 + $0x24] sm:$0xf] %v939_v60  ;;  %v834_v23 = vrot.slane %v832_v5, 7  ;;  %v952_v30 = vld [vmem:[#allocation2 + $0x3c] sm:$0xf] }
  0x37   : > { %1570 = vmatpush.bf16.msrb.mxu2 %v3208_v32  ;;  %1521 = vmatpush.bf16.msrb.mxu1 %v3200_v45  ;;  %v812_v4 = vsel %vm3666_vm7, %v804_v47, %v811_v59  ;;  %v3812_v24 = vrot.slane %v840_v9, 7  ;;  %v728_v25 = vadd.f32 %v3606_v18, %v708_v56  ;;  %v3266_v28 = vunpack.c.h.bf16 %v3264_v52  ;;  %v3198_v40 = vld [vmem:[%s4395_s3 + $0x58] sm:$0xff]  ;;  %v578_v54 = vld [vmem:[#allocation2 + $0x20] sm:$0x1]  ;;  %v3220_v5 = vld [vmem:[%s4395_s3 + $0x108] sm:$0xff] }
  0x38   : > { %1854 = vmatpush.bf16.msrb.mxu3 %v3216_v20  ;;  %1903 = vmatpush.bf16.msrb.mxu0 %v3224_v44  ;;  %v645_v14 = vsel %vm3666_vm7, %v637_v63, %v644_v51  ;;  %v653_v15 = vsel %vm3658_vm6, %v636_v62, %v652_v33  ;;  %941 = vst [vmem:[#allocation2 + $0x28] sm:$0xf] %v812_v4  ;;  %v743_v32 = vmax.f32 %v727_v19, 0.0  ;;  %v573_v34 = vsel %vm3800_vm9, 0, %v572_v12  ;;  %v3205_v44 = vld [vmem:[%s4395_s3 + $0x90] sm:$0xff] }
  0x39   : > { %654 = vst [vmem:[#allocation2] sm:$0xf] %v653_v15  ;;  %v695_v20 = vmul.f32 %v3583_v8, %v3265_v1  ;;  %v837_v35 = vor.u32 %v835_v6, %v834_v23  ;;  %v838_v36 = vrot.slane %v834_v23, 4  ;;  %v845_v37 = vor.u32 %v843_v17, %v3812_v24  ;;  %v3212_v1 = vld [vmem:[%s4395_s3 + $0xc8] sm:$0xff]  ;;  %v966_v4 = vld [vmem:[#allocation2 + $0x54] sm:$0xf] }
  0x3a   : > { %655 = vst [vmem:[#allocation2 + $0x4] sm:$0xf] %v645_v14  ;;  %v744_v38 = vmax.f32 %v728_v25, 0.0  ;;  %v759_v41 = vpack.c.bf16 %v743_v32, %v743_v32  ;;  %v696_v42 = vmul.f32 %v3583_v8, %v3266_v28  ;;  %v3197_v8 = vld [vmem:[%s4395_s3 + $0x50] sm:$0xff]  ;;  %v576_v52 = vsel %vm3800_vm9, 0, %v575_v22  ;;  %v3196_v23 = vld [vmem:[%s4395_s3 + $0x48] sm:$0xff] }
  0x3b   : > { %1571 = vmatpush.bf16.msrb.mxu2 %v3207_v57  ;;  %1522 = vmatpush.bf16.msrb.mxu1 %v3199_v3  ;;  %574 = vst [vmem:[#allocation2 + $0x8] sm:$0x1] %v573_v34  ;;  %v715_v43 = vadd.f32 %v3606_v18, %v695_v20  ;;  %v846_v45 = vsel %vm3666_vm7, %v838_v36, %v845_v37  ;;  %v646_v59 = vrot.slane %v3776_v55, 4  ;;  %v579_v6 = vsel %vm3800_vm9, 0, %v578_v54  ;;  %v924_v22 = vld [vmem:[#allocation2 + $0xc] sm:$0xf] }
  0x3c   : > { %1855 = vmatpush.bf16.msrb.mxu3 %v3215_v58  ;;  %1904 = vmatpush.bf16.msrb.mxu0 %v3223_v0  ;;  %v953_v46 = vsel %vm3658_vm6, %v837_v35, %v952_v30  ;;  %v760_v47 = vpack.c.bf16 %v744_v38, %v744_v38  ;;  %v866_v50 = vshrl.u32 %v759_v41, 16  ;;  %v869_v56 = vshll.u32 %v759_v41, 16  ;;  %v3221_v58 = vld [vmem:[%s4395_s3 + $0x110] sm:$0xff]  ;;  %955 = vst [vmem:[#allocation2 + $0x40] sm:$0xf] %v846_v45  ;;  %v3203_v32 = vld [vmem:[%s4395_s3 + $0x80] sm:$0xff] }
  0x3d   : > { %954 = vst [vmem:[#allocation2 + $0x3c] sm:$0xf] %v953_v46  ;;  %v716_v33 = vadd.f32 %v3606_v18, %v696_v42  ;;  %v731_v57 = vmax.f32 %v715_v43, 0.0  ;;  %v3204_v18 = vld [vmem:[%s4395_s3 + $0x88] sm:$0xff]  ;;  %v3211_v34 = vld [vmem:[%s4395_s3 + $0xc0] sm:$0xff]  ;;  %v3242_v35 = vld [vmem:[%s4395_s3 + $0x1b8] sm:$0xff] }
  0x3e   : > { %v874_v61 = vshrl.u32 %v760_v47, 16  ;;  %v877_v62 = vshll.u32 %v760_v47, 16  ;;  %v868_v63 = vrot.slane %v866_v50, 7  ;;  %577 = vst [vmem:[#allocation2 + $0x14] sm:$0x1] %v576_v52  ;;  %v3250_v36 = vld [vmem:[%s4395_s3 + $0x1f8] sm:$0xff] }
  0x3f   : > { %1572 = vmatpush.bf16.msrb.mxu2 %v3206_v21  ;;  %v3850_v60 = vld [vmem:[#allocation2 + $0x24] sm:$0xff]  ;;  %1523 = vmatpush.bf16.msrb.mxu1 %v3198_v40  ;;  %v732_v51 = vmax.f32 %v716_v33, 0.0  ;;  %v747_v0 = vpack.c.bf16 %v731_v57, %v731_v57  ;;  %580 = vst [vmem:[#allocation2 + $0x20] sm:$0x1] %v579_v6  ;;  %v796_v42 = vrot.slane %v3662_v10, 4  ;;  %v3234_v10 = vld [vmem:[%s4395_s3 + $0x178] sm:$0xff] }
  0x40   : > { %1856 = vmatpush.bf16.msrb.mxu3 %v3214_v27  ;;  %1905 = vmatpush.bf16.msrb.mxu0 %v3222_v29  ;;  %v3860_v55 = vrot.slane %v874_v61, 7  ;;  %v871_v9 = vor.u32 %v869_v56, %v868_v63  ;;  %v872_v12 = vrot.slane %v868_v63, 4  ;;  %v3195_v43 = vld [vmem:[%s4395_s3 + $0x40] sm:$0xff]  ;;  %v3258_v52 = vld [vmem:[%s4395_s3 + $0x238] sm:$0xff]  ;;  %v581_v54 = vld [vmem:[#allocation2 + $0x2c] sm:$0x1] }
  0x41   : > { %v3858_v3 = vld [vmem:[#allocation2] sm:$0xff]  ;;  %1493 = vmatmul.bf16.gmra.mxu1 %v3850_v60  ;;  %v748_v14 = vpack.c.bf16 %v732_v51, %v732_v51  ;;  %v764_v15 = vshrl.u32 %v747_v0, 16  ;;  %v767_v21 = vshll.u32 %v747_v0, 16  ;;  %v582_v56 = vsel %vm3800_vm9, 0, %v581_v54 }
  0x42   : > { %v656_v17 = vld [vmem:[#allocation2 + $0x8] sm:$0x1]  ;;  %1478 = vmatmul.bf16.vlgmr.msra.gmra.mxu0 %v3858_v3  ;;  %v879_v19 = vor.u32 %v877_v62, %v3860_v55  ;;  %v967_v27 = vsel %vm3658_vm6, %v871_v9, %v966_v4  ;;  %583 = vst [vmem:[#allocation2 + $0x2c] sm:$0x1] %v582_v56  ;;  %v1142_v62 = vshrl.u32 %v3858_v3, 16  ;;  %v813_v6 = vrot.slane %v3770_v48, 4 }
  0x43   : > { %1573 = vmatpush.bf16.msrb.mxu2 %v3205_v44  ;;  %1524 = vmatpush.bf16.msrb.mxu1 %v3197_v8  ;;  %v657_v25 = vsel %vm3563_vm2, %v646_v59, %v656_v17  ;;  %v766_v28 = vrot.slane %v764_v15, 7  ;;  %v772_v29 = vshrl.u32 %v748_v14, 16  ;;  %v775_v30 = vshll.u32 %v748_v14, 16  ;;  %968 = vst [vmem:[#allocation2 + $0x54] sm:$0xf] %v967_v27  ;;  %v3219_v44 = vld [vmem:[%s4395_s3 + $0x100] sm:$0xff] }
  0x44   : > { %1857 = vmatpush.bf16.msrb.mxu3 %v3213_v49  ;;  %1906 = vmatpush.bf16.msrb.mxu0 %v3221_v58  ;;  %658 = vst [vmem:[#allocation2 + $0x8] sm:$0x1] %v657_v25  ;;  %v880_v20 = vsel %vm3666_vm7, %v872_v12, %v879_v19  ;;  %v3891_v37 = vld [vmem:[#allocation2 + $0x3c] sm:$0xff]  ;;  %v1144_v49 = vshll.u32 %v3858_v3, 16  ;;  %v1246_v9 = vrot.slane %v3858_v3, 1  ;;  %vm1245_vm11 = vcmask 1046528  }
  0x45   : > { %969 = vst [vmem:[#allocation2 + $0x58] sm:$0xf] %v880_v20  ;;  %v769_v38 = vor.u32 %v767_v21, %v766_v28  ;;  %v770_v40 = vrot.slane %v766_v28, 4  ;;  %v774_v41 = vrot.slane %v772_v29, 7  ;;  %v928_v45 = vld [vmem:[#allocation2 + $0x14] sm:$0x1]  ;;  %1503 = vmatmul.bf16.gmra.mxu2 %v3891_v37 }
  0x46   : > { %v935_v50 = vld [vmem:[#allocation2 + $0x20] sm:$0x1]  ;;  %v1146_v63 = vrot.slane %v1144_v49, 1  ;;  %v3233_v48 = vld [vmem:[%s4395_s3 + $0x170] sm:$0xff]  ;;  %v584_v29 = vld [vmem:[#allocation2 + $0x38] sm:$0x1] }
  0x47   : > { %1574 = vmatpush.bf16.msrb.mxu2 %v3204_v18  ;;  %1525 = vmatpush.bf16.msrb.mxu1 %v3196_v23  ;;  %v777_v46 = vor.u32 %v775_v30, %v774_v41  ;;  %v925_v47 = vsel %vm3658_vm6, %v769_v38, %v924_v22  ;;  %v779_v8 = vrot.slane %v774_v41, 4  ;;  %v936_v58 = vsel %vm3563_vm2, %v796_v42, %v935_v50  ;;  %v3241_v18 = vld [vmem:[%s4395_s3 + $0x1b0] sm:$0xff]  ;;  %v3248_v41 = vld [vmem:[%s4395_s3 + $0x1e8] sm:$0xff]  ;;  %v587_v50 = vld [vmem:[#allocation2 + $0x44] sm:$0x1] }
  0x48   : > { %1858 = vmatpush.bf16.msrb.mxu3 %v3212_v1  ;;  %1907 = vmatpush.bf16.msrb.mxu0 %v3220_v5  ;;  %926 = vst [vmem:[#allocation2 + $0xc] sm:$0xf] %v925_v47  ;;  %v3249_v1 = vld [vmem:[%s4395_s3 + $0x1f0] sm:$0xff]  ;;  %v1147_v4 = vor.u32 %v1146_v63, %v1142_v62  ;;  %v830_v42 = vrot.slane %v3670_v16, 4  ;;  %v3256_v16 = vld [vmem:[%s4395_s3 + $0x228] sm:$0xff]  ;;  %v1168_v54 = vshll.u32 %v3751_v26, 16 }
  0x49   : > { %v778_v33 = vsel %vm3666_vm7, %v770_v40, %v777_v46  ;;  %v929_v57 = vsel %vm3563_vm2, %v779_v8, %v928_v45  ;;  %937 = vst [vmem:[#allocation2 + $0x20] sm:$0x1] %v936_v58  ;;  %v942_v14 = vld [vmem:[#allocation2 + $0x2c] sm:$0x1]  ;;  %v3257_v3 = vld [vmem:[%s4395_s3 + $0x230] sm:$0xff]  ;;  %v1166_v56 = vshrl.u32 %v3751_v26, 16 }
  0x4a   : > { %927 = vst [vmem:[#allocation2 + $0x10] sm:$0xf] %v778_v33  ;;  %v943_v19 = vsel %vm3563_vm2, %v813_v6, %v942_v14  ;;  %v3240_v40 = vld [vmem:[%s4395_s3 + $0x1a8] sm:$0xff]  ;;  %v1170_v33 = vrot.slane %v1168_v54, 1  ;;  %v588_v58 = vsel %vm3800_vm9, 0, %v587_v50  ;;  %v3239_v63 = vld [vmem:[%s4395_s3 + $0x1a0] sm:$0xff] }
  0x4b   : > { %1575 = vmatpush.bf16.msrb.mxu2 %v3203_v32  ;;  %1526 = vmatpush.bf16.msrb.mxu1 %v3195_v43  ;;  %v1036_v59 = vld [vmem:[#allocation2 + $0x8] sm:$0x1]  ;;  %930 = vst [vmem:[#allocation2 + $0x14] sm:$0x1] %v929_v57  ;;  %v3255_v14 = vld [vmem:[%s4395_s3 + $0x220] sm:$0xff]  ;;  %v3237_v50 = vld [vmem:[%s4395_s3 + $0x190] sm:$0xff] }
  0x4c   : > { %1859 = vmatpush.bf16.msrb.mxu3 %v3211_v34  ;;  %1908 = vmatpush.bf16.msrb.mxu0 %v3219_v44  ;;  %v1124_v61 = vunpack.c.l.b16 %v1036_v59  ;;  %v3919_v51 = vld [vmem:[#allocation2 + $0x54] sm:$0xff]  ;;  %944 = vst [vmem:[#allocation2 + $0x2c] sm:$0x1] %v943_v19  ;;  %v585_v34 = vsel %vm3800_vm9, 0, %v584_v29  ;;  %v3232_v8 = vld [vmem:[%s4395_s3 + $0x168] sm:$0xff]  ;;  %v1171_v59 = vor.u32 %v1170_v33, %v1166_v56  ;;  %v1180_v19 = vshll.u32 %v3850_v60, 16 }
  0x4d   : > { %1513 = vmatmul.bf16.gmra.mxu3 %v3919_v51  ;;  %586 = vst [vmem:[#allocation2 + $0x38] sm:$0x1] %v585_v34  ;;  %v3238_v29 = vld [vmem:[%s4395_s3 + $0x198] sm:$0xff]  ;;  %v1255_v34 = vrot.slane %v3850_v60, 1  ;;  %v3245_v56 = vld [vmem:[%s4395_s3 + $0x1d0] sm:$0xff] }
  0x4e   : > { %v1132_v0 = vpack.c.b16 %v1124_v61, %v1124_v61  ;;  %589 = vst [vmem:[#allocation2 + $0x44] sm:$0x1] %v588_v58 }
  0x4f   : > { %2234 = vmatpush.bf16.msra.mxu2 %v3242_v35  ;;  %1950 = vmatpush.bf16.msra.mxu1 %v3234_v10 }
  0x50   : > { %2283 = vmatpush.bf16.msra.mxu3 %v3250_v36  ;;  %2332 = vmatpush.bf16.msra.mxu0 %v3258_v52  ;;  %v1149_v5 = vshll.u32 %v1132_v0, 16  ;;  %v1247_v12 = vrot.slane %v1132_v0, 1  ;;  %v1042_v38 = vld [vmem:[#allocation2 + $0x20] sm:$0x1] }
  0x51   : > { %v3178_v15 = vld [vmem:[#allocation2 + $0xc] sm:$0xff]  ;;  %v1126_v46 = vunpack.c.l.b16 %v1042_v38  ;;  %v3247_v0 = vld [vmem:[%s4395_s3 + $0x1e0] sm:$0xff] }
  0x52   : > { %v1151_v17 = vrot.slane %v1149_v5, 1  ;;  %v1039_v21 = vld [vmem:[#allocation2 + $0x14] sm:$0x1]  ;;  %1483 = vmatmul.bf16.gmra.mxu0 %v3178_v15  ;;  %v1248_v25 = vsel %vm1245_vm11, %v1246_v9, %v1247_v12  ;;  %v1156_v27 = vshll.u32 %v3178_v15, 16  ;;  %v1154_v30 = vshrl.u32 %v3178_v15, 16 }
  0x53   : > { %2235 = vmatpush.bf16.msra.mxu2 %v3241_v18  ;;  %v1125_v23 = vunpack.c.l.b16 %v1039_v21  ;;  %1951 = vmatpush.bf16.msra.mxu1 %v3233_v48  ;;  %v1249_v44 = vrot.slane %v3178_v15, 1  ;;  %v1134_v52 = vpack.c.b16 %v1126_v46, %v1126_v46  ;;  %v1045_v62 = vld [vmem:[#allocation2 + $0x2c] sm:$0x1]  ;;  %v847_v18 = vrot.slane %v3812_v24, 4  ;;  %v3231_v24 = vld [vmem:[%s4395_s3 + $0x160] sm:$0xff] }
  0x54   : > { %2284 = vmatpush.bf16.msra.mxu3 %v3249_v1  ;;  %v1152_v22 = vsel %vm1140_vm10, %v1147_v4, %v1151_v17  ;;  %2333 = vmatpush.bf16.msra.mxu0 %v3257_v3  ;;  %v1158_v32 = vrot.slane %v1156_v27, 1  ;;  %v949_v47 = vld [vmem:[#allocation2 + $0x38] sm:$0x1]  ;;  %v1252_v4 = vrot.slane %v3751_v26, 1  ;;  %v1127_v6 = vunpack.c.l.b16 %v1045_v62  ;;  %v590_v21 = vld [vmem:[#allocation2 + $0x50] sm:$0x1] }
  0x55   : > { %1527 = vmatmul.bf16.vlgmr.msrb.gmra.mxu1 %v1152_v22  ;;  %v1133_v28 = vpack.c.b16 %v1125_v23, %v1125_v23  ;;  %1576 = vmatmul.bf16.vlgmr.msrb.gmra.mxu2 %v1248_v25  ;;  %v950_v49 = vsel %vm3563_vm2, %v830_v42, %v949_v47  ;;  %v1173_v57 = vshll.u32 %v1134_v52, 16  ;;  %v1253_v5 = vrot.slane %v1134_v52, 1  ;;  %v956_v9 = vld [vmem:[#allocation2 + $0x44] sm:$0x1] }
  0x56   : > { %v1159_v35 = vor.u32 %v1158_v32, %v1154_v30  ;;  %951 = vst [vmem:[#allocation2 + $0x38] sm:$0x1] %v950_v49  ;;  %v957_v12 = vsel %vm3563_vm2, %v847_v18, %v956_v9  ;;  %v1135_v17 = vpack.c.b16 %v1127_v6, %v1127_v6  ;;  %v1178_v22 = vshrl.u32 %v3850_v60, 16  ;;  %v3246_v30 = vld [vmem:[%s4395_s3 + $0x1d8] sm:$0xff]  ;;  %v3229_v6 = vld [vmem:[%s4395_s3 + $0x150] sm:$0xff] }
  0x57   : > { %v1161_v20 = vshll.u32 %v1133_v28, 16  ;;  %v1250_v45 = vrot.slane %v1133_v28, 1  ;;  %2236 = vmatpush.bf16.msra.mxu2 %v3240_v40  ;;  %1952 = vmatpush.bf16.msra.mxu1 %v3232_v8  ;;  %v1175_v61 = vrot.slane %v1173_v57, 1  ;;  %958 = vst [vmem:[#allocation2 + $0x44] sm:$0x1] %v957_v12  ;;  %v1182_v23 = vrot.slane %v1180_v19, 1 }
  0x58   : > { %2285 = vmatpush.bf16.msra.mxu3 %v3248_v41  ;;  %2334 = vmatpush.bf16.msra.mxu0 %v3256_v16  ;;  %v1185_v48 = vshll.u32 %v1135_v17, 16  ;;  %v591_v3 = vsel %vm3800_vm9, 0, %v590_v21  ;;  %v864_v32 = vrot.slane %v3684_v31, 4  ;;  %v3230_v31 = vld [vmem:[%s4395_s3 + $0x158] sm:$0xff]  ;;  %v1190_v46 = vshrl.u32 %v3762_v39, 16  ;;  %v3253_v9 = vld [vmem:[%s4395_s3 + $0x210] sm:$0xff] }
  0x59   : > { %v1163_v36 = vrot.slane %v1161_v20, 1  ;;  %v3959_v10 = vsel %vm1245_vm11, %v1249_v44, %v1250_v45  ;;  %v3975_v1 = vsel %vm1140_vm10, %v1171_v59, %v1175_v61  ;;  %592 = vst [vmem:[#allocation2 + $0x50] sm:$0x1] %v591_v3  ;;  %v1183_v25 = vor.u32 %v1182_v23, %v1178_v22  ;;  %v3254_v41 = vld [vmem:[%s4395_s3 + $0x218] sm:$0xff]  ;;  %v3424_v12 = vld [vmem:[%s4397_s5] ss:$0 sm:$0xff] }
  0x5a   : > { %v1187_v27 = vrot.slane %v1185_v48, 1  ;;  %v1192_v44 = vshll.u32 %v3762_v39, 16  ;;  %v593_v45 = vld [vmem:[#allocation2 + $0x5c] sm:$0x1]  ;;  %v881_v57 = vrot.slane %v3860_v55, 4  ;;  %v1258_v59 = vrot.slane %v3762_v39, 1 }
  0x5b   : > { %v1164_v43 = vsel %vm1140_vm10, %v1159_v35, %v1163_v36  ;;  %2237 = vmatpush.bf16.msra.mxu2 %v3239_v63  ;;  %1953 = vmatpush.bf16.msra.mxu1 %v3231_v24  ;;  %v1256_v35 = vrot.slane %v1135_v17, 1  ;;  %v594_v8 = vsel %vm3800_vm9, 0, %v593_v45  ;;  %v3345_v63 = vld [vmem:[%s3596_s23 + $0x38] sm:$0xff]   ;;  %v1204_v55 = vshll.u32 %v3891_v37, 16  ;;  %v3425_v19 = vld [vmem:[%s4398_s6] ss:$0 sm:$0xff] }
  0x5c   : > { %2286 = vmatpush.bf16.msra.mxu3 %v3247_v0  ;;  %2335 = vmatpush.bf16.msra.mxu0 %v3255_v14  ;;  %v4005_v20 = vsel %vm1140_vm10, %v1183_v25, %v1187_v27  ;;  %v1194_v47 = vrot.slane %v1192_v44, 1  ;;  %595 = vst [vmem:[#allocation2 + $0x5c] sm:$0x1] %v594_v8  ;;  %v3294_v18 = vunpack.c.h.bf16 %v3345_v63  ;;  %v1202_v23 = vshrl.u32 %v3891_v37, 16  ;;  %v596_v27 = vld [vmem:[#allocation2 + $0x68] sm:$0x1] }
  0x5d   : > { %1860 = vmatmul.bf16.vlgmr.msrb.gmra.mxu3 %v3178_v15  ;;  %v3989_v15 = vsel %vm1245_vm11, %v1252_v4, %v1253_v5  ;;  %v1048_v28 = vld [vmem:[#allocation2 + $0x38] sm:$0x1]  ;;  %v4019_v42 = vsel %vm1245_vm11, %v1255_v34, %v1256_v35  ;;  %v3293_v4 = vunpack.c.l.bf16 %v3345_v63  ;;  %v1206_v48 = vrot.slane %v1204_v55, 1  ;;  %v3236_v44 = vld [vmem:[%s4395_s3 + $0x188] sm:$0xff] }
  0x5e   : > { %v1128_v36 = vunpack.c.l.b16 %v1048_v28  ;;  %v1195_v16 = vor.u32 %v1194_v47, %v1190_v46  ;;  %v1051_v54 = vld [vmem:[#allocation2 + $0x44] sm:$0x1]  ;;  %v710_v24 = vmul.f32 %v3424_v12, %v3294_v18  ;;  %v564_v28 = vld [vmem:[#allocation2 + $0x60] sm:$0x1]  ;;  %v3244_v45 = vld [vmem:[%s4395_s3 + $0x1c8] sm:$0xff] }
  0x5f   : > { %2238 = vmatpush.bf16.msra.mxu2 %v3238_v29  ;;  %1954 = vmatpush.bf16.msra.mxu1 %v3230_v31  ;;  %v1129_v33 = vunpack.c.l.b16 %v1051_v54  ;;  %v709_v17 = vmul.f32 %v3424_v12, %v3293_v4  ;;  %v3228_v63 = vld [vmem:[%s4395_s3 + $0x148] sm:$0xff] }
  0x60   : > { %2287 = vmatpush.bf16.msra.mxu3 %v3246_v30  ;;  %v963_v38 = vld [vmem:[#allocation2 + $0x50] sm:$0x1]  ;;  %2336 = vmatpush.bf16.msra.mxu0 %v3254_v41  ;;  %v730_v21 = vadd.f32 %v3425_v19, %v710_v24  ;;  %v597_v30 = vsel %vm3800_vm9, 0, %v596_v27 }
  0x61   : > { %v964_v40 = vsel %vm3563_vm2, %v864_v32, %v963_v38  ;;  %v1137_v5 = vpack.c.b16 %v1129_v33, %v1129_v33  ;;  %v729_v22 = vadd.f32 %v3425_v19, %v709_v17  ;;  %v565_v32 = vsel %vm3563_vm2, 0, %v564_v28  ;;  %598 = vst [vmem:[#allocation2 + $0x68] sm:$0x1] %v597_v30  ;;  %v3251_v30 = vld [vmem:[%s4395_s3 + $0x200] sm:$0xff] }
  0x62   : > { %1909 = vmatmul.bf16.vlgmr.msrb.gmra.mxu0 %v1164_v43  ;;  %965 = vst [vmem:[#allocation2 + $0x50] sm:$0x1] %v964_v40  ;;  %v746_v25 = vmax.f32 %v730_v21, 0.0 }
  0x63   : > { %2239 = vmatpush.bf16.msra.mxu2 %v3237_v50  ;;  %v970_v62 = vld [vmem:[#allocation2 + $0x5c] sm:$0x1]  ;;  %1955 = vmatpush.bf16.msra.mxu1 %v3229_v6  ;;  %v1209_v3 = vshll.u32 %v1137_v5, 16  ;;  %v745_v29 = vmax.f32 %v729_v22, 0.0  ;;  %566 = vst [vmem:[#allocation2 + $0x60] sm:$0x1] %v565_v32 }
  0x64   : > { %2288 = vmatpush.bf16.msra.mxu3 %v3245_v56  ;;  %v971_v0 = vsel %vm3563_vm2, %v881_v57, %v970_v62  ;;  %2337 = vmatpush.bf16.msra.mxu0 %v3253_v9  ;;  %v762_v34 = vpack.c.bf16 %v746_v25, %v746_v25  ;;  %v1262_v54 = vrot.slane %v1137_v5, 1  ;;  %v1216_v6 = vshll.u32 %v3774_v53, 16 }
  0x65   : > { %1532 = vmatmul.bf16.gmra.mxu1 %v1164_v43  ;;  %1581 = vmatmul.bf16.gmra.mxu2 %v3959_v10  ;;  %v1136_v43 = vpack.c.b16 %v1128_v36, %v1128_v36  ;;  %972 = vst [vmem:[#allocation2 + $0x5c] sm:$0x1] %v971_v0  ;;  %v761_v35 = vpack.c.bf16 %v745_v29, %v745_v29  ;;  %v1211_v38 = vrot.slane %v1209_v3, 1  ;;  %v3252_v0 = vld [vmem:[%s4395_s3 + $0x208] sm:$0xff]  ;;  %v1214_v9 = vshrl.u32 %v3774_v53, 16  ;;  %v3227_v29 = vld [vmem:[%s4395_s3 + $0x140] sm:$0xff] }
  0x66   : > { %v1207_v36 = vor.u32 %v1206_v48, %v1202_v23  ;;  %v891_v40 = vshrl.u32 %v762_v34, 16  ;;  %v894_v8 = vshll.u32 %v762_v34, 16  ;;  %v1218_v12 = vrot.slane %v1216_v6, 1  ;;  %v3235_v23 = vld [vmem:[%s4395_s3 + $0x180] sm:$0xff] }
  0x67   : > { %v1197_v49 = vshll.u32 %v1136_v43, 16  ;;  %v1259_v61 = vrot.slane %v1136_v43, 1  ;;  %v883_v31 = vshrl.u32 %v761_v35, 16  ;;  %2240 = vmatpush.bf16.msra.mxu2 %v3236_v44  ;;  %1956 = vmatpush.bf16.msra.mxu1 %v3228_v63  ;;  %v3243_v48 = vld [vmem:[%s4395_s3 + $0x1c0] sm:$0xff]  ;;  %v1264_v25 = vrot.slane %v3774_v53, 1 }
  0x68   : > { %v893_v43 = vrot.slane %v891_v40, 7  ;;  %v4073_v47 = vsel %vm1140_vm10, %v1207_v36, %v1211_v38  ;;  %2289 = vmatpush.bf16.msra.mxu3 %v3244_v45  ;;  %v977_v33 = vld [vmem:[#allocation2 + $0x68] sm:$0x1]  ;;  %2338 = vmatpush.bf16.msra.mxu0 %v3252_v0  ;;  %v1219_v17 = vor.u32 %v1218_v12, %v1214_v9  ;;  %v1228_v34 = vshll.u32 %v3919_v51, 16 }
  0x69   : > { %v1199_v52 = vrot.slane %v1197_v49, 1  ;;  %v4054_v14 = vsel %vm1245_vm11, %v1258_v59, %v1259_v61  ;;  %v1054_v41 = vld [vmem:[#allocation2 + $0x50] sm:$0x1]  ;;  %v885_v46 = vrot.slane %v883_v31, 7  ;;  %v886_v49 = vshll.u32 %v761_v35, 16 }
  0x6a   : > { %v1130_v50 = vunpack.c.l.b16 %v1054_v41  ;;  %v896_v59 = vor.u32 %v894_v8, %v893_v43  ;;  %v973_v61 = vld [vmem:[#allocation2 + $0x60] sm:$0xf]  ;;  %v1226_v38 = vshrl.u32 %v3919_v51, 16  ;;  %v1230_v40 = vrot.slane %v1228_v34, 1 }
  0x6b   : > { %v4035_v58 = vsel %vm1140_vm10, %v1195_v16, %v1199_v52  ;;  %v898_v16 = vrot.slane %v893_v43, 4  ;;  %v1261_v52 = vrot.slane %v3891_v37, 1  ;;  %v889_v56 = vrot.slane %v885_v46, 4  ;;  %2241 = vmatpush.bf16.msra.mxu2 %v3235_v23  ;;  %1957 = vmatpush.bf16.msra.mxu1 %v3227_v29 }
  0x6c   : > { %v888_v57 = vor.u32 %v886_v49, %v885_v46  ;;  %v1138_v55 = vpack.c.b16 %v1130_v50, %v1130_v50  ;;  %v1057_v21 = vld [vmem:[#allocation2 + $0x5c] sm:$0x1]  ;;  %2290 = vmatpush.bf16.msra.mxu3 %v3243_v48  ;;  %2339 = vmatpush.bf16.msra.mxu0 %v3251_v30  ;;  %v1231_v43 = vor.u32 %v1230_v40, %v1226_v38 }
  0x6d   : > { %1865 = vmatmul.bf16.gmra.mxu3 %v3751_v26  ;;  %v978_v62 = vsel %vm3563_vm2, %v898_v16, %v977_v33  ;;  %v897_v18 = vsel %vm3666_vm7, %v889_v56, %v896_v59  ;;  %v4091_v5 = vsel %vm1245_vm11, %v1261_v52, %v1262_v54  ;;  %v1131_v28 = vunpack.c.l.b16 %v1057_v21 }
  0x6e   : > { %979 = vst [vmem:[#allocation2 + $0x68] sm:$0x1] %v978_v62  ;;  %v974_v4 = vsel %vm3658_vm6, %v888_v57, %v973_v61  ;;  %v1221_v24 = vshll.u32 %v1138_v55, 16  ;;  %v1265_v27 = vrot.slane %v1138_v55, 1  ;;  %v1267_v52 = vrot.slane %v3919_v51, 1 }
  0x6f   : > { %975 = vst [vmem:[#allocation2 + $0x60] sm:$0xf] %v974_v4 }
  0x70   : > { %976 = vst [vmem:[#allocation2 + $0x64] sm:$0xf] %v897_v18  ;;  %v1223_v19 = vrot.slane %v1221_v24, 1  ;;  %v4118_v32 = vsel %vm1245_vm11, %v1264_v25, %v1265_v27 }
  0x72   : > { %1914 = vmatmul.bf16.gmra.mxu0 %v3975_v1  ;;  %v4106_v3 = vsel %vm1140_vm10, %v1219_v17, %v1223_v19 }
  0x75   : > { %1537 = vmatmul.bf16.gmra.mxu1 %v3975_v1  ;;  %1586 = vmatmul.bf16.gmra.mxu2 %v3989_v15  ;;  %v1060_v45 = vld [vmem:[#allocation2 + $0x68] sm:$0x1] }
  0x76   : > { %v1640_v56 = vunpack.c.l.b16 %v1060_v45 }
  0x77   : > { %v4138_v50 = vld [vmem:[#allocation2 + $0x60] sm:$0xff] }
  0x78   : > { %v4145_v57 = vpack.c.b16 %v1640_v56, %v1640_v56  ;;  %v1645_v59 = vshll.u32 %v4138_v50, 16  ;;  %v1643_v0 = vshrl.u32 %v4138_v50, 16 }
  0x7a   : > { %v1647_v18 = vrot.slane %v1645_v59, 1  ;;  %v1650_v4 = vshll.u32 %v4145_v57, 16 }
  0x7c   : > { %v1648_v6 = vor.u32 %v1647_v18, %v1643_v0  ;;  %v1652_v9 = vrot.slane %v1650_v4, 1 }
  0x7d   : > { %1870 = vmatmul.bf16.gmra.mxu3 %v3850_v60 }
  0x7e   : > { %v4159_v24 = vsel %vm1140_vm10, %v1648_v6, %v1652_v9 }
  0x82   : > { %1919 = vmatmul.bf16.gmra.mxu0 %v4005_v20 }
  0x85   : > { %1542 = vmatmul.bf16.gmra.mxu1 %v4005_v20  ;;  %1591 = vmatmul.bf16.gmra.mxu2 %v4019_v42 }
  0x8d   : > { %1875 = vmatmul.bf16.gmra.mxu3 %v3762_v39 }
  0x92   : > { %1924 = vmatmul.bf16.gmra.mxu0 %v4035_v58 }
  0x95   : > { %1547 = vmatmul.bf16.gmra.mxu1 %v4035_v58  ;;  %1596 = vmatmul.bf16.gmra.mxu2 %v4054_v14 }
  0x9d   : > { %1880 = vmatmul.bf16.gmra.mxu3 %v3891_v37 }
  0xa2   : > { %1929 = vmatmul.bf16.gmra.mxu0 %v4073_v47 }
  0xa5   : > { %1552 = vmatmul.bf16.gmra.mxu1 %v4073_v47  ;;  %1601 = vmatmul.bf16.gmra.mxu2 %v4091_v5 }
  0xad   : > { %1885 = vmatmul.bf16.gmra.mxu3 %v3774_v53  ;;  %v1139_v53 = vpack.c.b16 %v1131_v28, %v1131_v28 }
  0xae   : > { %v4097_v22 = vpop.f32.mrf.mxu1 }
  0xaf   : > { %v1233_v31 = vshll.u32 %v1139_v53, 16  ;;  %v1268_v54 = vrot.slane %v1139_v53, 1 }
  0xb1   : > { %v1235_v44 = vrot.slane %v1233_v31, 1  ;;  %v4143_v33 = vsel %vm1245_vm11, %v1267_v52, %v1268_v54 }
  0xb2   : > { %1934 = vmatmul.bf16.gmra.mxu0 %v4106_v3 }
  0xb3   : > { %v4133_v8 = vsel %vm1140_vm10, %v1231_v43, %v1235_v44 }
  0xb5   : > { %1557 = vmatmul.bf16.gmra.mxu1 %v4106_v3  ;;  %v4121_v35 = vpop.f32.mrf.mxu2  ;;  %1606 = vmatmul.bf16.gmra.mxu2 %v4118_v32 }
  0xb6   : > { %v4123_v36 = vpop.f32.mrf.mxu1 }
  0xb8   : > { %v4127_v41 = vpop.f32.mrf.mxu3 }
  0xbd   : > { %1890 = vmatmul.bf16.gmra.mxu3 %v3919_v51  ;;  %v4135_v16 = vpop.f32.mrf.mxu2 }
  0xbe   : > { %v4130_v46 = vpop.f32.mrf.mxu1 }
  0xbf   : > { %v1479_v49 = vpop.f32.mrf.mxu0 }
  0xc0   : > { %v4148_v61 = vpop.f32.mrf.mxu3 }
  0xc2   : > { %1939 = vmatmul.bf16.gmra.mxu0 %v4133_v8 }
  0xc5   : > { %1562 = vmatmul.bf16.gmra.mxu1 %v4133_v8  ;;  %1611 = vmatmul.bf16.gmra.mxu2 %v4143_v33 }
  0xc6   : > { %v4151_v63 = vpop.f32.mrf.mxu1 }
  0xc7   : > { %v1481_v62 = vpop.f32.mrf.mxu0 }
  0xc8   : > { %v4155_v55 = vpop.f32.mrf.mxu2 }
  0xcd   : > { %1895 = vmatmul.bf16.gmra.mxu3 %v4138_v50 }
  0xcf   : > { %v1484_v12 = vpop.f32.mrf.mxu0 }
  0xd0   : > { %v4161_v17 = vpop.f32.mrf.mxu3  ;;  %v4163_v21 = vpop.f32.mrf.mxu2 }
  0xd2   : > { %v1528_v19 = vpop.f32.mrf.mxu1  ;;  %1944 = vmatmul.bf16.gmra.mxu0 %v4159_v24 }
  0xd3   : > { %v1529_v23 = vadd.f32 %v1528_v19, %v1479_v49 }
  0xd5   : > { %1958 = vmatmul.bf16.vlgmr.msra.gmra.mxu1 %v3959_v10  ;;  %2242 = vmatmul.bf16.vlgmr.msra.gmra.mxu2 %v3751_v26 }
  0xd7   : > { %v1486_v48 = vpop.f32.mrf.mxu0 }
  0xd8   : > { %v4168_v25 = vpop.f32.mrf.mxu3  ;;  %v1577_v28 = vpop.f32.mrf.mxu2 }
  0xd9   : > { %v4170_v30 = vadd.f32 %v1577_v28, %v1529_v23 }
  0xda   : > { %v1530_v27 = vpop.f32.mrf.mxu1 }
  0xdb   : > { %v1531_v29 = vadd.f32 %v1530_v27, %v1481_v62 }
  0xdd   : > { %2291 = vmatmul.bf16.vlgmr.msra.gmra.mxu3 %v3975_v1 }
  0xdf   : > { %v1910_v53 = vpop.f32.mrf.mxu0 }
  0xe0   : > { %v1861_v34 = vpop.f32.mrf.mxu3  ;;  %v1579_v31 = vpop.f32.mrf.mxu2 }
  0xe1   : > { %v4173_v40 = vadd.f32 %v1910_v53, %v1861_v34  ;;  %v4176_v26 = vadd.f32 %v1579_v31, %v1531_v29 }
  0xe2   : > { %v1533_v38 = vpop.f32.mrf.mxu1  ;;  %2340 = vmatmul.bf16.vlgmr.msra.gmra.mxu0 %v3989_v15 }
  0xe3   : > { %v1534_v10 = vadd.f32 %v1533_v38, %v1484_v12 }
  0xe5   : > { %1963 = vmatmul.bf16.gmra.mxu1 %v3989_v15  ;;  %2247 = vmatmul.bf16.gmra.mxu2 %v3850_v60 }
  0xe7   : > { %v1912_v43 = vpop.f32.mrf.mxu0 }
  0xe8   : > { %v1863_v44 = vpop.f32.mrf.mxu3  ;;  %v1582_v49 = vpop.f32.mrf.mxu2 }
  0xe9   : > { %v4180_v1 = vadd.f32 %v1912_v43, %v1863_v44  ;;  %v4182_v54 = vadd.f32 %v1582_v49, %v1534_v10 }
  0xea   : > { %v1535_v45 = vpop.f32.mrf.mxu1 }
  0xeb   : > { %v1536_v52 = vadd.f32 %v1535_v45, %v1486_v48  ;;  %v3423_v45 = vld [vmem:[%s4398_s6] ss:$0 sm:$0xff] }
  0xed   : > { %2296 = vmatmul.bf16.gmra.mxu3 %v4005_v20 }
  0xef   : > { %v1915_v56 = vpop.f32.mrf.mxu0 }
  0xf0   : > { %v1866_v59 = vpop.f32.mrf.mxu3  ;;  %v1584_v15 = vpop.f32.mrf.mxu2 }
  0xf1   : > { %v4186_v0 = vadd.f32 %v1915_v56, %v1866_v59  ;;  %v4190_v18 = vadd.f32 %v1584_v15, %v1536_v52 }
  0xf2   : > { %v1538_v62 = vpop.f32.mrf.mxu1  ;;  %2345 = vmatmul.bf16.gmra.mxu0 %v4019_v42 }
  0xf3   : > { %v1539_v60 = vadd.f32 %v1538_v62, %v4097_v22 }
  0xf5   : > { %1968 = vmatmul.bf16.gmra.mxu1 %v4019_v42  ;;  %2252 = vmatmul.bf16.gmra.mxu2 %v3762_v39 }
  0xf7   : > { %v1917_v20 = vpop.f32.mrf.mxu0 }
  0xf8   : > { %v1868_v4 = vpop.f32.mrf.mxu3  ;;  %v1587_v12 = vpop.f32.mrf.mxu2 }
  0xf9   : > { %v4194_v9 = vadd.f32 %v1917_v20, %v1868_v4  ;;  %v4197_v22 = vadd.f32 %v1587_v12, %v1539_v60  ;;  %v1000_v4 = vstv %s999_s17  ;;  %v599_v12 = vld [vmem:[#allocation2 + $0x74] sm:$0x1] }
  0xfa   : > { %v1540_v6 = vpop.f32.mrf.mxu1  ;;  %vm1001_vm12 = vcmp.eq.s32.totalorder %v1000_v4, 1 }
  0xfb   : > { %v1541_v19 = vadd.f32 %v1540_v6, %v4123_v36 }
  0xfd   : > { %2301 = vmatmul.bf16.gmra.mxu3 %v4035_v58 }
  0xff   : > { %v1920_v23 = vpop.f32.mrf.mxu0 }
 0x100   : > { %v1871_v42 = vpop.f32.mrf.mxu3  ;;  %v1589_v27 = vpop.f32.mrf.mxu2 }
 0x101   : > { %v4200_v39 = vadd.f32 %v1920_v23, %v1871_v42  ;;  %v4205_v29 = vadd.f32 %v1589_v27, %v1541_v19  ;;  %v567_v19 = vld [vmem:[#allocation2 + $0x6c] sm:$0x1]  ;;  %v600_v42 = vsel %vm3800_vm9, 0, %v599_v12 }
 0x102   : > { %v1543_v48 = vpop.f32.mrf.mxu1  ;;  %2350 = vmatmul.bf16.gmra.mxu0 %v4054_v14  ;;  %601 = vst [vmem:[#allocation2 + $0x74] sm:$0x1] %v600_v42 }
 0x103   : > { %v1544_v28 = vadd.f32 %v1543_v48, %v4130_v46  ;;  %v568_v48 = vsel %vm3563_vm2, 0, %v567_v19 }
 0x104   : > { %569 = vst [vmem:[#allocation2 + $0x6c] sm:$0x1] %v568_v48 }
 0x105   : > { %1973 = vmatmul.bf16.gmra.mxu1 %v4054_v14  ;;  %2257 = vmatmul.bf16.gmra.mxu2 %v3891_v37  ;;  %v3296_v14 = vld [vmem:[%s507_s27] sm:$0xff]   ;;  %s4321_s27 = scalar_lea.vmem %s4399_s7, %s2740_s25 }
 0x106   : > { %v3298_v10 = vunpack.c.h.bf16 %v3296_v14  ;;  %v3422_v37 = vld [vmem:[%s4397_s5] ss:$0 sm:$0xff]  ;;  %v3297_v43 = vunpack.c.l.bf16 %v3296_v14 }
 0x107   : > { %v1922_v58 = vpop.f32.mrf.mxu0 }
 0x108   : > { %v1873_v36 = vpop.f32.mrf.mxu3  ;;  %v1592_v46 = vpop.f32.mrf.mxu2  ;;  %v990_v44 = vmul.f32 %v3422_v37, %v3298_v10 }
 0x109   : > { %v4212_v34 = vadd.f32 %v1922_v58, %v1873_v36  ;;  %v4216_v31 = vadd.f32 %v1592_v46, %v1544_v28  ;;  %v3426_v36 = vld [vmem:[#allocation2 + $0x48] sm:$0xff] }
 0x10a   : > { %v1545_v53 = vpop.f32.mrf.mxu1  ;;  %v996_v52 = vadd.f32 %v3423_v45, %v990_v44 }
 0x10b   : > { %v1546_v38 = vadd.f32 %v1545_v53, %v4151_v63  ;;  %v989_v63 = vmul.f32 %v3422_v37, %v3297_v43  ;;  %v1027_v4 = vld [vmem:[#allocation2 + $0x6c] sm:$0xf] }
 0x10c   : > { %v998_v20 = vmax.f32 %v996_v52, 0.0 }
 0x10d   : > { %2306 = vmatmul.bf16.gmra.mxu3 %v4073_v47  ;;  %v995_v62 = vadd.f32 %v3423_v45, %v989_v63 }
 0x10e   : > { %v1003_v23 = vsel %vm1001_vm12, %v998_v20, 0.0 }
 0x10f   : > { %v1925_v49 = vpop.f32.mrf.mxu0  ;;  %v997_v6 = vmax.f32 %v995_v62, 0.0  ;;  %v1005_v28 = vpack.c.bf16 %v1003_v23, %v1003_v23 }
 0x110   : > { %v1876_v56 = vpop.f32.mrf.mxu3  ;;  %v1594_v60 = vpop.f32.mrf.mxu2 }
 0x111   : > { %v4227_v15 = vadd.f32 %v1925_v49, %v1876_v56  ;;  %v4230_v47 = vadd.f32 %v1594_v60, %v1546_v38  ;;  %v1002_v27 = vsel %vm1001_vm12, %v997_v6, 0.0  ;;  %v1015_v53 = vshrl.u32 %v1005_v28, 16  ;;  %v1031_v60 = vld [vmem:[#allocation2 + $0x74] sm:$0x1] }
 0x112   : > { %v1548_v59 = vpop.f32.mrf.mxu1  ;;  %2355 = vmatmul.bf16.gmra.mxu0 %v4091_v5  ;;  %v1004_v58 = vpack.c.bf16 %v1002_v27, %v1002_v27  ;;  %v1018_v49 = vshll.u32 %v1005_v28, 16 }
 0x113   : > { %v1017_v37 = vrot.slane %v1015_v53, 7 }
 0x114   : > { %v1007_v38 = vshrl.u32 %v1004_v58, 16  ;;  %v1010_v45 = vshll.u32 %v1004_v58, 16 }
 0x115   : > { %1978 = vmatmul.bf16.gmra.mxu1 %v4091_v5  ;;  %2262 = vmatmul.bf16.gmra.mxu2 %v3426_v36  ;;  %v1549_v5 = vadd.f32 %v1548_v59, %v4121_v35  ;;  %v1022_v52 = vrot.slane %v1017_v37, 4  ;;  %v1020_v20 = vor.u32 %v1018_v49, %v1017_v37 }
 0x116   : > { %v1009_v44 = vrot.slane %v1007_v38, 7 }
 0x117   : > { %v1927_v46 = vpop.f32.mrf.mxu0  ;;  %v1032_v6 = vsel %vm3563_vm2, %v1022_v52, %v1031_v60 }
 0x118   : > { %v1878_v14 = vpop.f32.mrf.mxu3  ;;  %v1597_v43 = vpop.f32.mrf.mxu2  ;;  %v1012_v56 = vor.u32 %v1010_v45, %v1009_v44  ;;  %v1013_v62 = vrot.slane %v1009_v44, 4  ;;  %1033 = vst [vmem:[#allocation2 + $0x74] sm:$0x1] %v1032_v6 }
 0x119   : > { %v4238_v11 = vadd.f32 %v1927_v46, %v1878_v14  ;;  %v4240_v63 = vadd.f32 %v1597_v43, %v1549_v5 }
 0x11a   : > { %v1550_v10 = vpop.f32.mrf.mxu1  ;;  %v1028_v35 = vsel %vm3658_vm6, %v1012_v56, %v1027_v4  ;;  %v1021_v59 = vsel %vm3666_vm7, %v1013_v62, %v1020_v20  ;;  %v1655_v56 = vrot.slane %v4138_v50, 1  ;;  %v1656_v62 = vrot.slane %v4145_v57, 1 }
 0x11b   : > { %1029 = vst [vmem:[#allocation2 + $0x6c] sm:$0xf] %v1028_v35  ;;  %v1551_v23 = vadd.f32 %v1550_v10, %v4135_v16 }
 0x11c   : > { %1030 = vst [vmem:[#allocation2 + $0x70] sm:$0xf] %v1021_v59  ;;  %v1657_v4 = vsel %vm1245_vm11, %v1655_v56, %v1656_v62 }
 0x11d   : > { %2311 = vmatmul.bf16.gmra.mxu3 %v4106_v3 }
 0x11f   : > { %v1930_v12 = vpop.f32.mrf.mxu0  ;;  %v1063_v10 = vld [vmem:[#allocation2 + $0x74] sm:$0x1] }
 0x120   : > { %v1881_v19 = vpop.f32.mrf.mxu3  ;;  %v1599_v2 = vpop.f32.mrf.mxu2  ;;  %v2022_v52 = vunpack.c.l.b16 %v1063_v10 }
 0x121   : > { %v4250_v48 = vadd.f32 %v1930_v12, %v1881_v19  ;;  %v4253_v3 = vadd.f32 %v1599_v2, %v1551_v23 }
 0x122   : > { %v1553_v42 = vpop.f32.mrf.mxu1  ;;  %2360 = vmatmul.bf16.gmra.mxu0 %v4118_v32 }
 0x123   : > { %v1554_v27 = vadd.f32 %v1553_v42, %v4155_v55  ;;  %v3186_v49 = vld [vmem:[#allocation2 + $0x6c] sm:$0xff] }
 0x124   : > { %v2027_v60 = vshll.u32 %v3186_v49, 16 }
 0x125   : > { %1983 = vmatmul.bf16.gmra.mxu1 %v4118_v32  ;;  %2267 = vmatmul.bf16.gmra.mxu2 %v3919_v51 }
 0x126   : > { %v2029_v23 = vrot.slane %v2027_v60, 1 }
 0x127   : > { %v1932_v7 = vpop.f32.mrf.mxu0 }
 0x128   : > { %v1883_v13 = vpop.f32.mrf.mxu3  ;;  %v1602_v16 = vpop.f32.mrf.mxu2 }
 0x129   : > { %v4258_v58 = vadd.f32 %v1932_v7, %v1883_v13  ;;  %v4260_v36 = vadd.f32 %v1602_v16, %v1554_v27 }
 0x12a   : > { %v1555_v28 = vpop.f32.mrf.mxu1 }
 0x12b   : > { %v1556_v38 = vadd.f32 %v1555_v28, %v4163_v21 }
 0x12d   : > { %2316 = vmatmul.bf16.gmra.mxu3 %v4133_v8 }
 0x12f   : > { %v1935_v53 = vpop.f32.mrf.mxu0 }
 0x130   : > { %v1886_v46 = vpop.f32.mrf.mxu3  ;;  %v1604_v51 = vpop.f32.mrf.mxu2 }
 0x131   : > { %v4264_v32 = vadd.f32 %v1935_v53, %v1886_v46  ;;  %v4267_v5 = vadd.f32 %v1604_v51, %v1556_v38  ;;  %v2037_v46 = vrot.slane %v3186_v49, 1 }
 0x132   : > { %v1558_v14 = vpop.f32.mrf.mxu1  ;;  %2365 = vmatmul.bf16.gmra.mxu0 %v4143_v33 }
 0x133   : > { %v1559_v8 = vadd.f32 %v1558_v14, %v4127_v41  ;;  %v4294_v14 = vld [vmem:[%s4396_s4] ss:$0 sm:$0xff] }
 0x135   : > { %1988 = vmatmul.bf16.gmra.mxu1 %v4143_v33  ;;  %2272 = vmatmul.bf16.gmra.mxu2 %v4138_v50  ;;  %v2023_v33 = vpack.c.b16 %v2022_v52, %v2022_v52  ;;  %v2025_v50 = vshrl.u32 %v3186_v49, 16 }
 0x137   : > { %v1937_v55 = vpop.f32.mrf.mxu0  ;;  %v2032_v57 = vshll.u32 %v2023_v33, 16  ;;  %v2038_v38 = vrot.slane %v2023_v33, 1 }
 0x138   : > { %v1888_v37 = vpop.f32.mrf.mxu3  ;;  %v1607_v21 = vpop.f32.mrf.mxu2 }
 0x139   : > { %v4272_v44 = vadd.f32 %v1937_v55, %v1888_v37  ;;  %v4274_v45 = vadd.f32 %v1607_v21, %v1559_v8  ;;  %v2034_v42 = vrot.slane %v2032_v57, 1  ;;  %v2039_v55 = vsel %vm1245_vm11, %v2037_v46, %v2038_v38 }
 0x13a   : > { %v1560_v43 = vpop.f32.mrf.mxu1  ;;  %v1617_v8 = vadd.f32 %v4294_v14, %v4170_v30 }
 0x13b   : > { %v1561_v6 = vadd.f32 %v1560_v43, %v4148_v61 }
 0x13d   : > { %2321 = vmatmul.bf16.gmra.mxu3 %v4159_v24  ;;  %v2030_v24 = vor.u32 %v2029_v23, %v2025_v50 }
 0x13f   : > { %v1940_v20 = vpop.f32.mrf.mxu0  ;;  %v2035_v16 = vsel %vm1140_vm10, %v2030_v24, %v2034_v42 }
 0x140   : > { %v1891_v41 = vpop.f32.mrf.mxu3  ;;  %v1609_v12 = vpop.f32.mrf.mxu2 }
 0x141   : > { %v4281_v59 = vadd.f32 %v1940_v20, %v1891_v41  ;;  %v4283_v19 = vadd.f32 %v1609_v12, %v1561_v6  ;;  %v1619_v12 = vadd.f32 %v4294_v14, %v4182_v54 }
 0x142   : > { %v1563_v35 = vpop.f32.mrf.mxu1  ;;  %2370 = vmatmul.bf16.gmra.mxu0 %v1657_v4 }
 0x143   : > { %v1564_v13 = vadd.f32 %v1563_v35, %v4161_v17 }
 0x145   : > { %1993 = vmatmul.bf16.gmra.mxu1 %v1657_v4  ;;  %2277 = vmatmul.bf16.gmra.mxu2 %v3186_v49 }
 0x147   : > { %v1942_v2 = vpop.f32.mrf.mxu0 }
 0x148   : > { %v1893_v7 = vpop.f32.mrf.mxu3  ;;  %v1612_v28 = vpop.f32.mrf.mxu2 }
 0x149   : > { %v4286_v61 = vadd.f32 %v1942_v2, %v1893_v7  ;;  %v4289_v53 = vadd.f32 %v1612_v28, %v1564_v13  ;;  %v1620_v7 = vadd.f32 %v4294_v14, %v4190_v18 }
 0x14a   : > { %v1565_v27 = vpop.f32.mrf.mxu1 }
 0x14b   : > { %v1566_v10 = vadd.f32 %v1565_v27, %v4168_v25  ;;  %v1618_v25 = vadd.f32 %v4294_v14, %v4176_v26 }
 0x14d   : > { %2326 = vmatmul.bf16.gmra.mxu3 %v2035_v16 }
 0x14f   : > { %v1945_v51 = vpop.f32.mrf.mxu0 }
 0x150   : > { %v1896_v17 = vpop.f32.mrf.mxu3  ;;  %v1614_v21 = vpop.f32.mrf.mxu2 }
 0x151   : > { %v4300_v43 = vadd.f32 %v1945_v51, %v1896_v17  ;;  %v4303_v52 = vadd.f32 %v1614_v21, %v1566_v10 }
 0x152   : > { %v1959_v37 = vpop.f32.mrf.mxu1  ;;  %2375 = vmatmul.bf16.gmra.mxu0 %v2039_v55 }
 0x153   : > { %v1960_v49 = vadd.f32 %v1959_v37, %v4173_v40 }
 0x155   : > { %v1999_v56 = vadd.f32 %v1960_v49, %v1617_v8 }
 0x157   : > { %v1947_v62 = vpop.f32.mrf.mxu0 }
 0x158   : > { %v1898_v33 = vpop.f32.mrf.mxu3  ;;  %v2243_v4 = vpop.f32.mrf.mxu2 }
 0x159   : > { %v4307_v20 = vadd.f32 %v1947_v62, %v1898_v33 }
 0x15a   : > { %v1961_v60 = vpop.f32.mrf.mxu1 }
 0x15b   : > { %v1962_v30 = vadd.f32 %v1961_v60, %v4180_v1 }
 0x15d   : > { %v2000_v41 = vadd.f32 %v1962_v30, %v1618_v25 }
 0x15f   : > { %v2341_v6 = vpop.f32.mrf.mxu0 }
 0x160   : > { %v2292_v40 = vpop.f32.mrf.mxu3  ;;  %v2245_v50 = vpop.f32.mrf.mxu2 }
 0x161   : > { %v2293_v57 = vadd.f32 %v2292_v40, %v2243_v4  ;;  %v1622_v40 = vadd.f32 %v4294_v14, %v4205_v29 }
 0x162   : > { %v1964_v35 = vpop.f32.mrf.mxu1 }
 0x163   : > { %v1965_v23 = vadd.f32 %v1964_v35, %v4186_v0  ;;  %v2342_v24 = vadd.f32 %v2341_v6, %v2293_v57 }
 0x165   : > { %v2001_v26 = vadd.f32 %v1965_v23, %v1619_v12  ;;  %v2381_v16 = vadd.f32 %v2342_v24, %v1999_v56 }
 0x167   : > { %v2343_v42 = vpop.f32.mrf.mxu0  ;;  %v2419_v38 = vmul.f32 %v2381_v16, %v2381_v16 }
 0x168   : > { %v2294_v2 = vpop.f32.mrf.mxu3  ;;  %v2248_v27 = vpop.f32.mrf.mxu2 }
 0x169   : > { %v2295_v13 = vadd.f32 %v2294_v2, %v2245_v50 }
 0x16a   : > { %v1966_v1 = vpop.f32.mrf.mxu1 }
 0x16b   : > { %v1967_v28 = vadd.f32 %v1966_v1, %v4194_v9  ;;  %v2344_v54 = vadd.f32 %v2343_v42, %v2295_v13  ;;  %v1621_v9 = vadd.f32 %v4294_v14, %v4197_v22  ;;  %v1623_v13 = vadd.f32 %v4294_v14, %v4216_v31 }
 0x16d   : > { %v2002_v46 = vadd.f32 %v1967_v28, %v1620_v7  ;;  %v2382_v0 = vadd.f32 %v2344_v54, %v2000_v41 }
 0x16f   : > { %v2397_v51 = vadd.f32 %v2382_v0, %v2381_v16  ;;  %v2420_v55 = vmul.f32 %v2382_v0, %v2382_v0  ;;  %v3302_v17 = vpack.c.bf16 %v2382_v0, %v2381_v16  ;;  %v2346_v18 = vpop.f32.mrf.mxu0 }
 0x170   : > { %v2297_v10 = vpop.f32.mrf.mxu3  ;;  %v2250_v49 = vpop.f32.mrf.mxu2 }
 0x171   : > { %v2435_v8 = vadd.f32 %v2420_v55, %v2419_v38  ;;  %3303 = vst [vmem:[%s4321_s27] sm:$0xff] %v3302_v17   ;;  %v2298_v21 = vadd.f32 %v2297_v10, %v2248_v27 }
 0x172   : > { %v1969_v37 = vpop.f32.mrf.mxu1 }
 0x173   : > { %v1970_v56 = vadd.f32 %v1969_v37, %v4200_v39  ;;  %v2347_v62 = vadd.f32 %v2346_v18, %v2298_v21  ;;  %v1624_v18 = vadd.f32 %v4294_v14, %v4230_v47 }
 0x175   : > { %v2003_v33 = vadd.f32 %v1970_v56, %v1621_v9  ;;  %v2383_v60 = vadd.f32 %v2347_v62, %v2001_v26 }
 0x177   : > { %v2398_v25 = vadd.f32 %v2397_v51, %v2383_v60  ;;  %v2421_v4 = vmul.f32 %v2383_v60, %v2383_v60  ;;  %v2348_v30 = vpop.f32.mrf.mxu0 }
 0x178   : > { %v2299_v41 = vpop.f32.mrf.mxu3  ;;  %v2253_v12 = vpop.f32.mrf.mxu2 }
 0x179   : > { %v2436_v35 = vadd.f32 %v2435_v8, %v2421_v4  ;;  %v2300_v22 = vadd.f32 %v2299_v41, %v2250_v49  ;;  %v1625_v4 = vadd.f32 %v4294_v14, %v4240_v63 }
 0x17a   : > { %v1971_v6 = vpop.f32.mrf.mxu1 }
 0x17b   : > { %v1972_v50 = vadd.f32 %v1971_v6, %v4212_v34  ;;  %v2349_v23 = vadd.f32 %v2348_v30, %v2300_v22 }
 0x17d   : > { %v2004_v57 = vadd.f32 %v1972_v50, %v1622_v40  ;;  %v2384_v39 = vadd.f32 %v2349_v23, %v2002_v46 }
 0x17f   : > { %v2399_v24 = vadd.f32 %v2398_v25, %v2384_v39  ;;  %v2422_v42 = vmul.f32 %v2384_v39, %v2384_v39  ;;  %v3307_v26 = vpack.c.bf16 %v2384_v39, %v2383_v60  ;;  %v2351_v2 = vpop.f32.mrf.mxu0  ;;  %v1626_v39 = vadd.f32 %v4294_v14, %v4253_v3 }
 0x180   : > { %v2302_v1 = vpop.f32.mrf.mxu3  ;;  %v2255_v28 = vpop.f32.mrf.mxu2 }
 0x181   : > { %v2437_v27 = vadd.f32 %v2436_v35, %v2422_v42  ;;  %3346 = vst [vmem:[%s4321_s27 + $0x8] sm:$0xff] %v3307_v26   ;;  %v2303_v29 = vadd.f32 %v2302_v1, %v2253_v12 }
 0x182   : > { %v1974_v7 = vpop.f32.mrf.mxu1 }
 0x183   : > { %v1975_v16 = vadd.f32 %v1974_v7, %v4227_v15  ;;  %v2352_v54 = vadd.f32 %v2351_v2, %v2303_v29 }
 0x185   : > { %v2005_v34 = vadd.f32 %v1975_v16, %v1623_v13  ;;  %v2385_v0 = vadd.f32 %v2352_v54, %v2003_v33  ;;  %v1627_v54 = vadd.f32 %v4294_v14, %v4260_v36 }
 0x187   : > { %v2400_v38 = vadd.f32 %v2399_v24, %v2385_v0  ;;  %v2423_v46 = vmul.f32 %v2385_v0, %v2385_v0  ;;  %v2353_v51 = vpop.f32.mrf.mxu0 }
 0x188   : > { %v2304_v55 = vpop.f32.mrf.mxu3  ;;  %v2258_v37 = vpop.f32.mrf.mxu2 }
 0x189   : > { %v2438_v10 = vadd.f32 %v2437_v27, %v2423_v46  ;;  %v2305_v31 = vadd.f32 %v2304_v55, %v2255_v28 }
 0x18a   : > { %v1976_v17 = vpop.f32.mrf.mxu1 }
 0x18b   : > { %v1977_v9 = vadd.f32 %v1976_v17, %v4238_v11  ;;  %v2354_v8 = vadd.f32 %v2353_v51, %v2305_v31 }
 0x18d   : > { %v2006_v21 = vadd.f32 %v1977_v9, %v1624_v18  ;;  %v2386_v15 = vadd.f32 %v2354_v8, %v2004_v57 }
 0x18f   : > { %v2401_v49 = vadd.f32 %v2400_v38, %v2386_v15  ;;  %v2424_v56 = vmul.f32 %v2386_v15, %v2386_v15  ;;  %v3312_v62 = vpack.c.bf16 %v2386_v15, %v2385_v0  ;;  %v2356_v33 = vpop.f32.mrf.mxu0 }
 0x190   : > { %v2307_v60 = vpop.f32.mrf.mxu3  ;;  %v2260_v41 = vpop.f32.mrf.mxu2 }
 0x191   : > { %v2439_v30 = vadd.f32 %v2438_v10, %v2424_v56  ;;  %3347 = vst [vmem:[%s4321_s27 + $0x10] sm:$0xff] %v3312_v62   ;;  %v2308_v47 = vadd.f32 %v2307_v60, %v2258_v37  ;;  %v1628_v37 = vadd.f32 %v4294_v14, %v4267_v5 }
 0x192   : > { %v1979_v25 = vpop.f32.mrf.mxu1 }
 0x193   : > { %v1980_v6 = vadd.f32 %v1979_v25, %v4250_v48  ;;  %v2357_v40 = vadd.f32 %v2356_v33, %v2308_v47 }
 0x195   : > { %v2007_v11 = vadd.f32 %v1980_v6, %v1625_v4  ;;  %v2387_v35 = vadd.f32 %v2357_v40, %v2005_v34 }
 0x197   : > { %v2402_v22 = vadd.f32 %v2401_v49, %v2387_v35  ;;  %v2425_v12 = vmul.f32 %v2387_v35, %v2387_v35  ;;  %v2358_v50 = vpop.f32.mrf.mxu0 }
 0x198   : > { %v2309_v23 = vpop.f32.mrf.mxu3  ;;  %v2263_v42 = vpop.f32.mrf.mxu2 }
 0x199   : > { %v2440_v24 = vadd.f32 %v2439_v30, %v2425_v12  ;;  %v2310_v63 = vadd.f32 %v2309_v23, %v2260_v41  ;;  %v1629_v30 = vadd.f32 %v4294_v14, %v4274_v45 }
 0x19a   : > { %v1981_v57 = vpop.f32.mrf.mxu1 }
 0x19b   : > { %v1982_v26 = vadd.f32 %v1981_v57, %v4258_v58  ;;  %v2359_v2 = vadd.f32 %v2358_v50, %v2310_v63  ;;  %v1630_v57 = vadd.f32 %v4294_v14, %v4283_v19 }
 0x19d   : > { %v2008_v1 = vadd.f32 %v1982_v26, %v1626_v39  ;;  %v2388_v48 = vadd.f32 %v2359_v2, %v2006_v21 }
 0x19f   : > { %v2403_v7 = vadd.f32 %v2402_v22, %v2388_v48  ;;  %v2426_v13 = vmul.f32 %v2388_v48, %v2388_v48  ;;  %v3317_v27 = vpack.c.bf16 %v2388_v48, %v2387_v35  ;;  %v2361_v29 = vpop.f32.mrf.mxu0 }
 0x1a0   : > { %v2312_v28 = vpop.f32.mrf.mxu3  ;;  %v2265_v0 = vpop.f32.mrf.mxu2 }
 0x1a1   : > { %v2441_v34 = vadd.f32 %v2440_v24, %v2426_v13  ;;  %3348 = vst [vmem:[%s4321_s27 + $0x18] sm:$0xff] %v3317_v27   ;;  %v2313_v3 = vadd.f32 %v2312_v28, %v2263_v42 }
 0x1a2   : > { %v1984_v16 = vpop.f32.mrf.mxu1 }
 0x1a3   : > { %v1985_v38 = vadd.f32 %v1984_v16, %v4264_v32  ;;  %v2362_v46 = vadd.f32 %v2361_v29, %v2313_v3  ;;  %v1631_v29 = vadd.f32 %v4294_v14, %v4289_v53 }
 0x1a5   : > { %v2009_v58 = vadd.f32 %v1985_v38, %v1627_v54  ;;  %v2389_v51 = vadd.f32 %v2362_v46, %v2007_v11 }
 0x1a7   : > { %v2404_v55 = vadd.f32 %v2403_v7, %v2389_v51  ;;  %v2427_v17 = vmul.f32 %v2389_v51, %v2389_v51  ;;  %v2363_v18 = vpop.f32.mrf.mxu0 }
 0x1a8   : > { %v2314_v10 = vpop.f32.mrf.mxu3  ;;  %v2268_v8 = vpop.f32.mrf.mxu2 }
 0x1a9   : > { %v2442_v9 = vadd.f32 %v2441_v34, %v2427_v17  ;;  %v2315_v36 = vadd.f32 %v2314_v10, %v2265_v0 }
 0x1aa   : > { %v1986_v31 = vpop.f32.mrf.mxu1 }
 0x1ab   : > { %v1987_v21 = vadd.f32 %v1986_v31, %v4272_v44  ;;  %v2364_v15 = vadd.f32 %v2363_v18, %v2315_v36 }
 0x1ad   : > { %v2010_v49 = vadd.f32 %v1987_v21, %v1628_v37  ;;  %v2390_v32 = vadd.f32 %v2364_v15, %v2008_v1 }
 0x1af   : > { %v2405_v56 = vadd.f32 %v2404_v55, %v2390_v32  ;;  %v2428_v62 = vmul.f32 %v2390_v32, %v2390_v32  ;;  %v3322_v33 = vpack.c.bf16 %v2390_v32, %v2389_v51  ;;  %v2366_v60 = vpop.f32.mrf.mxu0  ;;  %v1632_v55 = vadd.f32 %v4294_v14, %v4303_v52 }
 0x1b0   : > { %v2317_v25 = vpop.f32.mrf.mxu3  ;;  %v2270_v41 = vpop.f32.mrf.mxu2 }
 0x1b1   : > { %v2443_v47 = vadd.f32 %v2442_v9, %v2428_v62  ;;  %3349 = vst [vmem:[%s4321_s27 + $0x20] sm:$0xff] %v3322_v33   ;;  %v2318_v5 = vadd.f32 %v2317_v25, %v2268_v8 }
 0x1b2   : > { %v1989_v4 = vpop.f32.mrf.mxu1 }
 0x1b3   : > { %v1990_v6 = vadd.f32 %v1989_v4, %v4281_v59  ;;  %v2367_v40 = vadd.f32 %v2366_v60, %v2318_v5 }
 0x1b5   : > { %v2011_v44 = vadd.f32 %v1990_v6, %v1629_v30  ;;  %v2391_v11 = vadd.f32 %v2367_v40, %v2009_v58 }
 0x1b7   : > { %v2406_v35 = vadd.f32 %v2405_v56, %v2391_v11  ;;  %v2429_v22 = vmul.f32 %v2391_v11, %v2391_v11  ;;  %v2368_v12 = vpop.f32.mrf.mxu0 }
 0x1b8   : > { %v2319_v50 = vpop.f32.mrf.mxu3  ;;  %v2273_v24 = vpop.f32.mrf.mxu2 }
 0x1b9   : > { %v2444_v39 = vadd.f32 %v2443_v47, %v2429_v22  ;;  %v2320_v45 = vadd.f32 %v2319_v50, %v2270_v41 }
 0x1ba   : > { %v1991_v23 = vpop.f32.mrf.mxu1 }
 0x1bb   : > { %v1992_v63 = vadd.f32 %v1991_v23, %v4286_v61  ;;  %v2369_v42 = vadd.f32 %v2368_v12, %v2320_v45 }
 0x1bd   : > { %v2012_v26 = vadd.f32 %v1992_v63, %v1630_v57  ;;  %v2392_v59 = vadd.f32 %v2369_v42, %v2010_v49 }
 0x1bf   : > { %v2407_v2 = vadd.f32 %v2406_v35, %v2392_v59  ;;  %v2430_v1 = vmul.f32 %v2392_v59, %v2392_v59  ;;  %v3327_v48 = vpack.c.bf16 %v2392_v59, %v2391_v11  ;;  %v2371_v7 = vpop.f32.mrf.mxu0 }
 0x1c0   : > { %v2322_v13 = vpop.f32.mrf.mxu3  ;;  %v2275_v54 = vpop.f32.mrf.mxu2 }
 0x1c1   : > { %v2445_v28 = vadd.f32 %v2444_v39, %v2430_v1  ;;  %3350 = vst [vmem:[%s4321_s27 + $0x28] sm:$0xff] %v3327_v48   ;;  %v2323_v19 = vadd.f32 %v2322_v13, %v2273_v24 }
 0x1c2   : > { %v1994_v27 = vpop.f32.mrf.mxu1 }
 0x1c3   : > { %v1995_v16 = vadd.f32 %v1994_v27, %v4300_v43  ;;  %v2372_v34 = vadd.f32 %v2371_v7, %v2323_v19 }
 0x1c5   : > { %v2013_v61 = vadd.f32 %v1995_v16, %v1631_v29  ;;  %v2393_v3 = vadd.f32 %v2372_v34, %v2011_v44 }
 0x1c7   : > { %v2408_v0 = vadd.f32 %v2407_v2, %v2393_v3  ;;  %v2431_v38 = vmul.f32 %v2393_v3, %v2393_v3  ;;  %v2373_v46 = vpop.f32.mrf.mxu0 }
 0x1c8   : > { %v2324_v58 = vpop.f32.mrf.mxu3  ;;  %v2278_v43 = vpop.f32.mrf.mxu2 }
 0x1c9   : > { %v2446_v17 = vadd.f32 %v2445_v28, %v2431_v38  ;;  %v2325_v53 = vadd.f32 %v2324_v58, %v2275_v54 }
 0x1ca   : > { %v1996_v51 = vpop.f32.mrf.mxu1 }
 0x1cb   : > { %v1997_v18 = vadd.f32 %v1996_v51, %v4307_v20  ;;  %v2374_v10 = vadd.f32 %v2373_v46, %v2325_v53 }
 0x1cd   : > { %v2014_v31 = vadd.f32 %v1997_v18, %v1632_v55  ;;  %v2394_v37 = vadd.f32 %v2374_v10, %v2012_v26 }
 0x1cf   : > { %v2409_v9 = vadd.f32 %v2408_v0, %v2394_v37  ;;  %v2432_v36 = vmul.f32 %v2394_v37, %v2394_v37  ;;  %v3332_v8 = vpack.c.bf16 %v2394_v37, %v2393_v3  ;;  %v2376_v21 = vpop.f32.mrf.mxu0 }
 0x1d0   : > { %v2327_v15 = vpop.f32.mrf.mxu3  ;;  %v2280_v14 = vpop.f32.mrf.mxu2 }
 0x1d1   : > { %v2447_v49 = vadd.f32 %v2446_v17, %v2432_v36  ;;  %3351 = vst [vmem:[%s4321_s27 + $0x30] sm:$0xff] %v3332_v8   ;;  %v2328_v32 = vadd.f32 %v2327_v15, %v2278_v43 }
 0x1d3   : > { %v2377_v56 = vadd.f32 %v2376_v21, %v2328_v32 }
 0x1d5   : > { %v2395_v62 = vadd.f32 %v2377_v56, %v2013_v61 }
 0x1d7   : > { %v2410_v52 = vadd.f32 %v2409_v9, %v2395_v62  ;;  %v2433_v20 = vmul.f32 %v2395_v62, %v2395_v62  ;;  %v2378_v4 = vpop.f32.mrf.mxu0 }
 0x1d8   : > { %v2329_v33 = vpop.f32.mrf.mxu3 }
 0x1d9   : > { %v2448_v60 = vadd.f32 %v2447_v49, %v2433_v20  ;;  %v2330_v25 = vadd.f32 %v2329_v33, %v2280_v14 }
 0x1db   : > { %v2379_v30 = vadd.f32 %v2378_v4, %v2330_v25 }
 0x1dd   : > { %v2396_v47 = vadd.f32 %v2379_v30, %v2014_v31 }
 0x1df   : > { %v2411_v5 = vadd.f32 %v2410_v52, %v2396_v47  ;;  %v2434_v41 = vmul.f32 %v2396_v47, %v2396_v47  ;;  %v3337_v6 = vpack.c.bf16 %v2396_v47, %v2395_v62 }
 0x1e1   : > { %v2412_v40 = vrot.slane %v2411_v5, 4  ;;  %v2449_v44 = vadd.f32 %v2448_v60, %v2434_v41  ;;  %3352 = vst [vmem:[%s4321_s27 + $0x38] sm:$0xff] %v3337_v6  }
 0x1e3   : > { %v2413_v11 = vadd.f32 %v2412_v40, %v2411_v5  ;;  %v2450_v35 = vrot.slane %v2449_v44, 4 }
 0x1e5   : > { %v2414_v22 = vrot.slane %v2413_v11, 2  ;;  %v2451_v12 = vadd.f32 %v2450_v35, %v2449_v44 }
 0x1e7   : > { %v2415_v50 = vadd.f32 %v2414_v22, %v2413_v11  ;;  %v2452_v23 = vrot.slane %v2451_v12, 2 }
 0x1e9   : > { %v2416_v57 = vrot.slane %v2415_v50, 1  ;;  %v2453_v39 = vadd.f32 %v2452_v23, %v2451_v12 }
 0x1eb   : > { %v2417_v45 = vadd.f32 %v2416_v57, %v2415_v50  ;;  %v2454_v24 = vrot.slane %v2453_v39, 1 }
 0x1ed   : > { %2418 = vst [vmem:[%s528_s16] sm:$0x1] %v2417_v45  ;;  %v2455_v63 = vadd.f32 %v2454_v24, %v2453_v39 }
 0x1ef   : > { %2456 = vst [vmem:[%s535_s20] sm:$0x1] %v2455_v63 }
 0x1f0 PF: > { %s20_s13 = sadd.s32 1, %s3465_s13   ;;  %s4412_s30 = smov %s3457_s11 }
 0x1f1   : > { %p17_p13 = scmp.ge.s32.totalorder %s20_s13, 6   ;;  %s4413_s10 = smov %s3461_s12 }
 0x1f2   : > { %s4414_s11 = smov %s4417_s14  ;;  %s4415_s12 = smov %s4421_s15 }
 0x1f3   :  { %19 = sbr.rel (!%p17_p13) target bundleno = 3 (0x3), region = 112 }

</bundles_post_ra>
